<compile_context>
chip_gen: v6e
topology: v6e:2x2x1
jax: 0.10.0
libtpu: 0.0.40
codegen_flags: <defaults>
</compile_context>

<pallas_src>
import math

import jax
import jax.numpy as jnp
import numpy as np
from jax.experimental import pallas as pl
from jax.experimental.pallas import tpu as pltpu


# ----------------------------------------------------------------------------
# Resampling matrices (bilinear align_corners=True, adaptive avg pool)
# ----------------------------------------------------------------------------

def bilinear_matrix(s_in, s_out):
    A = np.zeros((s_out, s_in), np.float32)
    if s_out == 1:
        A[0, 0] = 1.0
        return A
    scale = (s_in - 1) / (s_out - 1)
    for i in range(s_out):
        src = i * scale
        i0 = min(int(math.floor(src)), s_in - 1)
        i1 = min(i0 + 1, s_in - 1)
        w1 = src - i0
        A[i, i0] += 1.0 - w1
        A[i, i1] += w1
    return A


def adaptive_avg_matrix(s_in, s_out):
    A = np.zeros((s_out, s_in), np.float32)
    for i in range(s_out):
        start = (i * s_in) // s_out
        end = -((-(i + 1) * s_in) // s_out)  # ceil((i+1)*s_in/s_out)
        A[i, start:end] = 1.0 / (end - start)
    return A


# ----------------------------------------------------------------------------
# Host-side folding of the module into matmul operands (lane-dense layout)
# ----------------------------------------------------------------------------

def _shift_matrix(n, dy):
    # (Sh @ z)[r] = z[r + dy - 1], zero outside -> conv row shift w/ zero pad.
    Sh = np.zeros((n, n), np.float32)
    for r in range(n):
        c = r + dy - 1
        if 0 <= c < n:
            Sh[r, c] = 1.0
    return Sh


def _col_conv_matrix(taps_dy, w_s, nch):
    # taps_dy: (3, nch) taps of one kernel row. Builds M (w_s*nch, w_s*nch)
    # so that (Z @ M)[h, w*nch + p] = sum_dx Z[h, (w+dx-1)*nch + p] * taps_dy[dx, p]
    # (zero padding at the W borders is implicit).
    M = np.zeros((w_s * nch, w_s * nch), np.float32)
    for w_out in range(w_s):
        for j in range(3):
            w_in = w_out + j - 1
            if 0 <= w_in < w_s:
                M[w_in * nch:(w_in + 1) * nch,
                  w_out * nch:(w_out + 1) * nch] = np.diag(taps_dy[j])
    return M


def _fold_w_resample(A, nch):
    # A: (w_out, w_in) resample matrix along W. Returns (w_in*nch, w_out*nch)
    # acting on the folded (W, channel) lane axis by right-multiplication.
    return np.kron(A.T, np.eye(nch, dtype=np.float32)).astype(np.float32)


def _bn_fold(gamma, beta, mean, var, eps=1e-5):
    scale = gamma / np.sqrt(var + eps)
    return scale, beta - mean * scale


def prepare_epp(params, H, W, scales=(2.0, 1.5, 1.0, 0.5, 0.1), eps=1e-5):
    """Precompute all folded matrices / vectors consumed by the fused kernel."""
    scales = sorted(scales, reverse=True)
    p = {k: np.asarray(v, np.float32) for k, v in params.items()}
    Cin, P = p["proj_w"].shape
    Cout = p["final_w"].shape[1]
    S = len(scales)
    WP = W * P

    def tile_w(vec):
        return np.tile(vec, W).astype(np.float32)   # column index = w*nch + c

    # --- projection CBR: folded 1x1 matmul on the (W, Cin) lane axis ---------
    psc, psh = _bn_fold(p["proj_gamma"], p["proj_beta"], p["proj_mean"],
                        p["proj_var"], eps)
    proj_w_big = np.kron(np.eye(W, dtype=np.float32), p["proj_w"])  # (W*Cin, W*P)
    pv = np.stack([tile_w(psc), tile_w(psh), tile_w(p["proj_alpha"])])[:, None, :]

    # --- per-branch folded (resample-down -> dwconv3x3 -> resample-up) ------
    L = np.zeros((S, 3, H, H), np.float32)
    R = np.zeros((S, 3, WP, WP), np.float32)
    Mm = np.zeros((S, 3, WP, WP), np.float32)     # merge grouped-conv column taps
    brv = np.zeros((S, 3, 1, WP), np.float32)     # per-branch slice of BR(S*P)
    m1sc, m1sh = _bn_fold(p["mbn1_gamma"], p["mbn1_beta"], p["mbn1_mean"],
                          p["mbn1_var"], eps)
    for b, s in enumerate(scales):
        h_s = int(math.ceil(H * s)); h_s = h_s if h_s > 5 else 5
        w_s = int(math.ceil(W * s)); w_s = w_s if w_s > 5 else 5
        if s < 1.0:
            Ah = adaptive_avg_matrix(H, h_s); Aw = adaptive_avg_matrix(W, w_s)
            Uh = bilinear_matrix(h_s, H);     Uw = bilinear_matrix(w_s, W)
        elif s > 1.0:
            Ah = bilinear_matrix(H, h_s);     Aw = bilinear_matrix(W, w_s)
            Uh = adaptive_avg_matrix(h_s, H); Uw = adaptive_avg_matrix(w_s, W)
        else:
            Ah = Uh = np.eye(H, dtype=np.float32)
            Aw = Uw = np.eye(W, dtype=np.float32)
        Dw = _fold_w_resample(Aw, P)     # (W*P, w_s*P)
        UwF = _fold_w_resample(Uw, P)    # (w_s*P, W*P)
        taps = p["stage_w"][b]           # (9, P), index = dy*3 + dx
        for dy in range(3):
            L[b, dy] = Uh @ _shift_matrix(h_s, dy) @ Ah                  # (H, H)
            R[b, dy] = Dw @ _col_conv_matrix(taps[dy * 3:(dy + 1) * 3], w_s, P) @ UwF
            Mm[b, dy] = _col_conv_matrix(p["merge_w"][b][dy * 3:(dy + 1) * 3], W, P)
        brv[b, 0, 0] = tile_w(m1sc[b * P:(b + 1) * P])
        brv[b, 1, 0] = tile_w(m1sh[b * P:(b + 1) * P])
        brv[b, 2, 0] = tile_w(p["mbn1_alpha"][b * P:(b + 1) * P])

    Shm = np.stack([_shift_matrix(H, dy) for dy in range(3)])            # (3, H, H)
    msc, msh = _bn_fold(p["mcbr_gamma"], p["mcbr_beta"], p["mcbr_mean"],
                        p["mcbr_var"], eps)
    mv = np.stack([tile_w(msc), tile_w(msh), tile_w(p["mcbr_alpha"])])[:, None, :]

    # --- final 1x1 conv + final BR ------------------------------------------
    final_w_big = np.kron(np.eye(W, dtype=np.float32), p["final_w"])     # (W*P, W*Cout)
    fsc, fsh = _bn_fold(p["br_gamma"], p["br_beta"], p["br_mean"], p["br_var"], eps)
    fv = np.stack([tile_w(fsc), tile_w(fsh), tile_w(p["br_alpha"])])[:, None, :]

    return dict(
        proj_w_big=jnp.asarray(proj_w_big), pv=jnp.asarray(pv),
        L=jnp.asarray(L), R=jnp.asarray(R), brv=jnp.asarray(brv),
        Shm=jnp.asarray(Shm), Mm=jnp.asarray(Mm), mv=jnp.asarray(mv),
        final_w_big=jnp.asarray(final_w_big), fv=jnp.asarray(fv),
        meta=dict(H=H, W=W, Cin=Cin, P=P, Cout=Cout, S=S),
    )


# ----------------------------------------------------------------------------
# The fused Pallas kernel: whole EfficientPyrPool forward for one image.
# ----------------------------------------------------------------------------

def _epp_kernel(x_ref, pw_ref, pv_ref, L_ref, R_ref, brv_ref,
                Shm_ref, Mm_ref, mv_ref, fw_ref, fv_ref, o_ref):
    S = L_ref.shape[0]

    # projection: 1x1 conv (folded to lane-dense matmul) + BN + PReLU
    x = x_ref[0]                                                        # (H, W*Cin)
    xp = jnp.dot(x, pw_ref[...], preferred_element_type=jnp.float32)   # (H, W*P)
    xp = xp * pv_ref[0] + pv_ref[1]
    xp = jnp.where(xp >= 0.0, xp, xp * pv_ref[2])

    acc_m = jnp.zeros(xp.shape, jnp.float32)   # merge-conv accumulator (H, W*P)
    for b in range(S):
        # branch b: resample-down -> depthwise 3x3 -> resample-up, all folded
        # into three left/right matmul pairs; intermediate stays in VMEM/vregs.
        acc_b = jnp.zeros(xp.shape, jnp.float32)
        for dy in range(3):
            t = jnp.dot(L_ref[b, dy], xp, preferred_element_type=jnp.float32)
            acc_b = acc_b + jnp.dot(t, R_ref[b, dy],
                                    preferred_element_type=jnp.float32)
        # per-branch slice of the BR(S*P) (folded BN + PReLU)
        yb = acc_b * brv_ref[b, 0] + brv_ref[b, 1]
        yb = jnp.where(yb >= 0.0, yb, yb * brv_ref[b, 2])
        # Shuffle(groups=S) + grouped 3x3 conv contribution of this branch
        for dy in range(3):
            t2 = jnp.dot(Shm_ref[dy], yb, preferred_element_type=jnp.float32)
            acc_m = acc_m + jnp.dot(t2, Mm_ref[b, dy],
                                    preferred_element_type=jnp.float32)

    # merge CBR post-ops (folded BN + PReLU)
    m = acc_m * mv_ref[0] + mv_ref[1]
    m = jnp.where(m >= 0.0, m, m * mv_ref[2])

    # final 1x1 conv + final BR, lane-dense output store
    out = jnp.dot(m, fw_ref[...], preferred_element_type=jnp.float32)   # (H, W*Cout)
    out = out * fv_ref[0] + fv_ref[1]
    out = jnp.where(out >= 0.0, out, out * fv_ref[2])
    o_ref[0] = out.astype(o_ref.dtype)


def efficient_pyr_pool(x_nchw, prep):
    meta = prep["meta"]
    H, W, Cin, P, Cout, S = (meta[k] for k in ("H", "W", "Cin", "P", "Cout", "S"))
    N = x_nchw.shape[0]
    WP, WCin, WCout = W * P, W * Cin, W * Cout

    # NCHW -> (N, H, W*Cin): channels folded into the lane axis (lane-dense).
    x = jnp.transpose(x_nchw.astype(jnp.float32), (0, 2, 3, 1)).reshape(N, H, WCin)

    out = pl.pallas_call(
        _epp_kernel,
        out_shape=jax.ShapeDtypeStruct((N, H, WCout), jnp.float32),
        grid=(N,),
        in_specs=[
            pl.BlockSpec((1, H, WCin), lambda n: (n, 0, 0)),
            pl.BlockSpec((WCin, WP), lambda n: (0, 0)),
            pl.BlockSpec((3, 1, WP), lambda n: (0, 0, 0)),
            pl.BlockSpec((S, 3, H, H), lambda n: (0, 0, 0, 0)),
            pl.BlockSpec((S, 3, WP, WP), lambda n: (0, 0, 0, 0)),
            pl.BlockSpec((S, 3, 1, WP), lambda n: (0, 0, 0, 0)),
            pl.BlockSpec((3, H, H), lambda n: (0, 0, 0)),
            pl.BlockSpec((S, 3, WP, WP), lambda n: (0, 0, 0, 0)),
            pl.BlockSpec((3, 1, WP), lambda n: (0, 0, 0)),
            pl.BlockSpec((WP, WCout), lambda n: (0, 0)),
            pl.BlockSpec((3, 1, WCout), lambda n: (0, 0, 0)),
        ],
        out_specs=pl.BlockSpec((1, H, WCout), lambda n: (n, 0, 0)),
        compiler_params=pltpu.CompilerParams(
            dimension_semantics=("parallel",),          # batch over both TCs
            vmem_limit_bytes=32 * 1024 * 1024,
        ),
    )(x, prep["proj_w_big"], prep["pv"], prep["L"], prep["R"], prep["brv"],
      prep["Shm"], prep["Mm"], prep["mv"], prep["final_w_big"], prep["fv"])

    out = out.reshape(N, H, W, Cout)
    return jnp.transpose(out, (0, 3, 1, 2))  # back to NCHW


# ----------------------------------------------------------------------------
# Deterministic parameter init (synthetic; mirrors the PyTorch module's shapes)
# ----------------------------------------------------------------------------

def init_params(key, in_planes, proj_planes, out_planes, num_scales=5):
    ks = jax.random.split(key, 20)
    P = proj_planes

    def u(k, shape, lo=0.5, hi=1.5):
        return jax.random.uniform(k, shape, jnp.float32, lo, hi)

    def n(k, shape, s=0.1):
        return jax.random.normal(k, shape, jnp.float32) * s

    return dict(
        proj_w=n(ks[0], (in_planes, P), 0.3),
        proj_gamma=u(ks[1], (P,)), proj_beta=n(ks[2], (P,)),
        proj_mean=n(ks[3], (P,)), proj_var=u(ks[4], (P,)),
        proj_alpha=jnp.full((P,), 0.25, jnp.float32),
        stage_w=n(ks[5], (num_scales, 9, P), 0.3),
        mbn1_gamma=u(ks[6], (num_scales * P,)), mbn1_beta=n(ks[7], (num_scales * P,)),
        mbn1_mean=n(ks[8], (num_scales * P,)), mbn1_var=u(ks[9], (num_scales * P,)),
        mbn1_alpha=jnp.full((num_scales * P,), 0.25, jnp.float32),
        # grouped CBR weight indexed as w[branch, tap, proj_channel]
        # (== PyTorch weight[p, branch, ky, kx] after the Shuffle)
        merge_w=n(ks[10], (num_scales, 9, P), 0.3),
        mcbr_gamma=u(ks[11], (P,)), mcbr_beta=n(ks[12], (P,)),
        mcbr_mean=n(ks[13], (P,)), mcbr_var=u(ks[14], (P,)),
        mcbr_alpha=jnp.full((P,), 0.25, jnp.float32),
        final_w=n(ks[15], (P, out_planes), 0.3),
        br_gamma=u(ks[16], (out_planes,)), br_beta=n(ks[17], (out_planes,)),
        br_mean=n(ks[18], (out_planes,)), br_var=u(ks[19], (out_planes,)),
        br_alpha=jnp.full((out_planes,), 0.25, jnp.float32),
    )


# ----------------------------------------------------------------------------
# Straightforward float64 numpy reference (unfused) used as a self-check.
# ----------------------------------------------------------------------------

def _reference_forward(x_nchw, params, scales, eps=1e-5):
    x = np.asarray(x_nchw, np.float64).transpose(0, 2, 3, 1)   # NHWC
    N, H, W, _ = x.shape
    p = {k: np.asarray(v, np.float64) for k, v in params.items()}
    P = p["proj_w"].shape[1]
    scales = sorted(scales, reverse=True)
    S = len(scales)

    def bn(y, g, b, m, v):
        return (y - m) / np.sqrt(v + eps) * g + b

    def prelu(y, a):
        return np.where(y >= 0, y, y * a)

    def dwconv(z, taps):
        n_, h_, w_, c_ = z.shape
        zp = np.zeros((n_, h_ + 2, w_ + 2, c_), z.dtype)
        zp[:, 1:-1, 1:-1, :] = z
        out = np.zeros_like(z)
        for k in range(9):
            dy, dx = k // 3, k % 3
            out += zp[:, dy:dy + h_, dx:dx + w_, :] * taps[k]
        return out

    def resample(z, Ah, Aw):
        z = np.einsum('ah,nhwc->nawc', Ah.astype(np.float64), z)
        return np.einsum('bw,nawc->nabc', Aw.astype(np.float64), z)

    xp = np.einsum('nhwc,cp->nhwp', x, p["proj_w"])
    xp = prelu(bn(xp, p["proj_gamma"], p["proj_beta"], p["proj_mean"], p["proj_var"]),
               p["proj_alpha"])

    branches = []
    for i, s in enumerate(scales):
        h_s = int(math.ceil(H * s)); h_s = h_s if h_s > 5 else 5
        w_s = int(math.ceil(W * s)); w_s = w_s if w_s > 5 else 5
        taps = p["stage_w"][i]
        if s < 1.0:
            h = resample(xp, adaptive_avg_matrix(H, h_s), adaptive_avg_matrix(W, w_s))
            h = dwconv(h, taps)
            h = resample(h, bilinear_matrix(h_s, H), bilinear_matrix(w_s, W))
        elif s > 1.0:
            h = resample(xp, bilinear_matrix(H, h_s), bilinear_matrix(W, w_s))
            h = dwconv(h, taps)
            h = resample(h, adaptive_avg_matrix(h_s, H), adaptive_avg_matrix(w_s, W))
        else:
            h = dwconv(xp, taps)
        branches.append(h)

    cat = np.concatenate(branches, axis=-1)
    cat = prelu(bn(cat, p["mbn1_gamma"], p["mbn1_beta"], p["mbn1_mean"], p["mbn1_var"]),
                p["mbn1_alpha"])
    merged = np.zeros((N, H, W, P), np.float64)
    for b in range(S):
        merged += dwconv(cat[..., b * P:(b + 1) * P], p["merge_w"][b])
    merged = prelu(bn(merged, p["mcbr_gamma"], p["mcbr_beta"], p["mcbr_mean"],
                      p["mcbr_var"]), p["mcbr_alpha"])
    out = np.einsum('nhwp,po->nhwo', merged, p["final_w"])
    out = prelu(bn(out, p["br_gamma"], p["br_beta"], p["br_mean"], p["br_var"]),
                p["br_alpha"])
    return out.transpose(0, 3, 1, 2)


if __name__ == "__main__":
    key = jax.random.PRNGKey(0)
    k_x, k_p = jax.random.split(key)

    batch, in_planes, H, W = 2, 16, 16, 16
    proj_planes, out_planes = 8, 8
    scales = (2.0, 1.5, 1.0, 0.5, 0.1)

    x = jax.random.normal(k_x, (batch, in_planes, H, W), jnp.float32)  # NCHW input
    params = init_params(k_p, in_planes, proj_planes, out_planes, num_scales=len(scales))

    prep = prepare_epp(params, H, W, scales)
    out = efficient_pyr_pool(x, prep)
    out = jax.block_until_ready(out)

    assert out.shape == (batch, out_planes, H, W), out.shape
    assert bool(jnp.all(jnp.isfinite(out)))

    ref = _reference_forward(np.asarray(x), params, scales)
    assert np.allclose(np.asarray(out, np.float64), ref, rtol=5e-2, atol=5e-2), (
        float(np.max(np.abs(np.asarray(out, np.float64) - ref))))

    print("KERNEL_OK")
</pallas_src>

<mosaic_0001>
module attributes {stable_mosaic.version = 11 : i64} {
  func.func @_epp_kernel(%arg0: i32, %arg1: memref<1x16x256xf32, #tpu.memory_space<vmem>>, %arg2: memref<256x128xf32, #tpu.memory_space<vmem>>, %arg3: memref<3x1x128xf32, #tpu.memory_space<vmem>>, %arg4: memref<5x3x16x16xf32, #tpu.memory_space<vmem>>, %arg5: memref<5x3x128x128xf32, #tpu.memory_space<vmem>>, %arg6: memref<5x3x1x128xf32, #tpu.memory_space<vmem>>, %arg7: memref<3x16x16xf32, #tpu.memory_space<vmem>>, %arg8: memref<5x3x128x128xf32, #tpu.memory_space<vmem>>, %arg9: memref<3x1x128xf32, #tpu.memory_space<vmem>>, %arg10: memref<128x128xf32, #tpu.memory_space<vmem>>, %arg11: memref<3x1x128xf32, #tpu.memory_space<vmem>>, %arg12: memref<1x16x128xf32, #tpu.memory_space<vmem>>) attributes {dimension_semantics = [#tpu.dimension_semantics<parallel>], iteration_bounds = array<i64: 2>, scalar_prefetch = 0 : i64, scratch_operands = 0 : i64, tpu.core_type = #tpu.core_type<tc>, window_params = [{transform_indices = @transform_0, window_bounds = array<i64: 1, 16, 256>}, {pipeline_mode = #tpu.pipeline_mode<synchronous>, transform_indices = @transform_1, window_bounds = array<i64: 256, 128>}, {pipeline_mode = #tpu.pipeline_mode<synchronous>, transform_indices = @transform_2, window_bounds = array<i64: 3, 1, 128>}, {pipeline_mode = #tpu.pipeline_mode<synchronous>, transform_indices = @transform_3, window_bounds = array<i64: 5, 3, 16, 16>}, {pipeline_mode = #tpu.pipeline_mode<synchronous>, transform_indices = @transform_4, window_bounds = array<i64: 5, 3, 128, 128>}, {pipeline_mode = #tpu.pipeline_mode<synchronous>, transform_indices = @transform_5, window_bounds = array<i64: 5, 3, 1, 128>}, {pipeline_mode = #tpu.pipeline_mode<synchronous>, transform_indices = @transform_6, window_bounds = array<i64: 3, 16, 16>}, {pipeline_mode = #tpu.pipeline_mode<synchronous>, transform_indices = @transform_7, window_bounds = array<i64: 5, 3, 128, 128>}, {pipeline_mode = #tpu.pipeline_mode<synchronous>, transform_indices = @transform_8, window_bounds = array<i64: 3, 1, 128>}, {pipeline_mode = #tpu.pipeline_mode<synchronous>, transform_indices = @transform_9, window_bounds = array<i64: 128, 128>}, {pipeline_mode = #tpu.pipeline_mode<synchronous>, transform_indices = @transform_10, window_bounds = array<i64: 3, 1, 128>}, {transform_indices = @transform_11, window_bounds = array<i64: 1, 16, 128>}]} {
    %c0 = arith.constant 0 : index
    %c0_0 = arith.constant 0 : index
    %c0_1 = arith.constant 0 : index
    %0 = vector.load %arg1[%c0, %c0_0, %c0_1] : memref<1x16x256xf32, #tpu.memory_space<vmem>>, vector<1x16x256xf32>
    %1 = vector.shape_cast %0 : vector<1x16x256xf32> to vector<16x256xf32>
    %c0_2 = arith.constant 0 : index
    %c0_3 = arith.constant 0 : index
    %2 = vector.load %arg2[%c0_2, %c0_3] : memref<256x128xf32, #tpu.memory_space<vmem>>, vector<256x128xf32>
    %cst = arith.constant dense<0.000000e+00> : vector<16x128xf32>
    %3 = tpu.matmul %1, %2, %cst {dimension_numbers = #tpu.dot_dimension_numbers<[1], [0], [0], [1], [0, 0, 1, 1], [], []>} : vector<16x256xf32>, vector<256x128xf32>, vector<16x128xf32> -> vector<16x128xf32>
    %c0_4 = arith.constant 0 : index
    %c0_5 = arith.constant 0 : index
    %c0_6 = arith.constant 0 : index
    %4 = vector.load %arg3[%c0_4, %c0_5, %c0_6] : memref<3x1x128xf32, #tpu.memory_space<vmem>>, vector<1x1x128xf32>
    %5 = vector.shape_cast %4 : vector<1x1x128xf32> to vector<1x128xf32>
    %6 = vector.broadcast %5 : vector<1x128xf32> to vector<16x128xf32>
    %7 = arith.mulf %3, %6 : vector<16x128xf32>
    %c1 = arith.constant 1 : index
    %c0_7 = arith.constant 0 : index
    %c0_8 = arith.constant 0 : index
    %8 = vector.load %arg3[%c1, %c0_7, %c0_8] : memref<3x1x128xf32, #tpu.memory_space<vmem>>, vector<1x1x128xf32>
    %9 = vector.shape_cast %8 : vector<1x1x128xf32> to vector<1x128xf32>
    %10 = vector.broadcast %9 : vector<1x128xf32> to vector<16x128xf32>
    %11 = arith.addf %7, %10 : vector<16x128xf32>
    %cst_9 = arith.constant 0.000000e+00 : f32
    %12 = vector.broadcast %cst_9 : f32 to vector<16x128xf32>
    %13 = arith.cmpf oge, %11, %12 : vector<16x128xf32>
    %c2 = arith.constant 2 : index
    %c0_10 = arith.constant 0 : index
    %c0_11 = arith.constant 0 : index
    %14 = vector.load %arg3[%c2, %c0_10, %c0_11] : memref<3x1x128xf32, #tpu.memory_space<vmem>>, vector<1x1x128xf32>
    %15 = vector.shape_cast %14 : vector<1x1x128xf32> to vector<1x128xf32>
    %16 = vector.broadcast %15 : vector<1x128xf32> to vector<16x128xf32>
    %17 = arith.mulf %11, %16 : vector<16x128xf32>
    %18 = arith.select %13, %11, %17 : vector<16x128xi1>, vector<16x128xf32>
    %cst_12 = arith.constant 0.000000e+00 : f32
    %19 = vector.broadcast %cst_12 : f32 to vector<16x128xf32>
    %cst_13 = arith.constant 0.000000e+00 : f32
    %20 = vector.broadcast %cst_13 : f32 to vector<16x128xf32>
    %c0_14 = arith.constant 0 : index
    %c0_15 = arith.constant 0 : index
    %c0_16 = arith.constant 0 : index
    %c0_17 = arith.constant 0 : index
    %21 = vector.load %arg4[%c0_14, %c0_15, %c0_16, %c0_17] : memref<5x3x16x16xf32, #tpu.memory_space<vmem>>, vector<1x1x16x16xf32>
    %22 = vector.shape_cast %21 : vector<1x1x16x16xf32> to vector<16x16xf32>
    %cst_18 = arith.constant dense<0.000000e+00> : vector<16x128xf32>
    %23 = tpu.matmul %22, %18, %cst_18 {dimension_numbers = #tpu.dot_dimension_numbers<[1], [0], [0], [1], [0, 0, 1, 1], [], []>} : vector<16x16xf32>, vector<16x128xf32>, vector<16x128xf32> -> vector<16x128xf32>
    %c0_19 = arith.constant 0 : index
    %c0_20 = arith.constant 0 : index
    %c0_21 = arith.constant 0 : index
    %c0_22 = arith.constant 0 : index
    %24 = vector.load %arg5[%c0_19, %c0_20, %c0_21, %c0_22] : memref<5x3x128x128xf32, #tpu.memory_space<vmem>>, vector<1x1x128x128xf32>
    %25 = vector.shape_cast %24 : vector<1x1x128x128xf32> to vector<128x128xf32>
    %cst_23 = arith.constant dense<0.000000e+00> : vector<16x128xf32>
    %26 = tpu.matmul %23, %25, %cst_23 {dimension_numbers = #tpu.dot_dimension_numbers<[1], [0], [0], [1], [0, 0, 1, 1], [], []>} : vector<16x128xf32>, vector<128x128xf32>, vector<16x128xf32> -> vector<16x128xf32>
    %27 = arith.addf %20, %26 : vector<16x128xf32>
    %c0_24 = arith.constant 0 : index
    %c1_25 = arith.constant 1 : index
    %c0_26 = arith.constant 0 : index
    %c0_27 = arith.constant 0 : index
    %28 = vector.load %arg4[%c0_24, %c1_25, %c0_26, %c0_27] : memref<5x3x16x16xf32, #tpu.memory_space<vmem>>, vector<1x1x16x16xf32>
    %29 = vector.shape_cast %28 : vector<1x1x16x16xf32> to vector<16x16xf32>
    %cst_28 = arith.constant dense<0.000000e+00> : vector<16x128xf32>
    %30 = tpu.matmul %29, %18, %cst_28 {dimension_numbers = #tpu.dot_dimension_numbers<[1], [0], [0], [1], [0, 0, 1, 1], [], []>} : vector<16x16xf32>, vector<16x128xf32>, vector<16x128xf32> -> vector<16x128xf32>
    %c0_29 = arith.constant 0 : index
    %c1_30 = arith.constant 1 : index
    %c0_31 = arith.constant 0 : index
    %c0_32 = arith.constant 0 : index
    %31 = vector.load %arg5[%c0_29, %c1_30, %c0_31, %c0_32] : memref<5x3x128x128xf32, #tpu.memory_space<vmem>>, vector<1x1x128x128xf32>
    %32 = vector.shape_cast %31 : vector<1x1x128x128xf32> to vector<128x128xf32>
    %cst_33 = arith.constant dense<0.000000e+00> : vector<16x128xf32>
    %33 = tpu.matmul %30, %32, %cst_33 {dimension_numbers = #tpu.dot_dimension_numbers<[1], [0], [0], [1], [0, 0, 1, 1], [], []>} : vector<16x128xf32>, vector<128x128xf32>, vector<16x128xf32> -> vector<16x128xf32>
    %34 = arith.addf %27, %33 : vector<16x128xf32>
    %c0_34 = arith.constant 0 : index
    %c2_35 = arith.constant 2 : index
    %c0_36 = arith.constant 0 : index
    %c0_37 = arith.constant 0 : index
    %35 = vector.load %arg4[%c0_34, %c2_35, %c0_36, %c0_37] : memref<5x3x16x16xf32, #tpu.memory_space<vmem>>, vector<1x1x16x16xf32>
    %36 = vector.shape_cast %35 : vector<1x1x16x16xf32> to vector<16x16xf32>
    %cst_38 = arith.constant dense<0.000000e+00> : vector<16x128xf32>
    %37 = tpu.matmul %36, %18, %cst_38 {dimension_numbers = #tpu.dot_dimension_numbers<[1], [0], [0], [1], [0, 0, 1, 1], [], []>} : vector<16x16xf32>, vector<16x128xf32>, vector<16x128xf32> -> vector<16x128xf32>
    %c0_39 = arith.constant 0 : index
    %c2_40 = arith.constant 2 : index
    %c0_41 = arith.constant 0 : index
    %c0_42 = arith.constant 0 : index
    %38 = vector.load %arg5[%c0_39, %c2_40, %c0_41, %c0_42] : memref<5x3x128x128xf32, #tpu.memory_space<vmem>>, vector<1x1x128x128xf32>
    %39 = vector.shape_cast %38 : vector<1x1x128x128xf32> to vector<128x128xf32>
    %cst_43 = arith.constant dense<0.000000e+00> : vector<16x128xf32>
    %40 = tpu.matmul %37, %39, %cst_43 {dimension_numbers = #tpu.dot_dimension_numbers<[1], [0], [0], [1], [0, 0, 1, 1], [], []>} : vector<16x128xf32>, vector<128x128xf32>, vector<16x128xf32> -> vector<16x128xf32>
    %41 = arith.addf %34, %40 : vector<16x128xf32>
    %c0_44 = arith.constant 0 : index
    %c0_45 = arith.constant 0 : index
    %c0_46 = arith.constant 0 : index
    %c0_47 = arith.constant 0 : index
    %42 = vector.load %arg6[%c0_44, %c0_45, %c0_46, %c0_47] : memref<5x3x1x128xf32, #tpu.memory_space<vmem>>, vector<1x1x1x128xf32>
    %43 = vector.shape_cast %42 : vector<1x1x1x128xf32> to vector<1x128xf32>
    %44 = vector.broadcast %43 : vector<1x128xf32> to vector<16x128xf32>
    %45 = arith.mulf %41, %44 : vector<16x128xf32>
    %c0_48 = arith.constant 0 : index
    %c1_49 = arith.constant 1 : index
    %c0_50 = arith.constant 0 : index
    %c0_51 = arith.constant 0 : index
    %46 = vector.load %arg6[%c0_48, %c1_49, %c0_50, %c0_51] : memref<5x3x1x128xf32, #tpu.memory_space<vmem>>, vector<1x1x1x128xf32>
    %47 = vector.shape_cast %46 : vector<1x1x1x128xf32> to vector<1x128xf32>
    %48 = vector.broadcast %47 : vector<1x128xf32> to vector<16x128xf32>
    %49 = arith.addf %45, %48 : vector<16x128xf32>
    %cst_52 = arith.constant 0.000000e+00 : f32
    %50 = vector.broadcast %cst_52 : f32 to vector<16x128xf32>
    %51 = arith.cmpf oge, %49, %50 : vector<16x128xf32>
    %c0_53 = arith.constant 0 : index
    %c2_54 = arith.constant 2 : index
    %c0_55 = arith.constant 0 : index
    %c0_56 = arith.constant 0 : index
    %52 = vector.load %arg6[%c0_53, %c2_54, %c0_55, %c0_56] : memref<5x3x1x128xf32, #tpu.memory_space<vmem>>, vector<1x1x1x128xf32>
    %53 = vector.shape_cast %52 : vector<1x1x1x128xf32> to vector<1x128xf32>
    %54 = vector.broadcast %53 : vector<1x128xf32> to vector<16x128xf32>
    %55 = arith.mulf %49, %54 : vector<16x128xf32>
    %56 = arith.select %51, %49, %55 : vector<16x128xi1>, vector<16x128xf32>
    %c0_57 = arith.constant 0 : index
    %c0_58 = arith.constant 0 : index
    %c0_59 = arith.constant 0 : index
    %57 = vector.load %arg7[%c0_57, %c0_58, %c0_59] : memref<3x16x16xf32, #tpu.memory_space<vmem>>, vector<1x16x16xf32>
    %58 = vector.shape_cast %57 : vector<1x16x16xf32> to vector<16x16xf32>
    %cst_60 = arith.constant dense<0.000000e+00> : vector<16x128xf32>
    %59 = tpu.matmul %58, %56, %cst_60 {dimension_numbers = #tpu.dot_dimension_numbers<[1], [0], [0], [1], [0, 0, 1, 1], [], []>} : vector<16x16xf32>, vector<16x128xf32>, vector<16x128xf32> -> vector<16x128xf32>
    %c0_61 = arith.constant 0 : index
    %c0_62 = arith.constant 0 : index
    %c0_63 = arith.constant 0 : index
    %c0_64 = arith.constant 0 : index
    %60 = vector.load %arg8[%c0_61, %c0_62, %c0_63, %c0_64] : memref<5x3x128x128xf32, #tpu.memory_space<vmem>>, vector<1x1x128x128xf32>
    %61 = vector.shape_cast %60 : vector<1x1x128x128xf32> to vector<128x128xf32>
    %cst_65 = arith.constant dense<0.000000e+00> : vector<16x128xf32>
    %62 = tpu.matmul %59, %61, %cst_65 {dimension_numbers = #tpu.dot_dimension_numbers<[1], [0], [0], [1], [0, 0, 1, 1], [], []>} : vector<16x128xf32>, vector<128x128xf32>, vector<16x128xf32> -> vector<16x128xf32>
    %63 = arith.addf %19, %62 : vector<16x128xf32>
    %c1_66 = arith.constant 1 : index
    %c0_67 = arith.constant 0 : index
    %c0_68 = arith.constant 0 : index
    %64 = vector.load %arg7[%c1_66, %c0_67, %c0_68] : memref<3x16x16xf32, #tpu.memory_space<vmem>>, vector<1x16x16xf32>
    %65 = vector.shape_cast %64 : vector<1x16x16xf32> to vector<16x16xf32>
    %cst_69 = arith.constant dense<0.000000e+00> : vector<16x128xf32>
    %66 = tpu.matmul %65, %56, %cst_69 {dimension_numbers = #tpu.dot_dimension_numbers<[1], [0], [0], [1], [0, 0, 1, 1], [], []>} : vector<16x16xf32>, vector<16x128xf32>, vector<16x128xf32> -> vector<16x128xf32>
    %c0_70 = arith.constant 0 : index
    %c1_71 = arith.constant 1 : index
    %c0_72 = arith.constant 0 : index
    %c0_73 = arith.constant 0 : index
    %67 = vector.load %arg8[%c0_70, %c1_71, %c0_72, %c0_73] : memref<5x3x128x128xf32, #tpu.memory_space<vmem>>, vector<1x1x128x128xf32>
    %68 = vector.shape_cast %67 : vector<1x1x128x128xf32> to vector<128x128xf32>
    %cst_74 = arith.constant dense<0.000000e+00> : vector<16x128xf32>
    %69 = tpu.matmul %66, %68, %cst_74 {dimension_numbers = #tpu.dot_dimension_numbers<[1], [0], [0], [1], [0, 0, 1, 1], [], []>} : vector<16x128xf32>, vector<128x128xf32>, vector<16x128xf32> -> vector<16x128xf32>
    %70 = arith.addf %63, %69 : vector<16x128xf32>
    %c2_75 = arith.constant 2 : index
    %c0_76 = arith.constant 0 : index
    %c0_77 = arith.constant 0 : index
    %71 = vector.load %arg7[%c2_75, %c0_76, %c0_77] : memref<3x16x16xf32, #tpu.memory_space<vmem>>, vector<1x16x16xf32>
    %72 = vector.shape_cast %71 : vector<1x16x16xf32> to vector<16x16xf32>
    %cst_78 = arith.constant dense<0.000000e+00> : vector<16x128xf32>
    %73 = tpu.matmul %72, %56, %cst_78 {dimension_numbers = #tpu.dot_dimension_numbers<[1], [0], [0], [1], [0, 0, 1, 1], [], []>} : vector<16x16xf32>, vector<16x128xf32>, vector<16x128xf32> -> vector<16x128xf32>
    %c0_79 = arith.constant 0 : index
    %c2_80 = arith.constant 2 : index
    %c0_81 = arith.constant 0 : index
    %c0_82 = arith.constant 0 : index
    %74 = vector.load %arg8[%c0_79, %c2_80, %c0_81, %c0_82] : memref<5x3x128x128xf32, #tpu.memory_space<vmem>>, vector<1x1x128x128xf32>
    %75 = vector.shape_cast %74 : vector<1x1x128x128xf32> to vector<128x128xf32>
    %cst_83 = arith.constant dense<0.000000e+00> : vector<16x128xf32>
    %76 = tpu.matmul %73, %75, %cst_83 {dimension_numbers = #tpu.dot_dimension_numbers<[1], [0], [0], [1], [0, 0, 1, 1], [], []>} : vector<16x128xf32>, vector<128x128xf32>, vector<16x128xf32> -> vector<16x128xf32>
    %77 = arith.addf %70, %76 : vector<16x128xf32>
    %cst_84 = arith.constant 0.000000e+00 : f32
    %78 = vector.broadcast %cst_84 : f32 to vector<16x128xf32>
    %c1_85 = arith.constant 1 : index
    %c0_86 = arith.constant 0 : index
    %c0_87 = arith.constant 0 : index
    %c0_88 = arith.constant 0 : index
    %79 = vector.load %arg4[%c1_85, %c0_86, %c0_87, %c0_88] : memref<5x3x16x16xf32, #tpu.memory_space<vmem>>, vector<1x1x16x16xf32>
    %80 = vector.shape_cast %79 : vector<1x1x16x16xf32> to vector<16x16xf32>
    %cst_89 = arith.constant dense<0.000000e+00> : vector<16x128xf32>
    %81 = tpu.matmul %80, %18, %cst_89 {dimension_numbers = #tpu.dot_dimension_numbers<[1], [0], [0], [1], [0, 0, 1, 1], [], []>} : vector<16x16xf32>, vector<16x128xf32>, vector<16x128xf32> -> vector<16x128xf32>
    %c1_90 = arith.constant 1 : index
    %c0_91 = arith.constant 0 : index
    %c0_92 = arith.constant 0 : index
    %c0_93 = arith.constant 0 : index
    %82 = vector.load %arg5[%c1_90, %c0_91, %c0_92, %c0_93] : memref<5x3x128x128xf32, #tpu.memory_space<vmem>>, vector<1x1x128x128xf32>
    %83 = vector.shape_cast %82 : vector<1x1x128x128xf32> to vector<128x128xf32>
    %cst_94 = arith.constant dense<0.000000e+00> : vector<16x128xf32>
    %84 = tpu.matmul %81, %83, %cst_94 {dimension_numbers = #tpu.dot_dimension_numbers<[1], [0], [0], [1], [0, 0, 1, 1], [], []>} : vector<16x128xf32>, vector<128x128xf32>, vector<16x128xf32> -> vector<16x128xf32>
    %85 = arith.addf %78, %84 : vector<16x128xf32>
    %c1_95 = arith.constant 1 : index
    %c1_96 = arith.constant 1 : index
    %c0_97 = arith.constant 0 : index
    %c0_98 = arith.constant 0 : index
    %86 = vector.load %arg4[%c1_95, %c1_96, %c0_97, %c0_98] : memref<5x3x16x16xf32, #tpu.memory_space<vmem>>, vector<1x1x16x16xf32>
    %87 = vector.shape_cast %86 : vector<1x1x16x16xf32> to vector<16x16xf32>
    %cst_99 = arith.constant dense<0.000000e+00> : vector<16x128xf32>
    %88 = tpu.matmul %87, %18, %cst_99 {dimension_numbers = #tpu.dot_dimension_numbers<[1], [0], [0], [1], [0, 0, 1, 1], [], []>} : vector<16x16xf32>, vector<16x128xf32>, vector<16x128xf32> -> vector<16x128xf32>
    %c1_100 = arith.constant 1 : index
    %c1_101 = arith.constant 1 : index
    %c0_102 = arith.constant 0 : index
    %c0_103 = arith.constant 0 : index
    %89 = vector.load %arg5[%c1_100, %c1_101, %c0_102, %c0_103] : memref<5x3x128x128xf32, #tpu.memory_space<vmem>>, vector<1x1x128x128xf32>
    %90 = vector.shape_cast %89 : vector<1x1x128x128xf32> to vector<128x128xf32>
    %cst_104 = arith.constant dense<0.000000e+00> : vector<16x128xf32>
    %91 = tpu.matmul %88, %90, %cst_104 {dimension_numbers = #tpu.dot_dimension_numbers<[1], [0], [0], [1], [0, 0, 1, 1], [], []>} : vector<16x128xf32>, vector<128x128xf32>, vector<16x128xf32> -> vector<16x128xf32>
    %92 = arith.addf %85, %91 : vector<16x128xf32>
    %c1_105 = arith.constant 1 : index
    %c2_106 = arith.constant 2 : index
    %c0_107 = arith.constant 0 : index
    %c0_108 = arith.constant 0 : index
    %93 = vector.load %arg4[%c1_105, %c2_106, %c0_107, %c0_108] : memref<5x3x16x16xf32, #tpu.memory_space<vmem>>, vector<1x1x16x16xf32>
    %94 = vector.shape_cast %93 : vector<1x1x16x16xf32> to vector<16x16xf32>
    %cst_109 = arith.constant dense<0.000000e+00> : vector<16x128xf32>
    %95 = tpu.matmul %94, %18, %cst_109 {dimension_numbers = #tpu.dot_dimension_numbers<[1], [0], [0], [1], [0, 0, 1, 1], [], []>} : vector<16x16xf32>, vector<16x128xf32>, vector<16x128xf32> -> vector<16x128xf32>
    %c1_110 = arith.constant 1 : index
    %c2_111 = arith.constant 2 : index
    %c0_112 = arith.constant 0 : index
    %c0_113 = arith.constant 0 : index
    %96 = vector.load %arg5[%c1_110, %c2_111, %c0_112, %c0_113] : memref<5x3x128x128xf32, #tpu.memory_space<vmem>>, vector<1x1x128x128xf32>
    %97 = vector.shape_cast %96 : vector<1x1x128x128xf32> to vector<128x128xf32>
    %cst_114 = arith.constant dense<0.000000e+00> : vector<16x128xf32>
    %98 = tpu.matmul %95, %97, %cst_114 {dimension_numbers = #tpu.dot_dimension_numbers<[1], [0], [0], [1], [0, 0, 1, 1], [], []>} : vector<16x128xf32>, vector<128x128xf32>, vector<16x128xf32> -> vector<16x128xf32>
    %99 = arith.addf %92, %98 : vector<16x128xf32>
    %c1_115 = arith.constant 1 : index
    %c0_116 = arith.constant 0 : index
    %c0_117 = arith.constant 0 : index
    %c0_118 = arith.constant 0 : index
    %100 = vector.load %arg6[%c1_115, %c0_116, %c0_117, %c0_118] : memref<5x3x1x128xf32, #tpu.memory_space<vmem>>, vector<1x1x1x128xf32>
    %101 = vector.shape_cast %100 : vector<1x1x1x128xf32> to vector<1x128xf32>
    %102 = vector.broadcast %101 : vector<1x128xf32> to vector<16x128xf32>
    %103 = arith.mulf %99, %102 : vector<16x128xf32>
    %c1_119 = arith.constant 1 : index
    %c1_120 = arith.constant 1 : index
    %c0_121 = arith.constant 0 : index
    %c0_122 = arith.constant 0 : index
    %104 = vector.load %arg6[%c1_119, %c1_120, %c0_121, %c0_122] : memref<5x3x1x128xf32, #tpu.memory_space<vmem>>, vector<1x1x1x128xf32>
    %105 = vector.shape_cast %104 : vector<1x1x1x128xf32> to vector<1x128xf32>
    %106 = vector.broadcast %105 : vector<1x128xf32> to vector<16x128xf32>
    %107 = arith.addf %103, %106 : vector<16x128xf32>
    %cst_123 = arith.constant 0.000000e+00 : f32
    %108 = vector.broadcast %cst_123 : f32 to vector<16x128xf32>
    %109 = arith.cmpf oge, %107, %108 : vector<16x128xf32>
    %c1_124 = arith.constant 1 : index
    %c2_125 = arith.constant 2 : index
    %c0_126 = arith.constant 0 : index
    %c0_127 = arith.constant 0 : index
    %110 = vector.load %arg6[%c1_124, %c2_125, %c0_126, %c0_127] : memref<5x3x1x128xf32, #tpu.memory_space<vmem>>, vector<1x1x1x128xf32>
    %111 = vector.shape_cast %110 : vector<1x1x1x128xf32> to vector<1x128xf32>
    %112 = vector.broadcast %111 : vector<1x128xf32> to vector<16x128xf32>
    %113 = arith.mulf %107, %112 : vector<16x128xf32>
    %114 = arith.select %109, %107, %113 : vector<16x128xi1>, vector<16x128xf32>
    %c0_128 = arith.constant 0 : index
    %c0_129 = arith.constant 0 : index
    %c0_130 = arith.constant 0 : index
    %115 = vector.load %arg7[%c0_128, %c0_129, %c0_130] : memref<3x16x16xf32, #tpu.memory_space<vmem>>, vector<1x16x16xf32>
    %116 = vector.shape_cast %115 : vector<1x16x16xf32> to vector<16x16xf32>
    %cst_131 = arith.constant dense<0.000000e+00> : vector<16x128xf32>
    %117 = tpu.matmul %116, %114, %cst_131 {dimension_numbers = #tpu.dot_dimension_numbers<[1], [0], [0], [1], [0, 0, 1, 1], [], []>} : vector<16x16xf32>, vector<16x128xf32>, vector<16x128xf32> -> vector<16x128xf32>
    %c1_132 = arith.constant 1 : index
    %c0_133 = arith.constant 0 : index
    %c0_134 = arith.constant 0 : index
    %c0_135 = arith.constant 0 : index
    %118 = vector.load %arg8[%c1_132, %c0_133, %c0_134, %c0_135] : memref<5x3x128x128xf32, #tpu.memory_space<vmem>>, vector<1x1x128x128xf32>
    %119 = vector.shape_cast %118 : vector<1x1x128x128xf32> to vector<128x128xf32>
    %cst_136 = arith.constant dense<0.000000e+00> : vector<16x128xf32>
    %120 = tpu.matmul %117, %119, %cst_136 {dimension_numbers = #tpu.dot_dimension_numbers<[1], [0], [0], [1], [0, 0, 1, 1], [], []>} : vector<16x128xf32>, vector<128x128xf32>, vector<16x128xf32> -> vector<16x128xf32>
    %121 = arith.addf %77, %120 : vector<16x128xf32>
    %c1_137 = arith.constant 1 : index
    %c0_138 = arith.constant 0 : index
    %c0_139 = arith.constant 0 : index
    %122 = vector.load %arg7[%c1_137, %c0_138, %c0_139] : memref<3x16x16xf32, #tpu.memory_space<vmem>>, vector<1x16x16xf32>
    %123 = vector.shape_cast %122 : vector<1x16x16xf32> to vector<16x16xf32>
    %cst_140 = arith.constant dense<0.000000e+00> : vector<16x128xf32>
    %124 = tpu.matmul %123, %114, %cst_140 {dimension_numbers = #tpu.dot_dimension_numbers<[1], [0], [0], [1], [0, 0, 1, 1], [], []>} : vector<16x16xf32>, vector<16x128xf32>, vector<16x128xf32> -> vector<16x128xf32>
    %c1_141 = arith.constant 1 : index
    %c1_142 = arith.constant 1 : index
    %c0_143 = arith.constant 0 : index
    %c0_144 = arith.constant 0 : index
    %125 = vector.load %arg8[%c1_141, %c1_142, %c0_143, %c0_144] : memref<5x3x128x128xf32, #tpu.memory_space<vmem>>, vector<1x1x128x128xf32>
    %126 = vector.shape_cast %125 : vector<1x1x128x128xf32> to vector<128x128xf32>
    %cst_145 = arith.constant dense<0.000000e+00> : vector<16x128xf32>
    %127 = tpu.matmul %124, %126, %cst_145 {dimension_numbers = #tpu.dot_dimension_numbers<[1], [0], [0], [1], [0, 0, 1, 1], [], []>} : vector<16x128xf32>, vector<128x128xf32>, vector<16x128xf32> -> vector<16x128xf32>
    %128 = arith.addf %121, %127 : vector<16x128xf32>
    %c2_146 = arith.constant 2 : index
    %c0_147 = arith.constant 0 : index
    %c0_148 = arith.constant 0 : index
    %129 = vector.load %arg7[%c2_146, %c0_147, %c0_148] : memref<3x16x16xf32, #tpu.memory_space<vmem>>, vector<1x16x16xf32>
    %130 = vector.shape_cast %129 : vector<1x16x16xf32> to vector<16x16xf32>
    %cst_149 = arith.constant dense<0.000000e+00> : vector<16x128xf32>
    %131 = tpu.matmul %130, %114, %cst_149 {dimension_numbers = #tpu.dot_dimension_numbers<[1], [0], [0], [1], [0, 0, 1, 1], [], []>} : vector<16x16xf32>, vector<16x128xf32>, vector<16x128xf32> -> vector<16x128xf32>
    %c1_150 = arith.constant 1 : index
    %c2_151 = arith.constant 2 : index
    %c0_152 = arith.constant 0 : index
    %c0_153 = arith.constant 0 : index
    %132 = vector.load %arg8[%c1_150, %c2_151, %c0_152, %c0_153] : memref<5x3x128x128xf32, #tpu.memory_space<vmem>>, vector<1x1x128x128xf32>
    %133 = vector.shape_cast %132 : vector<1x1x128x128xf32> to vector<128x128xf32>
    %cst_154 = arith.constant dense<0.000000e+00> : vector<16x128xf32>
    %134 = tpu.matmul %131, %133, %cst_154 {dimension_numbers = #tpu.dot_dimension_numbers<[1], [0], [0], [1], [0, 0, 1, 1], [], []>} : vector<16x128xf32>, vector<128x128xf32>, vector<16x128xf32> -> vector<16x128xf32>
    %135 = arith.addf %128, %134 : vector<16x128xf32>
    %cst_155 = arith.constant 0.000000e+00 : f32
    %136 = vector.broadcast %cst_155 : f32 to vector<16x128xf32>
    %c2_156 = arith.constant 2 : index
    %c0_157 = arith.constant 0 : index
    %c0_158 = arith.constant 0 : index
    %c0_159 = arith.constant 0 : index
    %137 = vector.load %arg4[%c2_156, %c0_157, %c0_158, %c0_159] : memref<5x3x16x16xf32, #tpu.memory_space<vmem>>, vector<1x1x16x16xf32>
    %138 = vector.shape_cast %137 : vector<1x1x16x16xf32> to vector<16x16xf32>
    %cst_160 = arith.constant dense<0.000000e+00> : vector<16x128xf32>
    %139 = tpu.matmul %138, %18, %cst_160 {dimension_numbers = #tpu.dot_dimension_numbers<[1], [0], [0], [1], [0, 0, 1, 1], [], []>} : vector<16x16xf32>, vector<16x128xf32>, vector<16x128xf32> -> vector<16x128xf32>
    %c2_161 = arith.constant 2 : index
    %c0_162 = arith.constant 0 : index
    %c0_163 = arith.constant 0 : index
    %c0_164 = arith.constant 0 : index
    %140 = vector.load %arg5[%c2_161, %c0_162, %c0_163, %c0_164] : memref<5x3x128x128xf32, #tpu.memory_space<vmem>>, vector<1x1x128x128xf32>
    %141 = vector.shape_cast %140 : vector<1x1x128x128xf32> to vector<128x128xf32>
    %cst_165 = arith.constant dense<0.000000e+00> : vector<16x128xf32>
    %142 = tpu.matmul %139, %141, %cst_165 {dimension_numbers = #tpu.dot_dimension_numbers<[1], [0], [0], [1], [0, 0, 1, 1], [], []>} : vector<16x128xf32>, vector<128x128xf32>, vector<16x128xf32> -> vector<16x128xf32>
    %143 = arith.addf %136, %142 : vector<16x128xf32>
    %c2_166 = arith.constant 2 : index
    %c1_167 = arith.constant 1 : index
    %c0_168 = arith.constant 0 : index
    %c0_169 = arith.constant 0 : index
    %144 = vector.load %arg4[%c2_166, %c1_167, %c0_168, %c0_169] : memref<5x3x16x16xf32, #tpu.memory_space<vmem>>, vector<1x1x16x16xf32>
    %145 = vector.shape_cast %144 : vector<1x1x16x16xf32> to vector<16x16xf32>
    %cst_170 = arith.constant dense<0.000000e+00> : vector<16x128xf32>
    %146 = tpu.matmul %145, %18, %cst_170 {dimension_numbers = #tpu.dot_dimension_numbers<[1], [0], [0], [1], [0, 0, 1, 1], [], []>} : vector<16x16xf32>, vector<16x128xf32>, vector<16x128xf32> -> vector<16x128xf32>
    %c2_171 = arith.constant 2 : index
    %c1_172 = arith.constant 1 : index
    %c0_173 = arith.constant 0 : index
    %c0_174 = arith.constant 0 : index
    %147 = vector.load %arg5[%c2_171, %c1_172, %c0_173, %c0_174] : memref<5x3x128x128xf32, #tpu.memory_space<vmem>>, vector<1x1x128x128xf32>
    %148 = vector.shape_cast %147 : vector<1x1x128x128xf32> to vector<128x128xf32>
    %cst_175 = arith.constant dense<0.000000e+00> : vector<16x128xf32>
    %149 = tpu.matmul %146, %148, %cst_175 {dimension_numbers = #tpu.dot_dimension_numbers<[1], [0], [0], [1], [0, 0, 1, 1], [], []>} : vector<16x128xf32>, vector<128x128xf32>, vector<16x128xf32> -> vector<16x128xf32>
    %150 = arith.addf %143, %149 : vector<16x128xf32>
    %c2_176 = arith.constant 2 : index
    %c2_177 = arith.constant 2 : index
    %c0_178 = arith.constant 0 : index
    %c0_179 = arith.constant 0 : index
    %151 = vector.load %arg4[%c2_176, %c2_177, %c0_178, %c0_179] : memref<5x3x16x16xf32, #tpu.memory_space<vmem>>, vector<1x1x16x16xf32>
    %152 = vector.shape_cast %151 : vector<1x1x16x16xf32> to vector<16x16xf32>
    %cst_180 = arith.constant dense<0.000000e+00> : vector<16x128xf32>
    %153 = tpu.matmul %152, %18, %cst_180 {dimension_numbers = #tpu.dot_dimension_numbers<[1], [0], [0], [1], [0, 0, 1, 1], [], []>} : vector<16x16xf32>, vector<16x128xf32>, vector<16x128xf32> -> vector<16x128xf32>
    %c2_181 = arith.constant 2 : index
    %c2_182 = arith.constant 2 : index
    %c0_183 = arith.constant 0 : index
    %c0_184 = arith.constant 0 : index
    %154 = vector.load %arg5[%c2_181, %c2_182, %c0_183, %c0_184] : memref<5x3x128x128xf32, #tpu.memory_space<vmem>>, vector<1x1x128x128xf32>
    %155 = vector.shape_cast %154 : vector<1x1x128x128xf32> to vector<128x128xf32>
    %cst_185 = arith.constant dense<0.000000e+00> : vector<16x128xf32>
    %156 = tpu.matmul %153, %155, %cst_185 {dimension_numbers = #tpu.dot_dimension_numbers<[1], [0], [0], [1], [0, 0, 1, 1], [], []>} : vector<16x128xf32>, vector<128x128xf32>, vector<16x128xf32> -> vector<16x128xf32>
    %157 = arith.addf %150, %156 : vector<16x128xf32>
    %c2_186 = arith.constant 2 : index
    %c0_187 = arith.constant 0 : index
    %c0_188 = arith.constant 0 : index
    %c0_189 = arith.constant 0 : index
    %158 = vector.load %arg6[%c2_186, %c0_187, %c0_188, %c0_189] : memref<5x3x1x128xf32, #tpu.memory_space<vmem>>, vector<1x1x1x128xf32>
    %159 = vector.shape_cast %158 : vector<1x1x1x128xf32> to vector<1x128xf32>
    %160 = vector.broadcast %159 : vector<1x128xf32> to vector<16x128xf32>
    %161 = arith.mulf %157, %160 : vector<16x128xf32>
    %c2_190 = arith.constant 2 : index
    %c1_191 = arith.constant 1 : index
    %c0_192 = arith.constant 0 : index
    %c0_193 = arith.constant 0 : index
    %162 = vector.load %arg6[%c2_190, %c1_191, %c0_192, %c0_193] : memref<5x3x1x128xf32, #tpu.memory_space<vmem>>, vector<1x1x1x128xf32>
    %163 = vector.shape_cast %162 : vector<1x1x1x128xf32> to vector<1x128xf32>
    %164 = vector.broadcast %163 : vector<1x128xf32> to vector<16x128xf32>
    %165 = arith.addf %161, %164 : vector<16x128xf32>
    %cst_194 = arith.constant 0.000000e+00 : f32
    %166 = vector.broadcast %cst_194 : f32 to vector<16x128xf32>
    %167 = arith.cmpf oge, %165, %166 : vector<16x128xf32>
    %c2_195 = arith.constant 2 : index
    %c2_196 = arith.constant 2 : index
    %c0_197 = arith.constant 0 : index
    %c0_198 = arith.constant 0 : index
    %168 = vector.load %arg6[%c2_195, %c2_196, %c0_197, %c0_198] : memref<5x3x1x128xf32, #tpu.memory_space<vmem>>, vector<1x1x1x128xf32>
    %169 = vector.shape_cast %168 : vector<1x1x1x128xf32> to vector<1x128xf32>
    %170 = vector.broadcast %169 : vector<1x128xf32> to vector<16x128xf32>
    %171 = arith.mulf %165, %170 : vector<16x128xf32>
    %172 = arith.select %167, %165, %171 : vector<16x128xi1>, vector<16x128xf32>
    %c0_199 = arith.constant 0 : index
    %c0_200 = arith.constant 0 : index
    %c0_201 = arith.constant 0 : index
    %173 = vector.load %arg7[%c0_199, %c0_200, %c0_201] : memref<3x16x16xf32, #tpu.memory_space<vmem>>, vector<1x16x16xf32>
    %174 = vector.shape_cast %173 : vector<1x16x16xf32> to vector<16x16xf32>
    %cst_202 = arith.constant dense<0.000000e+00> : vector<16x128xf32>
    %175 = tpu.matmul %174, %172, %cst_202 {dimension_numbers = #tpu.dot_dimension_numbers<[1], [0], [0], [1], [0, 0, 1, 1], [], []>} : vector<16x16xf32>, vector<16x128xf32>, vector<16x128xf32> -> vector<16x128xf32>
    %c2_203 = arith.constant 2 : index
    %c0_204 = arith.constant 0 : index
    %c0_205 = arith.constant 0 : index
    %c0_206 = arith.constant 0 : index
    %176 = vector.load %arg8[%c2_203, %c0_204, %c0_205, %c0_206] : memref<5x3x128x128xf32, #tpu.memory_space<vmem>>, vector<1x1x128x128xf32>
    %177 = vector.shape_cast %176 : vector<1x1x128x128xf32> to vector<128x128xf32>
    %cst_207 = arith.constant dense<0.000000e+00> : vector<16x128xf32>
    %178 = tpu.matmul %175, %177, %cst_207 {dimension_numbers = #tpu.dot_dimension_numbers<[1], [0], [0], [1], [0, 0, 1, 1], [], []>} : vector<16x128xf32>, vector<128x128xf32>, vector<16x128xf32> -> vector<16x128xf32>
    %179 = arith.addf %135, %178 : vector<16x128xf32>
    %c1_208 = arith.constant 1 : index
    %c0_209 = arith.constant 0 : index
    %c0_210 = arith.constant 0 : index
    %180 = vector.load %arg7[%c1_208, %c0_209, %c0_210] : memref<3x16x16xf32, #tpu.memory_space<vmem>>, vector<1x16x16xf32>
    %181 = vector.shape_cast %180 : vector<1x16x16xf32> to vector<16x16xf32>
    %cst_211 = arith.constant dense<0.000000e+00> : vector<16x128xf32>
    %182 = tpu.matmul %181, %172, %cst_211 {dimension_numbers = #tpu.dot_dimension_numbers<[1], [0], [0], [1], [0, 0, 1, 1], [], []>} : vector<16x16xf32>, vector<16x128xf32>, vector<16x128xf32> -> vector<16x128xf32>
    %c2_212 = arith.constant 2 : index
    %c1_213 = arith.constant 1 : index
    %c0_214 = arith.constant 0 : index
    %c0_215 = arith.constant 0 : index
    %183 = vector.load %arg8[%c2_212, %c1_213, %c0_214, %c0_215] : memref<5x3x128x128xf32, #tpu.memory_space<vmem>>, vector<1x1x128x128xf32>
    %184 = vector.shape_cast %183 : vector<1x1x128x128xf32> to vector<128x128xf32>
    %cst_216 = arith.constant dense<0.000000e+00> : vector<16x128xf32>
    %185 = tpu.matmul %182, %184, %cst_216 {dimension_numbers = #tpu.dot_dimension_numbers<[1], [0], [0], [1], [0, 0, 1, 1], [], []>} : vector<16x128xf32>, vector<128x128xf32>, vector<16x128xf32> -> vector<16x128xf32>
    %186 = arith.addf %179, %185 : vector<16x128xf32>
    %c2_217 = arith.constant 2 : index
    %c0_218 = arith.constant 0 : index
    %c0_219 = arith.constant 0 : index
    %187 = vector.load %arg7[%c2_217, %c0_218, %c0_219] : memref<3x16x16xf32, #tpu.memory_space<vmem>>, vector<1x16x16xf32>
    %188 = vector.shape_cast %187 : vector<1x16x16xf32> to vector<16x16xf32>
    %cst_220 = arith.constant dense<0.000000e+00> : vector<16x128xf32>
    %189 = tpu.matmul %188, %172, %cst_220 {dimension_numbers = #tpu.dot_dimension_numbers<[1], [0], [0], [1], [0, 0, 1, 1], [], []>} : vector<16x16xf32>, vector<16x128xf32>, vector<16x128xf32> -> vector<16x128xf32>
    %c2_221 = arith.constant 2 : index
    %c2_222 = arith.constant 2 : index
    %c0_223 = arith.constant 0 : index
    %c0_224 = arith.constant 0 : index
    %190 = vector.load %arg8[%c2_221, %c2_222, %c0_223, %c0_224] : memref<5x3x128x128xf32, #tpu.memory_space<vmem>>, vector<1x1x128x128xf32>
    %191 = vector.shape_cast %190 : vector<1x1x128x128xf32> to vector<128x128xf32>
    %cst_225 = arith.constant dense<0.000000e+00> : vector<16x128xf32>
    %192 = tpu.matmul %189, %191, %cst_225 {dimension_numbers = #tpu.dot_dimension_numbers<[1], [0], [0], [1], [0, 0, 1, 1], [], []>} : vector<16x128xf32>, vector<128x128xf32>, vector<16x128xf32> -> vector<16x128xf32>
    %193 = arith.addf %186, %192 : vector<16x128xf32>
    %cst_226 = arith.constant 0.000000e+00 : f32
    %194 = vector.broadcast %cst_226 : f32 to vector<16x128xf32>
    %c3 = arith.constant 3 : index
    %c0_227 = arith.constant 0 : index
    %c0_228 = arith.constant 0 : index
    %c0_229 = arith.constant 0 : index
    %195 = vector.load %arg4[%c3, %c0_227, %c0_228, %c0_229] : memref<5x3x16x16xf32, #tpu.memory_space<vmem>>, vector<1x1x16x16xf32>
    %196 = vector.shape_cast %195 : vector<1x1x16x16xf32> to vector<16x16xf32>
    %cst_230 = arith.constant dense<0.000000e+00> : vector<16x128xf32>
    %197 = tpu.matmul %196, %18, %cst_230 {dimension_numbers = #tpu.dot_dimension_numbers<[1], [0], [0], [1], [0, 0, 1, 1], [], []>} : vector<16x16xf32>, vector<16x128xf32>, vector<16x128xf32> -> vector<16x128xf32>
    %c3_231 = arith.constant 3 : index
    %c0_232 = arith.constant 0 : index
    %c0_233 = arith.constant 0 : index
    %c0_234 = arith.constant 0 : index
    %198 = vector.load %arg5[%c3_231, %c0_232, %c0_233, %c0_234] : memref<5x3x128x128xf32, #tpu.memory_space<vmem>>, vector<1x1x128x128xf32>
    %199 = vector.shape_cast %198 : vector<1x1x128x128xf32> to vector<128x128xf32>
    %cst_235 = arith.constant dense<0.000000e+00> : vector<16x128xf32>
    %200 = tpu.matmul %197, %199, %cst_235 {dimension_numbers = #tpu.dot_dimension_numbers<[1], [0], [0], [1], [0, 0, 1, 1], [], []>} : vector<16x128xf32>, vector<128x128xf32>, vector<16x128xf32> -> vector<16x128xf32>
    %201 = arith.addf %194, %200 : vector<16x128xf32>
    %c3_236 = arith.constant 3 : index
    %c1_237 = arith.constant 1 : index
    %c0_238 = arith.constant 0 : index
    %c0_239 = arith.constant 0 : index
    %202 = vector.load %arg4[%c3_236, %c1_237, %c0_238, %c0_239] : memref<5x3x16x16xf32, #tpu.memory_space<vmem>>, vector<1x1x16x16xf32>
    %203 = vector.shape_cast %202 : vector<1x1x16x16xf32> to vector<16x16xf32>
    %cst_240 = arith.constant dense<0.000000e+00> : vector<16x128xf32>
    %204 = tpu.matmul %203, %18, %cst_240 {dimension_numbers = #tpu.dot_dimension_numbers<[1], [0], [0], [1], [0, 0, 1, 1], [], []>} : vector<16x16xf32>, vector<16x128xf32>, vector<16x128xf32> -> vector<16x128xf32>
    %c3_241 = arith.constant 3 : index
    %c1_242 = arith.constant 1 : index
    %c0_243 = arith.constant 0 : index
    %c0_244 = arith.constant 0 : index
    %205 = vector.load %arg5[%c3_241, %c1_242, %c0_243, %c0_244] : memref<5x3x128x128xf32, #tpu.memory_space<vmem>>, vector<1x1x128x128xf32>
    %206 = vector.shape_cast %205 : vector<1x1x128x128xf32> to vector<128x128xf32>
    %cst_245 = arith.constant dense<0.000000e+00> : vector<16x128xf32>
    %207 = tpu.matmul %204, %206, %cst_245 {dimension_numbers = #tpu.dot_dimension_numbers<[1], [0], [0], [1], [0, 0, 1, 1], [], []>} : vector<16x128xf32>, vector<128x128xf32>, vector<16x128xf32> -> vector<16x128xf32>
    %208 = arith.addf %201, %207 : vector<16x128xf32>
    %c3_246 = arith.constant 3 : index
    %c2_247 = arith.constant 2 : index
    %c0_248 = arith.constant 0 : index
    %c0_249 = arith.constant 0 : index
    %209 = vector.load %arg4[%c3_246, %c2_247, %c0_248, %c0_249] : memref<5x3x16x16xf32, #tpu.memory_space<vmem>>, vector<1x1x16x16xf32>
    %210 = vector.shape_cast %209 : vector<1x1x16x16xf32> to vector<16x16xf32>
    %cst_250 = arith.constant dense<0.000000e+00> : vector<16x128xf32>
    %211 = tpu.matmul %210, %18, %cst_250 {dimension_numbers = #tpu.dot_dimension_numbers<[1], [0], [0], [1], [0, 0, 1, 1], [], []>} : vector<16x16xf32>, vector<16x128xf32>, vector<16x128xf32> -> vector<16x128xf32>
    %c3_251 = arith.constant 3 : index
    %c2_252 = arith.constant 2 : index
    %c0_253 = arith.constant 0 : index
    %c0_254 = arith.constant 0 : index
    %212 = vector.load %arg5[%c3_251, %c2_252, %c0_253, %c0_254] : memref<5x3x128x128xf32, #tpu.memory_space<vmem>>, vector<1x1x128x128xf32>
    %213 = vector.shape_cast %212 : vector<1x1x128x128xf32> to vector<128x128xf32>
    %cst_255 = arith.constant dense<0.000000e+00> : vector<16x128xf32>
    %214 = tpu.matmul %211, %213, %cst_255 {dimension_numbers = #tpu.dot_dimension_numbers<[1], [0], [0], [1], [0, 0, 1, 1], [], []>} : vector<16x128xf32>, vector<128x128xf32>, vector<16x128xf32> -> vector<16x128xf32>
    %215 = arith.addf %208, %214 : vector<16x128xf32>
    %c3_256 = arith.constant 3 : index
    %c0_257 = arith.constant 0 : index
    %c0_258 = arith.constant 0 : index
    %c0_259 = arith.constant 0 : index
    %216 = vector.load %arg6[%c3_256, %c0_257, %c0_258, %c0_259] : memref<5x3x1x128xf32, #tpu.memory_space<vmem>>, vector<1x1x1x128xf32>
    %217 = vector.shape_cast %216 : vector<1x1x1x128xf32> to vector<1x128xf32>
    %218 = vector.broadcast %217 : vector<1x128xf32> to vector<16x128xf32>
    %219 = arith.mulf %215, %218 : vector<16x128xf32>
    %c3_260 = arith.constant 3 : index
    %c1_261 = arith.constant 1 : index
    %c0_262 = arith.constant 0 : index
    %c0_263 = arith.constant 0 : index
    %220 = vector.load %arg6[%c3_260, %c1_261, %c0_262, %c0_263] : memref<5x3x1x128xf32, #tpu.memory_space<vmem>>, vector<1x1x1x128xf32>
    %221 = vector.shape_cast %220 : vector<1x1x1x128xf32> to vector<1x128xf32>
    %222 = vector.broadcast %221 : vector<1x128xf32> to vector<16x128xf32>
    %223 = arith.addf %219, %222 : vector<16x128xf32>
    %cst_264 = arith.constant 0.000000e+00 : f32
    %224 = vector.broadcast %cst_264 : f32 to vector<16x128xf32>
    %225 = arith.cmpf oge, %223, %224 : vector<16x128xf32>
    %c3_265 = arith.constant 3 : index
    %c2_266 = arith.constant 2 : index
    %c0_267 = arith.constant 0 : index
    %c0_268 = arith.constant 0 : index
    %226 = vector.load %arg6[%c3_265, %c2_266, %c0_267, %c0_268] : memref<5x3x1x128xf32, #tpu.memory_space<vmem>>, vector<1x1x1x128xf32>
    %227 = vector.shape_cast %226 : vector<1x1x1x128xf32> to vector<1x128xf32>
    %228 = vector.broadcast %227 : vector<1x128xf32> to vector<16x128xf32>
    %229 = arith.mulf %223, %228 : vector<16x128xf32>
    %230 = arith.select %225, %223, %229 : vector<16x128xi1>, vector<16x128xf32>
    %c0_269 = arith.constant 0 : index
    %c0_270 = arith.constant 0 : index
    %c0_271 = arith.constant 0 : index
    %231 = vector.load %arg7[%c0_269, %c0_270, %c0_271] : memref<3x16x16xf32, #tpu.memory_space<vmem>>, vector<1x16x16xf32>
    %232 = vector.shape_cast %231 : vector<1x16x16xf32> to vector<16x16xf32>
    %cst_272 = arith.constant dense<0.000000e+00> : vector<16x128xf32>
    %233 = tpu.matmul %232, %230, %cst_272 {dimension_numbers = #tpu.dot_dimension_numbers<[1], [0], [0], [1], [0, 0, 1, 1], [], []>} : vector<16x16xf32>, vector<16x128xf32>, vector<16x128xf32> -> vector<16x128xf32>
    %c3_273 = arith.constant 3 : index
    %c0_274 = arith.constant 0 : index
    %c0_275 = arith.constant 0 : index
    %c0_276 = arith.constant 0 : index
    %234 = vector.load %arg8[%c3_273, %c0_274, %c0_275, %c0_276] : memref<5x3x128x128xf32, #tpu.memory_space<vmem>>, vector<1x1x128x128xf32>
    %235 = vector.shape_cast %234 : vector<1x1x128x128xf32> to vector<128x128xf32>
    %cst_277 = arith.constant dense<0.000000e+00> : vector<16x128xf32>
    %236 = tpu.matmul %233, %235, %cst_277 {dimension_numbers = #tpu.dot_dimension_numbers<[1], [0], [0], [1], [0, 0, 1, 1], [], []>} : vector<16x128xf32>, vector<128x128xf32>, vector<16x128xf32> -> vector<16x128xf32>
    %237 = arith.addf %193, %236 : vector<16x128xf32>
    %c1_278 = arith.constant 1 : index
    %c0_279 = arith.constant 0 : index
    %c0_280 = arith.constant 0 : index
    %238 = vector.load %arg7[%c1_278, %c0_279, %c0_280] : memref<3x16x16xf32, #tpu.memory_space<vmem>>, vector<1x16x16xf32>
    %239 = vector.shape_cast %238 : vector<1x16x16xf32> to vector<16x16xf32>
    %cst_281 = arith.constant dense<0.000000e+00> : vector<16x128xf32>
    %240 = tpu.matmul %239, %230, %cst_281 {dimension_numbers = #tpu.dot_dimension_numbers<[1], [0], [0], [1], [0, 0, 1, 1], [], []>} : vector<16x16xf32>, vector<16x128xf32>, vector<16x128xf32> -> vector<16x128xf32>
    %c3_282 = arith.constant 3 : index
    %c1_283 = arith.constant 1 : index
    %c0_284 = arith.constant 0 : index
    %c0_285 = arith.constant 0 : index
    %241 = vector.load %arg8[%c3_282, %c1_283, %c0_284, %c0_285] : memref<5x3x128x128xf32, #tpu.memory_space<vmem>>, vector<1x1x128x128xf32>
    %242 = vector.shape_cast %241 : vector<1x1x128x128xf32> to vector<128x128xf32>
    %cst_286 = arith.constant dense<0.000000e+00> : vector<16x128xf32>
    %243 = tpu.matmul %240, %242, %cst_286 {dimension_numbers = #tpu.dot_dimension_numbers<[1], [0], [0], [1], [0, 0, 1, 1], [], []>} : vector<16x128xf32>, vector<128x128xf32>, vector<16x128xf32> -> vector<16x128xf32>
    %244 = arith.addf %237, %243 : vector<16x128xf32>
    %c2_287 = arith.constant 2 : index
    %c0_288 = arith.constant 0 : index
    %c0_289 = arith.constant 0 : index
    %245 = vector.load %arg7[%c2_287, %c0_288, %c0_289] : memref<3x16x16xf32, #tpu.memory_space<vmem>>, vector<1x16x16xf32>
    %246 = vector.shape_cast %245 : vector<1x16x16xf32> to vector<16x16xf32>
    %cst_290 = arith.constant dense<0.000000e+00> : vector<16x128xf32>
    %247 = tpu.matmul %246, %230, %cst_290 {dimension_numbers = #tpu.dot_dimension_numbers<[1], [0], [0], [1], [0, 0, 1, 1], [], []>} : vector<16x16xf32>, vector<16x128xf32>, vector<16x128xf32> -> vector<16x128xf32>
    %c3_291 = arith.constant 3 : index
    %c2_292 = arith.constant 2 : index
    %c0_293 = arith.constant 0 : index
    %c0_294 = arith.constant 0 : index
    %248 = vector.load %arg8[%c3_291, %c2_292, %c0_293, %c0_294] : memref<5x3x128x128xf32, #tpu.memory_space<vmem>>, vector<1x1x128x128xf32>
    %249 = vector.shape_cast %248 : vector<1x1x128x128xf32> to vector<128x128xf32>
    %cst_295 = arith.constant dense<0.000000e+00> : vector<16x128xf32>
    %250 = tpu.matmul %247, %249, %cst_295 {dimension_numbers = #tpu.dot_dimension_numbers<[1], [0], [0], [1], [0, 0, 1, 1], [], []>} : vector<16x128xf32>, vector<128x128xf32>, vector<16x128xf32> -> vector<16x128xf32>
    %251 = arith.addf %244, %250 : vector<16x128xf32>
    %cst_296 = arith.constant 0.000000e+00 : f32
    %252 = vector.broadcast %cst_296 : f32 to vector<16x128xf32>
    %c4 = arith.constant 4 : index
    %c0_297 = arith.constant 0 : index
    %c0_298 = arith.constant 0 : index
    %c0_299 = arith.constant 0 : index
    %253 = vector.load %arg4[%c4, %c0_297, %c0_298, %c0_299] : memref<5x3x16x16xf32, #tpu.memory_space<vmem>>, vector<1x1x16x16xf32>
    %254 = vector.shape_cast %253 : vector<1x1x16x16xf32> to vector<16x16xf32>
    %cst_300 = arith.constant dense<0.000000e+00> : vector<16x128xf32>
    %255 = tpu.matmul %254, %18, %cst_300 {dimension_numbers = #tpu.dot_dimension_numbers<[1], [0], [0], [1], [0, 0, 1, 1], [], []>} : vector<16x16xf32>, vector<16x128xf32>, vector<16x128xf32> -> vector<16x128xf32>
    %c4_301 = arith.constant 4 : index
    %c0_302 = arith.constant 0 : index
    %c0_303 = arith.constant 0 : index
    %c0_304 = arith.constant 0 : index
    %256 = vector.load %arg5[%c4_301, %c0_302, %c0_303, %c0_304] : memref<5x3x128x128xf32, #tpu.memory_space<vmem>>, vector<1x1x128x128xf32>
    %257 = vector.shape_cast %256 : vector<1x1x128x128xf32> to vector<128x128xf32>
    %cst_305 = arith.constant dense<0.000000e+00> : vector<16x128xf32>
    %258 = tpu.matmul %255, %257, %cst_305 {dimension_numbers = #tpu.dot_dimension_numbers<[1], [0], [0], [1], [0, 0, 1, 1], [], []>} : vector<16x128xf32>, vector<128x128xf32>, vector<16x128xf32> -> vector<16x128xf32>
    %259 = arith.addf %252, %258 : vector<16x128xf32>
    %c4_306 = arith.constant 4 : index
    %c1_307 = arith.constant 1 : index
    %c0_308 = arith.constant 0 : index
    %c0_309 = arith.constant 0 : index
    %260 = vector.load %arg4[%c4_306, %c1_307, %c0_308, %c0_309] : memref<5x3x16x16xf32, #tpu.memory_space<vmem>>, vector<1x1x16x16xf32>
    %261 = vector.shape_cast %260 : vector<1x1x16x16xf32> to vector<16x16xf32>
    %cst_310 = arith.constant dense<0.000000e+00> : vector<16x128xf32>
    %262 = tpu.matmul %261, %18, %cst_310 {dimension_numbers = #tpu.dot_dimension_numbers<[1], [0], [0], [1], [0, 0, 1, 1], [], []>} : vector<16x16xf32>, vector<16x128xf32>, vector<16x128xf32> -> vector<16x128xf32>
    %c4_311 = arith.constant 4 : index
    %c1_312 = arith.constant 1 : index
    %c0_313 = arith.constant 0 : index
    %c0_314 = arith.constant 0 : index
    %263 = vector.load %arg5[%c4_311, %c1_312, %c0_313, %c0_314] : memref<5x3x128x128xf32, #tpu.memory_space<vmem>>, vector<1x1x128x128xf32>
    %264 = vector.shape_cast %263 : vector<1x1x128x128xf32> to vector<128x128xf32>
    %cst_315 = arith.constant dense<0.000000e+00> : vector<16x128xf32>
    %265 = tpu.matmul %262, %264, %cst_315 {dimension_numbers = #tpu.dot_dimension_numbers<[1], [0], [0], [1], [0, 0, 1, 1], [], []>} : vector<16x128xf32>, vector<128x128xf32>, vector<16x128xf32> -> vector<16x128xf32>
    %266 = arith.addf %259, %265 : vector<16x128xf32>
    %c4_316 = arith.constant 4 : index
    %c2_317 = arith.constant 2 : index
    %c0_318 = arith.constant 0 : index
    %c0_319 = arith.constant 0 : index
    %267 = vector.load %arg4[%c4_316, %c2_317, %c0_318, %c0_319] : memref<5x3x16x16xf32, #tpu.memory_space<vmem>>, vector<1x1x16x16xf32>
    %268 = vector.shape_cast %267 : vector<1x1x16x16xf32> to vector<16x16xf32>
    %cst_320 = arith.constant dense<0.000000e+00> : vector<16x128xf32>
    %269 = tpu.matmul %268, %18, %cst_320 {dimension_numbers = #tpu.dot_dimension_numbers<[1], [0], [0], [1], [0, 0, 1, 1], [], []>} : vector<16x16xf32>, vector<16x128xf32>, vector<16x128xf32> -> vector<16x128xf32>
    %c4_321 = arith.constant 4 : index
    %c2_322 = arith.constant 2 : index
    %c0_323 = arith.constant 0 : index
    %c0_324 = arith.constant 0 : index
    %270 = vector.load %arg5[%c4_321, %c2_322, %c0_323, %c0_324] : memref<5x3x128x128xf32, #tpu.memory_space<vmem>>, vector<1x1x128x128xf32>
    %271 = vector.shape_cast %270 : vector<1x1x128x128xf32> to vector<128x128xf32>
    %cst_325 = arith.constant dense<0.000000e+00> : vector<16x128xf32>
    %272 = tpu.matmul %269, %271, %cst_325 {dimension_numbers = #tpu.dot_dimension_numbers<[1], [0], [0], [1], [0, 0, 1, 1], [], []>} : vector<16x128xf32>, vector<128x128xf32>, vector<16x128xf32> -> vector<16x128xf32>
    %273 = arith.addf %266, %272 : vector<16x128xf32>
    %c4_326 = arith.constant 4 : index
    %c0_327 = arith.constant 0 : index
    %c0_328 = arith.constant 0 : index
    %c0_329 = arith.constant 0 : index
    %274 = vector.load %arg6[%c4_326, %c0_327, %c0_328, %c0_329] : memref<5x3x1x128xf32, #tpu.memory_space<vmem>>, vector<1x1x1x128xf32>
    %275 = vector.shape_cast %274 : vector<1x1x1x128xf32> to vector<1x128xf32>
    %276 = vector.broadcast %275 : vector<1x128xf32> to vector<16x128xf32>
    %277 = arith.mulf %273, %276 : vector<16x128xf32>
    %c4_330 = arith.constant 4 : index
    %c1_331 = arith.constant 1 : index
    %c0_332 = arith.constant 0 : index
    %c0_333 = arith.constant 0 : index
    %278 = vector.load %arg6[%c4_330, %c1_331, %c0_332, %c0_333] : memref<5x3x1x128xf32, #tpu.memory_space<vmem>>, vector<1x1x1x128xf32>
    %279 = vector.shape_cast %278 : vector<1x1x1x128xf32> to vector<1x128xf32>
    %280 = vector.broadcast %279 : vector<1x128xf32> to vector<16x128xf32>
    %281 = arith.addf %277, %280 : vector<16x128xf32>
    %cst_334 = arith.constant 0.000000e+00 : f32
    %282 = vector.broadcast %cst_334 : f32 to vector<16x128xf32>
    %283 = arith.cmpf oge, %281, %282 : vector<16x128xf32>
    %c4_335 = arith.constant 4 : index
    %c2_336 = arith.constant 2 : index
    %c0_337 = arith.constant 0 : index
    %c0_338 = arith.constant 0 : index
    %284 = vector.load %arg6[%c4_335, %c2_336, %c0_337, %c0_338] : memref<5x3x1x128xf32, #tpu.memory_space<vmem>>, vector<1x1x1x128xf32>
    %285 = vector.shape_cast %284 : vector<1x1x1x128xf32> to vector<1x128xf32>
    %286 = vector.broadcast %285 : vector<1x128xf32> to vector<16x128xf32>
    %287 = arith.mulf %281, %286 : vector<16x128xf32>
    %288 = arith.select %283, %281, %287 : vector<16x128xi1>, vector<16x128xf32>
    %c0_339 = arith.constant 0 : index
    %c0_340 = arith.constant 0 : index
    %c0_341 = arith.constant 0 : index
    %289 = vector.load %arg7[%c0_339, %c0_340, %c0_341] : memref<3x16x16xf32, #tpu.memory_space<vmem>>, vector<1x16x16xf32>
    %290 = vector.shape_cast %289 : vector<1x16x16xf32> to vector<16x16xf32>
    %cst_342 = arith.constant dense<0.000000e+00> : vector<16x128xf32>
    %291 = tpu.matmul %290, %288, %cst_342 {dimension_numbers = #tpu.dot_dimension_numbers<[1], [0], [0], [1], [0, 0, 1, 1], [], []>} : vector<16x16xf32>, vector<16x128xf32>, vector<16x128xf32> -> vector<16x128xf32>
    %c4_343 = arith.constant 4 : index
    %c0_344 = arith.constant 0 : index
    %c0_345 = arith.constant 0 : index
    %c0_346 = arith.constant 0 : index
    %292 = vector.load %arg8[%c4_343, %c0_344, %c0_345, %c0_346] : memref<5x3x128x128xf32, #tpu.memory_space<vmem>>, vector<1x1x128x128xf32>
    %293 = vector.shape_cast %292 : vector<1x1x128x128xf32> to vector<128x128xf32>
    %cst_347 = arith.constant dense<0.000000e+00> : vector<16x128xf32>
    %294 = tpu.matmul %291, %293, %cst_347 {dimension_numbers = #tpu.dot_dimension_numbers<[1], [0], [0], [1], [0, 0, 1, 1], [], []>} : vector<16x128xf32>, vector<128x128xf32>, vector<16x128xf32> -> vector<16x128xf32>
    %295 = arith.addf %251, %294 : vector<16x128xf32>
    %c1_348 = arith.constant 1 : index
    %c0_349 = arith.constant 0 : index
    %c0_350 = arith.constant 0 : index
    %296 = vector.load %arg7[%c1_348, %c0_349, %c0_350] : memref<3x16x16xf32, #tpu.memory_space<vmem>>, vector<1x16x16xf32>
    %297 = vector.shape_cast %296 : vector<1x16x16xf32> to vector<16x16xf32>
    %cst_351 = arith.constant dense<0.000000e+00> : vector<16x128xf32>
    %298 = tpu.matmul %297, %288, %cst_351 {dimension_numbers = #tpu.dot_dimension_numbers<[1], [0], [0], [1], [0, 0, 1, 1], [], []>} : vector<16x16xf32>, vector<16x128xf32>, vector<16x128xf32> -> vector<16x128xf32>
    %c4_352 = arith.constant 4 : index
    %c1_353 = arith.constant 1 : index
    %c0_354 = arith.constant 0 : index
    %c0_355 = arith.constant 0 : index
    %299 = vector.load %arg8[%c4_352, %c1_353, %c0_354, %c0_355] : memref<5x3x128x128xf32, #tpu.memory_space<vmem>>, vector<1x1x128x128xf32>
    %300 = vector.shape_cast %299 : vector<1x1x128x128xf32> to vector<128x128xf32>
    %cst_356 = arith.constant dense<0.000000e+00> : vector<16x128xf32>
    %301 = tpu.matmul %298, %300, %cst_356 {dimension_numbers = #tpu.dot_dimension_numbers<[1], [0], [0], [1], [0, 0, 1, 1], [], []>} : vector<16x128xf32>, vector<128x128xf32>, vector<16x128xf32> -> vector<16x128xf32>
    %302 = arith.addf %295, %301 : vector<16x128xf32>
    %c2_357 = arith.constant 2 : index
    %c0_358 = arith.constant 0 : index
    %c0_359 = arith.constant 0 : index
    %303 = vector.load %arg7[%c2_357, %c0_358, %c0_359] : memref<3x16x16xf32, #tpu.memory_space<vmem>>, vector<1x16x16xf32>
    %304 = vector.shape_cast %303 : vector<1x16x16xf32> to vector<16x16xf32>
    %cst_360 = arith.constant dense<0.000000e+00> : vector<16x128xf32>
    %305 = tpu.matmul %304, %288, %cst_360 {dimension_numbers = #tpu.dot_dimension_numbers<[1], [0], [0], [1], [0, 0, 1, 1], [], []>} : vector<16x16xf32>, vector<16x128xf32>, vector<16x128xf32> -> vector<16x128xf32>
    %c4_361 = arith.constant 4 : index
    %c2_362 = arith.constant 2 : index
    %c0_363 = arith.constant 0 : index
    %c0_364 = arith.constant 0 : index
    %306 = vector.load %arg8[%c4_361, %c2_362, %c0_363, %c0_364] : memref<5x3x128x128xf32, #tpu.memory_space<vmem>>, vector<1x1x128x128xf32>
    %307 = vector.shape_cast %306 : vector<1x1x128x128xf32> to vector<128x128xf32>
    %cst_365 = arith.constant dense<0.000000e+00> : vector<16x128xf32>
    %308 = tpu.matmul %305, %307, %cst_365 {dimension_numbers = #tpu.dot_dimension_numbers<[1], [0], [0], [1], [0, 0, 1, 1], [], []>} : vector<16x128xf32>, vector<128x128xf32>, vector<16x128xf32> -> vector<16x128xf32>
    %309 = arith.addf %302, %308 : vector<16x128xf32>
    %c0_366 = arith.constant 0 : index
    %c0_367 = arith.constant 0 : index
    %c0_368 = arith.constant 0 : index
    %310 = vector.load %arg9[%c0_366, %c0_367, %c0_368] : memref<3x1x128xf32, #tpu.memory_space<vmem>>, vector<1x1x128xf32>
    %311 = vector.shape_cast %310 : vector<1x1x128xf32> to vector<1x128xf32>
    %312 = vector.broadcast %311 : vector<1x128xf32> to vector<16x128xf32>
    %313 = arith.mulf %309, %312 : vector<16x128xf32>
    %c1_369 = arith.constant 1 : index
    %c0_370 = arith.constant 0 : index
    %c0_371 = arith.constant 0 : index
    %314 = vector.load %arg9[%c1_369, %c0_370, %c0_371] : memref<3x1x128xf32, #tpu.memory_space<vmem>>, vector<1x1x128xf32>
    %315 = vector.shape_cast %314 : vector<1x1x128xf32> to vector<1x128xf32>
    %316 = vector.broadcast %315 : vector<1x128xf32> to vector<16x128xf32>
    %317 = arith.addf %313, %316 : vector<16x128xf32>
    %cst_372 = arith.constant 0.000000e+00 : f32
    %318 = vector.broadcast %cst_372 : f32 to vector<16x128xf32>
    %319 = arith.cmpf oge, %317, %318 : vector<16x128xf32>
    %c2_373 = arith.constant 2 : index
    %c0_374 = arith.constant 0 : index
    %c0_375 = arith.constant 0 : index
    %320 = vector.load %arg9[%c2_373, %c0_374, %c0_375] : memref<3x1x128xf32, #tpu.memory_space<vmem>>, vector<1x1x128xf32>
    %321 = vector.shape_cast %320 : vector<1x1x128xf32> to vector<1x128xf32>
    %322 = vector.broadcast %321 : vector<1x128xf32> to vector<16x128xf32>
    %323 = arith.mulf %317, %322 : vector<16x128xf32>
    %324 = arith.select %319, %317, %323 : vector<16x128xi1>, vector<16x128xf32>
    %c0_376 = arith.constant 0 : index
    %c0_377 = arith.constant 0 : index
    %325 = vector.load %arg10[%c0_376, %c0_377] : memref<128x128xf32, #tpu.memory_space<vmem>>, vector<128x128xf32>
    %cst_378 = arith.constant dense<0.000000e+00> : vector<16x128xf32>
    %326 = tpu.matmul %324, %325, %cst_378 {dimension_numbers = #tpu.dot_dimension_numbers<[1], [0], [0], [1], [0, 0, 1, 1], [], []>} : vector<16x128xf32>, vector<128x128xf32>, vector<16x128xf32> -> vector<16x128xf32>
    %c0_379 = arith.constant 0 : index
    %c0_380 = arith.constant 0 : index
    %c0_381 = arith.constant 0 : index
    %327 = vector.load %arg11[%c0_379, %c0_380, %c0_381] : memref<3x1x128xf32, #tpu.memory_space<vmem>>, vector<1x1x128xf32>
    %328 = vector.shape_cast %327 : vector<1x1x128xf32> to vector<1x128xf32>
    %329 = vector.broadcast %328 : vector<1x128xf32> to vector<16x128xf32>
    %330 = arith.mulf %326, %329 : vector<16x128xf32>
    %c1_382 = arith.constant 1 : index
    %c0_383 = arith.constant 0 : index
    %c0_384 = arith.constant 0 : index
    %331 = vector.load %arg11[%c1_382, %c0_383, %c0_384] : memref<3x1x128xf32, #tpu.memory_space<vmem>>, vector<1x1x128xf32>
    %332 = vector.shape_cast %331 : vector<1x1x128xf32> to vector<1x128xf32>
    %333 = vector.broadcast %332 : vector<1x128xf32> to vector<16x128xf32>
    %334 = arith.addf %330, %333 : vector<16x128xf32>
    %cst_385 = arith.constant 0.000000e+00 : f32
    %335 = vector.broadcast %cst_385 : f32 to vector<16x128xf32>
    %336 = arith.cmpf oge, %334, %335 : vector<16x128xf32>
    %c2_386 = arith.constant 2 : index
    %c0_387 = arith.constant 0 : index
    %c0_388 = arith.constant 0 : index
    %337 = vector.load %arg11[%c2_386, %c0_387, %c0_388] : memref<3x1x128xf32, #tpu.memory_space<vmem>>, vector<1x1x128xf32>
    %338 = vector.shape_cast %337 : vector<1x1x128xf32> to vector<1x128xf32>
    %339 = vector.broadcast %338 : vector<1x128xf32> to vector<16x128xf32>
    %340 = arith.mulf %334, %339 : vector<16x128xf32>
    %341 = arith.select %336, %334, %340 : vector<16x128xi1>, vector<16x128xf32>
    %c0_389 = arith.constant 0 : index
    %c0_390 = arith.constant 0 : index
    %c0_391 = arith.constant 0 : index
    %342 = vector.load %arg12[%c0_389, %c0_390, %c0_391] : memref<1x16x128xf32, #tpu.memory_space<vmem>>, vector<1x16x128xf32>
    %343 = vector.shape_cast %342 : vector<1x16x128xf32> to vector<16x128xf32>
    %344 = vector.shape_cast %341 : vector<16x128xf32> to vector<1x16x128xf32>
    tpu.vector_store %arg12[%c0_389, %c0_390, %c0_391], %344 {strides = array<i32>} : memref<1x16x128xf32, #tpu.memory_space<vmem>>, vector<1x16x128xf32>,
    return
  }
  func.func @transform_0(%arg0: i32) -> (i32, i32, i32) {
    %c0_i32 = arith.constant 0 : i32
    %c0_i32_0 = arith.constant 0 : i32
    %c0_i32_1 = arith.constant 0 : i32
    return %arg0, %c0_i32, %c0_i32_0 : i32, i32, i32
  }
  func.func @transform_1(%arg0: i32) -> (i32, i32) {
    %c0_i32 = arith.constant 0 : i32
    %c0_i32_0 = arith.constant 0 : i32
    %c0_i32_1 = arith.constant 0 : i32
    return %c0_i32, %c0_i32_0 : i32, i32
  }
  func.func @transform_2(%arg0: i32) -> (i32, i32, i32) {
    %c0_i32 = arith.constant 0 : i32
    %c0_i32_0 = arith.constant 0 : i32
    %c0_i32_1 = arith.constant 0 : i32
    %c0_i32_2 = arith.constant 0 : i32
    return %c0_i32, %c0_i32_0, %c0_i32_1 : i32, i32, i32
  }
  func.func @transform_3(%arg0: i32) -> (i32, i32, i32, i32) {
    %c0_i32 = arith.constant 0 : i32
    %c0_i32_0 = arith.constant 0 : i32
    %c0_i32_1 = arith.constant 0 : i32
    %c0_i32_2 = arith.constant 0 : i32
    %c0_i32_3 = arith.constant 0 : i32
    return %c0_i32, %c0_i32_0, %c0_i32_1, %c0_i32_2 : i32, i32, i32, i32
  }
  func.func @transform_4(%arg0: i32) -> (i32, i32, i32, i32) {
    %c0_i32 = arith.constant 0 : i32
    %c0_i32_0 = arith.constant 0 : i32
    %c0_i32_1 = arith.constant 0 : i32
    %c0_i32_2 = arith.constant 0 : i32
    %c0_i32_3 = arith.constant 0 : i32
    return %c0_i32, %c0_i32_0, %c0_i32_1, %c0_i32_2 : i32, i32, i32, i32
  }
  func.func @transform_5(%arg0: i32) -> (i32, i32, i32, i32) {
    %c0_i32 = arith.constant 0 : i32
    %c0_i32_0 = arith.constant 0 : i32
    %c0_i32_1 = arith.constant 0 : i32
    %c0_i32_2 = arith.constant 0 : i32
    %c0_i32_3 = arith.constant 0 : i32
    return %c0_i32, %c0_i32_0, %c0_i32_1, %c0_i32_2 : i32, i32, i32, i32
  }
  func.func @transform_6(%arg0: i32) -> (i32, i32, i32) {
    %c0_i32 = arith.constant 0 : i32
    %c0_i32_0 = arith.constant 0 : i32
    %c0_i32_1 = arith.constant 0 : i32
    %c0_i32_2 = arith.constant 0 : i32
    return %c0_i32, %c0_i32_0, %c0_i32_1 : i32, i32, i32
  }
  func.func @transform_7(%arg0: i32) -> (i32, i32, i32, i32) {
    %c0_i32 = arith.constant 0 : i32
    %c0_i32_0 = arith.constant 0 : i32
    %c0_i32_1 = arith.constant 0 : i32
    %c0_i32_2 = arith.constant 0 : i32
    %c0_i32_3 = arith.constant 0 : i32
    return %c0_i32, %c0_i32_0, %c0_i32_1, %c0_i32_2 : i32, i32, i32, i32
  }
  func.func @transform_8(%arg0: i32) -> (i32, i32, i32) {
    %c0_i32 = arith.constant 0 : i32
    %c0_i32_0 = arith.constant 0 : i32
    %c0_i32_1 = arith.constant 0 : i32
    %c0_i32_2 = arith.constant 0 : i32
    return %c0_i32, %c0_i32_0, %c0_i32_1 : i32, i32, i32
  }
  func.func @transform_9(%arg0: i32) -> (i32, i32) {
    %c0_i32 = arith.constant 0 : i32
    %c0_i32_0 = arith.constant 0 : i32
    %c0_i32_1 = arith.constant 0 : i32
    return %c0_i32, %c0_i32_0 : i32, i32
  }
  func.func @transform_10(%arg0: i32) -> (i32, i32, i32) {
    %c0_i32 = arith.constant 0 : i32
    %c0_i32_0 = arith.constant 0 : i32
    %c0_i32_1 = arith.constant 0 : i32
    %c0_i32_2 = arith.constant 0 : i32
    return %c0_i32, %c0_i32_0, %c0_i32_1 : i32, i32, i32
  }
  func.func @transform_11(%arg0: i32) -> (i32, i32, i32) {
    %c0_i32 = arith.constant 0 : i32
    %c0_i32_0 = arith.constant 0 : i32
    %c0_i32_1 = arith.constant 0 : i32
    return %arg0, %c0_i32, %c0_i32_0 : i32, i32, i32
  }
}

</mosaic_0001>

<bundles_post_ra>
// kernel: tpu_custom_call.1
= control target key start
LH: loop header
LB: loop body
LE: loop exit
PB: predicated region body
PF: predicated region fallthrough
CT: control target
= control target key end

     0   :  { %s9586_s0 = inlined_call_operand.hbm [shape: f32[2,16,256], index: 0, kind: input, shape index: {}]   ;;  %s9587_s1 = inlined_call_operand.hbm [shape: f32[256,128], index: 1, kind: input, shape index: {}]   ;;  %s9588_s2 = inlined_call_operand.vmem [shape: f32[3,1,128], index: 2, kind: input, shape index: {}]   ;;  %s9589_s3 = inlined_call_operand.hbm [shape: f32[5,3,16,16], index: 3, kind: input, shape index: {}]   ;;  %s9590_s4 = inlined_call_operand.hbm [shape: f32[5,3,128,128], index: 4, kind: input, shape index: {}]   ;;  %s9591_s5 = inlined_call_operand.hbm [shape: f32[5,3,1,128], index: 5, kind: input, shape index: {}]   ;;  %s9592_s6 = inlined_call_operand.hbm [shape: f32[3,16,16], index: 6, kind: input, shape index: {}]   ;;  %s9593_s7 = inlined_call_operand.hbm [shape: f32[5,3,128,128], index: 7, kind: input, shape index: {}]   ;;  %s9594_s8 = inlined_call_operand.vmem [shape: f32[3,1,128], index: 8, kind: input, shape index: {}]   ;;  %s9595_s9 = inlined_call_operand.hbm [shape: f32[128,128], index: 9, kind: input, shape index: {}]   ;;  %s9596_s10 = inlined_call_operand.vmem [shape: f32[3,1,128], index: 10, kind: input, shape index: {}]   ;;  %s9597_s11 = inlined_call_operand.hbm [shape: f32[2,16,128], index: 11, kind: output, shape index: {}]  }
   0x1   :  { %9607 = sst [smem:[#allocation23_spill]] %s9587_s1 }
   0x2   :  { %9608 = sst [smem:[#allocation24_spill]] %s9589_s3 }
   0x3   :  { %9609 = sst [smem:[#allocation25_spill]] %s9590_s4 }
   0x4   :  { %9610 = sst [smem:[#allocation26_spill]] %s9591_s5 }
   0x5   :  { %9611 = sst [smem:[#allocation27_spill]] %s9592_s6 }
   0x6   :  { %16 = vsyncpa [#allocation3], 0 }
   0x7   :  { %18 = vsyncpa [#allocation3 + $0x1], 0 }
   0x8   :  { %19 = vsyncpa [#allocation6], 0 }
   0x9   :  { %20 = vsyncpa [#allocation9], 0 }
   0xa   :  { %21 = vsyncpa [#allocation12], 0 }
   0xb   :  { %22 = vsyncpa [#allocation15], 0 }
   0xc   :  { %23 = vsyncpa [#allocation4], 0 }
   0xd   :  { %25 = vsyncpa [#allocation4 + $0x1], 0  ;;  %s8973_s17 = smov 0   ;;  %s8975_s18 = smov 0  }
   0xe   :  { %s8977_s19 = smov 0   ;;  %s8979_s20 = smov 0  }
   0xf LB: > { %s8897_s21 = smov [#allocation5]   ;;  %s8994_s23 = sadd.s32 4294967295, %s8895_s20   ;;  %s8895_s20 = sphi %s8979_s20, %s9643_s20   ;;  %s8891_s19 = sphi %s8977_s19, %s9642_s19   ;;  %s8887_s18 = sphi %s8975_s18, %s9641_s18   ;;  %s8883_s17 = sphi %s8973_s17, %s9640_s17  }
  0x10   : > { %s310_s22 = sshll.u32 %s8897_s21, 4  ;;  %p6339_p0 = scmp.ge.s32.totalorder %s8895_s20, 1  ;;  %s311_s22 = int_to_ptr.vmem [resolvable:$true] %s310_s22 }
  0x11   : > { %p9603_p1 = scmp.eq.s32.totalorder %s8994_s23, 0  ;;  %p298_p2 = scmp.lt.s32.totalorder %s8895_s20, 3 }
  0x12   : > { %s8898_s25 = smov [#allocation8]   ;;  %s8899_s28 = smov [#allocation11]  }
  0x13   : > { %p8999_p3 = pnand %p6339_p0, %p298_p2  ;;  %s339_s26 = sshll.u32 %s8898_s25, 4  ;;  %s9012_s26 = int_to_ptr.vmem [resolvable:$true] %s339_s26 }
  0x14   : > { %s365_s29 = sshll.u32 %s8899_s28, 4  ;;  %s8616_s12 = scalar_lea.vmem %s311_s22, 4096  ;;  %s9014_s29 = int_to_ptr.vmem [resolvable:$true] %s365_s29 }
  0x15   : > { %s9612_s24 = scalar_select %p8999_p3, 1, 0 }
  0x16   : > { %p8501_p5 = pneg %p8999_p3  ;;  %p8617_p8 = scmp.ne.s32.totalorder %s311_s22, %s8616_s12 }
  0x17   : > { %p8624_p11 = scmp.lt.s32.totalorder %s311_s22, %s311_s22  ;;  %p8625_p12 = scmp.lt.s32.totalorder %s8616_s12, %s8616_s12 }
  0x18   : > { %p9008_p6 = pnand %p8501_p5, %p9603_p1 }
  0x19   : > { %p8626_p13 = por %p8625_p12, %p8624_p11 }
  0x1a   : > { %p9018_p7 = pneg %p9008_p6 }
  0x1c   : > { %p8619_p9 = pnand %p8617_p8, %p9018_p7 }
  0x1e   : > { %p8620_p10 = pneg %p8619_p9 }
  0x20   : > { %p8627_p0 = pnand %p8626_p13, %p8620_p10 }
  0x22   : > { %8630 = shalt.err (!%p8627_p0)
}
  0x23   : > { %s9598_s13 = smov 128   ;;  %s9600_s14 = smov 8  }
  0x24   : > { %s9615_s1 = sld [smem:[#allocation23_spill]]  ;;  %s8642_s21 = scalar_lea.vmem %s9012_s26, 30720 }
  0x25   : > { %p8643_p2 = scmp.ne.s32.totalorder %s9012_s26, %s8642_s21  ;;  %p8650_p9 = scmp.lt.s32.totalorder %s9012_s26, %s9012_s26 }
  0x26   : > { %p8651_p10 = scmp.lt.s32.totalorder %s8642_s21, %s8642_s21 }
  0x27   : > { %p8645_p5 = pnand %p8643_p2, %p9018_p7 }
  0x28   : > { %p8652_p11 = por %p8651_p10, %p8650_p9 }
  0x29   : > { %p8646_p8 = pneg %p8645_p5 }
  0x2a   : > { %8504 = dma.hbm_to_vmem [thread:$0]  (!%p9008_p6), %s9615_s1, 4096, %s311_s22, [#allocation6], %s9598_s13, %s9598_s13, %s9600_s14  }
  0x2b   : > { %p8653_p12 = pnand %p8652_p11, %p8646_p8 }
  0x2d   : > { %8656 = shalt.err (!%p8653_p12)
}
  0x2e   : > { %s9616_s4 = sld [smem:[#allocation25_spill]]  ;;  %s8668_s22 = scalar_lea.vmem %s9014_s29, 768 }
  0x2f   : > { %p8669_p13 = scmp.ne.s32.totalorder %s9014_s29, %s8668_s22  ;;  %p8676_p5 = scmp.lt.s32.totalorder %s9014_s29, %s9014_s29 }
  0x30   : > { %p8677_p8 = scmp.lt.s32.totalorder %s8668_s22, %s8668_s22 }
  0x31   : > { %p8671_p0 = pnand %p8669_p13, %p9018_p7 }
  0x32   : > { %p8678_p9 = por %p8677_p8, %p8676_p5 }
  0x33   : > { %p8672_p2 = pneg %p8671_p0 }
  0x34   : > { %8510 = dma.hbm_to_vmem [thread:$0]  (!%p9008_p6), %s9616_s4, 30720, %s9012_s26, [#allocation9], %s9598_s13, %s9598_s13, %s9600_s14  }
  0x35   : > { %p8679_p10 = pnand %p8678_p9, %p8672_p2 }
  0x37   : > { %8682 = shalt.err (!%p8679_p10)
}
  0x38   : > { %s9617_s6 = sld [smem:[#allocation27_spill]]  ;;  %s8902_s26 = smov [#allocation7]  }
  0x39   : > { %s326_s16 = sshll.u32 %s8902_s26, 4  ;;  %s8903_s21 = smov [#allocation10]   ;;  %s327_s16 = int_to_ptr.vmem [resolvable:$true] %s326_s16 }
  0x3a   : > { %s352_s25 = sshll.u32 %s8903_s21, 4  ;;  %s8694_s28 = scalar_lea.vmem %s327_s16, 3840  ;;  %s353_s25 = int_to_ptr.vmem [resolvable:$true] %s352_s25 }
  0x3b   : > { %p8695_p11 = scmp.ne.s32.totalorder %s327_s16, %s8694_s28  ;;  %p8702_p0 = scmp.lt.s32.totalorder %s327_s16, %s327_s16 }
  0x3c   : > { %p8703_p2 = scmp.lt.s32.totalorder %s8694_s28, %s8694_s28 }
  0x3d   : > { %p8697_p12 = pnand %p8695_p11, %p9018_p7 }
  0x3e   : > { %8516 = dma.hbm_to_vmem [thread:$0]  (!%p9008_p6), %s9617_s6, 768, %s9014_s29, [#allocation12], %s9598_s13, %s9598_s13, %s9600_s14  }
  0x3f   : > { %p8698_p13 = pneg %p8697_p12  ;;  %p8704_p5 = por %p8703_p2, %p8702_p0 }
  0x41   : > { %p8705_p8 = pnand %p8704_p5, %p8698_p13 }
  0x43   : > { %8708 = shalt.err (!%p8705_p8)
}
  0x44   : > { %s9618_s3 = sld [smem:[#allocation24_spill]]  ;;  %s8720_s12 = scalar_lea.vmem %s353_s25, 240 }
  0x45   : > { %p8721_p9 = scmp.ne.s32.totalorder %s353_s25, %s8720_s12  ;;  %s8727_s15 = scalar_lea.vmem %s353_s25, 256 }
  0x46   : > { %p8728_p12 = scmp.lt.s32.totalorder %s353_s25, %s353_s25  ;;  %p8729_p13 = scmp.lt.s32.totalorder %s8727_s15, %s8720_s12 }
  0x47   : > { %p8723_p10 = pnand %p8721_p9, %p9018_p7 }
  0x48   : > { %p8730_p0 = por %p8729_p13, %p8728_p12 }
  0x49   : > { %p8724_p11 = pneg %p8723_p10 }
  0x4a   : > { %8507 = dma.hbm_to_vmem [thread:$0]  (!%p9008_p6), %s9618_s3, 3840, %s327_s16, [#allocation6], %s9598_s13, %s9598_s13, %s9600_s14  }
  0x4b   : > { %p8731_p2 = pnand %p8730_p0, %p8724_p11 }
  0x4d   : > { %8734 = shalt.err (!%p8731_p2)
}
  0x4e   : > { %s9602_s26 = smov 16   ;;  %s8905_s21 = smov 1  }
  0x4f   : > { %s9619_s5 = sld [smem:[#allocation26_spill]]  ;;  %s8906_s29 = smov [#allocation13]  }
  0x50   : > { %s378_s22 = sshll.u32 %s8906_s29, 4  ;;  %s8907_s13 = smov [#allocation14]   ;;  %s379_s22 = int_to_ptr.vmem [resolvable:$true] %s378_s22 }
  0x51   : > { %s394_s14 = sshll.u32 %s8907_s13, 4  ;;  %s8746_s12 = scalar_lea.vmem %s379_s22, 30720  ;;  %s395_s14 = int_to_ptr.vmem [resolvable:$true] %s394_s14 }
  0x52   : > { %p8747_p5 = scmp.ne.s32.totalorder %s379_s22, %s8746_s12  ;;  %p8754_p10 = scmp.lt.s32.totalorder %s379_s22, %s379_s22 }
  0x53   : > { %p8755_p11 = scmp.lt.s32.totalorder %s8746_s12, %s8746_s12 }
  0x54   : > { %p8749_p8 = pnand %p8747_p5, %p9018_p7 }
  0x55   : > { %8513 = dma.hbm_to_vmem [thread:$0]  (!%p9008_p6), %s9619_s5, 240, %s353_s25, [#allocation9], %s9602_s26, %s9602_s26, %s8905_s21  }
  0x56   : > { %p8750_p9 = pneg %p8749_p8  ;;  %p8756_p12 = por %p8755_p11, %p8754_p10 }
  0x58   : > { %p8757_p13 = pnand %p8756_p12, %p8750_p9 }
  0x5a   : > { %8760 = shalt.err (!%p8757_p13)
}
  0x5b   : > { %s9620_s15 = smov 8   ;;  %s9621_s16 = smov 128  }
  0x5c   : > { %8519 = dma.hbm_to_vmem [thread:$0]  (!%p9008_p6), %s9593_s7, 30720, %s379_s22, [#allocation12], %s9621_s16, %s9621_s16, %s9620_s15  }
  0x5d   : > { %s8772_s13 = scalar_lea.vmem %s395_s14, 2048  ;;  %p8780_p8 = scmp.lt.s32.totalorder %s395_s14, %s395_s14 }
  0x5e   : > { %p8773_p0 = scmp.ne.s32.totalorder %s395_s14, %s8772_s13  ;;  %p8781_p10 = scmp.lt.s32.totalorder %s8772_s13, %s8772_s13 }
  0x60   : > { %p8775_p2 = pnand %p8773_p0, %p9018_p7  ;;  %p8782_p9 = por %p8781_p10, %p8780_p8 }
  0x62   : > { %p8776_p5 = pneg %p8775_p2 }
  0x64   : > { %p8783_p11 = pnand %p8782_p9, %p8776_p5 }
  0x66   : > { %8786 = shalt.err (!%p8783_p11)
}
  0x67   : > { %8522 = dma.hbm_to_vmem [thread:$0]  (!%p9008_p6), %s9595_s9, 2048, %s395_s14, [#allocation15], %s9621_s16, %s9621_s16, %s9620_s15  }
  0x68   : > { %s6338_s27 = sadd.s32 4294967294, %s8895_s20   ;;  %s9103_s30 = sadd.s32 1, %s8895_s20  }
  0x69   : > { %s38_s22 = sadd.s32 1, %s8891_s19  ;;  %s35_s12 = ssub.s32 %s8895_s20, %s9103_s30 }
  0x6a   : > { %p45_p7 = scmp.ne.s32.totalorder %s8891_s19, %s8887_s18  ;;  %p36_p12 = scmp.eq.s32.totalorder %s35_s12, 0 }
  0x6b   : > { %p46_p13 = scmp.eq.s32.totalorder %s8895_s20, 0  ;;  %p51_p0 = scmp.ne.s32.totalorder %s8887_s18, %s8883_s17 }
  0x6c   : > { %p285_p2 = scmp.eq.s32.totalorder %s8994_s23, 1  ;;  %p291_p10 = scmp.eq.s32.totalorder %s6338_s27, 1 }
  0x6d   : > { %s9115_s25 = scalar_select %p36_p12, %s8891_s19, %s38_s22  }
  0x6e   : > { %p47_p5 = por %p46_p13, %p45_p7  ;;  %p9119_p8 = por %p9603_p1, %p51_p0 }
  0x6f   : > { %p9123_p6 = por %p285_p2, %p45_p7  ;;  %p8538_p9 = scmp.lt.s32.totalorder %s8895_s20, 2 }
  0x70   : > { %s9622_s21 = scalar_select %p9119_p8, 1, 0 }
  0x71   : > { %s9623_s14 = scalar_select %p9123_p6, 1, 0 }
  0x72   : > { %s411_s15 = sand.u32 1, %s8891_s19   ;;  %p9129_p11 = por %p291_p10, %p51_p0 }
  0x73   : > { %s6348_s13 = sshll.u32 %s411_s15, 5  ;;  %s6456_s28 = sshll.u32 %s8895_s20, 9 }
  0x74   : > { %s9624_s16 = scalar_select %p9129_p11, 1, 0 }
  0x75   : > { %s9137_s12 = scalar_lea.hbm %s9586_s0, %s6456_s28  ;;  %s415_s26 = scalar_lea.vmem [#allocation2], %s6348_s13 }
  0x76   : > { %s422_s1 = sshll.u32 %s415_s26, 4  ;;  %p9139_p7 = pnand %p8538_p9, %p47_p5  ;;  %s9143_s1 = int_to_ptr.vmem [resolvable:$true] %s422_s1 }
  0x77   : > { %s9145_s3 = scalar_lea.sflag [#allocation3], %s411_s15  ;;  %s8787_s4 = scalar_lea.hbm %s9137_s12, 512 }
  0x78   : > { %p8788_p12 = scmp.ne.s32.totalorder %s9137_s12, %s8787_s4  ;;  %p8789_p13 = pneg %p9139_p7 }
  0x79   : > { %s8792_s13 = scalar_lea.hbm %s9586_s0, 1024  ;;  %p8793_p5 = scmp.lt.s32.totalorder %s9137_s12, %s9586_s0 }
  0x7a   : > { %p8790_p0 = pnand %p8789_p13, %p8788_p12  ;;  %p8794_p10 = scmp.lt.s32.totalorder %s8792_s13, %s8787_s4 }
  0x7c   : > { %p8791_p2 = pneg %p8790_p0  ;;  %p8795_p9 = por %p8794_p10, %p8793_p5 }
  0x7e   : > { %p8796_p4 = pnand %p8795_p9, %p8791_p2 }
  0x80   : > { %8799 = shalt.err (!%p8796_p4)
}
  0x81   : > { %s8800_s15 = scalar_lea.vmem %s9143_s1, 512  ;;  %s8908_s5 = smov [#allocation2]  }
  0x82   : > { %p8801_p1 = scmp.ne.s32.totalorder %s9143_s1, %s8800_s15  ;;  %s8805_s6 = sshll.u32 %s8908_s5, 4  ;;  %s8806_s6 = int_to_ptr.vmem [resolvable:$false] %s8805_s6 }
  0x83   : > { %s8807_s28 = scalar_lea.vmem %s8806_s6, 1024  ;;  %p8808_p0 = scmp.lt.s32.totalorder %s9143_s1, %s8806_s6 }
  0x84   : > { %p8803_p11 = pnand %p8801_p1, %p8789_p13  ;;  %p8809_p6 = scmp.lt.s32.totalorder %s8807_s28, %s8800_s15 }
  0x86   : > { %p8804_p12 = pneg %p8803_p11  ;;  %p8810_p8 = por %p8809_p6, %p8808_p0 }
  0x88   : > { %p8811_p3 = pnand %p8810_p8, %p8804_p12 }
  0x8a   : > { %8814 = shalt.err (!%p8811_p3)
}
  0x8b   : > { %s8909_s4 = smov 256   ;;  %s9626_s29 = smov 16  }
  0x8c   : > { %8526 = dma.hbm_to_vmem [thread:$0]  (!%p9139_p7), %s9137_s12, 512, %s9143_s1, %s9145_s3, %s8909_s4, %s8909_s4, %s9626_s29  }
  0x8d   : > { %p9627_p1 = scmp.ne.s32.totalorder %s9612_s24, 0 }
  0x8e   : > { %s9170_s5 = sand.u32 (!%p9627_p1), 1, %s8887_s18   ;;  %p9628_p3 = scmp.ne.s32.totalorder (!%p9627_p1), %s9622_s21, 0 }
  0x8f   : > { %434 = sbr.rel (%p9627_p1) target bundleno = 5093 (0x13e5), region = 64  ;;  %s6352_s6 = sshll.u32 (!%p9627_p1), %s9170_s5, 5 }
  0x90   : > { %s437_s13 = scalar_lea.sflag (!%p9627_p1), [#allocation3], %s9170_s5  ;;  %s9174_s26 = scalar_lea.vmem (!%p9627_p1), [#allocation2], %s6352_s6 }
  0x94   : > { %8858 = dma.done.wait (%p9628_p3), %s437_s13, 512  }
  0x95   : > { %8860 = vsyncadd (%p9628_p3), %s437_s13, 4294966784  ;;  %p9629_p4 = scmp.eq.s32.totalorder %s8994_s23, 0 }
  0x97   : > { %8862 = dma.done.wait (%p9629_p4), [#allocation6], 7936   ;;  %p9630_p8 = pmov %p9629_p4 }
  0x98   : > { %p9631_p6 = pmov %p9629_p4 }
  0x99   : > { %8864 = vsyncadd (%p9630_p8), [#allocation6], 4294959360 }
  0x9a   : > { %8866 = dma.done.wait (%p9631_p6), [#allocation9], 30960   ;;  %p9632_p11 = pmov %p9629_p4 }
  0x9b   : > { %p9633_p7 = pmov %p9629_p4 }
  0x9c   : > { %8868 = vsyncadd (%p9632_p11), [#allocation9], 4294936336 }
  0x9d   : > { %8870 = dma.done.wait (%p9633_p7), [#allocation12], 31488   ;;  %p9634_p13 = pmov %p9629_p4 }
  0x9e   : > { %p9635_p2 = pmov %p9629_p4 }
  0x9f   : > { %8872 = vsyncadd (%p9634_p13), [#allocation12], 4294935808 }
  0xa0   : > { %8874 = dma.done.wait (%p9635_p2), [#allocation15], 2048   ;;  %p9636_p5 = pmov %p9635_p2 }
  0xa1   : > { %v542_v0 = vld [vmem:[#allocation5 + $0xf8] sm:$0xff]  ;;  %v541_v2 = vld [vmem:[#allocation5 + $0xf0] sm:$0xff]  ;;  %v540_v4 = vld [vmem:[#allocation5 + $0xe8] sm:$0xff]  ;;  %vm653_vm0 = vcmask 130048   ;;  %s6360_s13 = sshll.u32 %s9170_s5, 4  ;;  %s6457_s15 = sshll.u32 %s8994_s23, 8 }
  0xa2   : > { %8876 = vsyncadd (%p9636_p5), [#allocation15], 4294965248  ;;  %v526_v1 = vld [vmem:[#allocation5 + $0x78] sm:$0xff]  ;;  %6458 = vmatprep.subr.mxu0 %v542_v0  ;;  %v525_v3 = vld [vmem:[#allocation5 + $0x70] sm:$0xff]  ;;  %s506_s27 = scalar_lea.vmem [#allocation16], %s6360_s13  ;;  %s9543_s29 = scalar_lea.hbm %s9597_s11, %s6457_s15 }
  0xa3   : > { %6459 = vmatpush3.msra.mxu0 %v526_v1  ;;  %v524_v5 = vld [vmem:[#allocation5 + $0x68] sm:$0xff]  ;;  %v539_v6 = vld [vmem:[#allocation5 + $0xe0] sm:$0xff]  ;;  %v538_v8 = vld [vmem:[#allocation5 + $0xd8] sm:$0xff]  ;;  %s6198_s22 = sshll.u32 %s506_s27, 4  ;;  %s6185_s23 = scalar_lea.sflag [#allocation4], %s9170_s5  ;;  %s9538_s22 = int_to_ptr.vmem [resolvable:$true] %s6198_s22 }
  0xa4   : > { %6460 = vmatprep.subr.mxu0 %v541_v2  ;;  %v523_v7 = vld [vmem:[#allocation5 + $0x60] sm:$0xff]  ;;  %v522_v9 = vld [vmem:[#allocation5 + $0x58] sm:$0xff]  ;;  %v537_v10 = vld [vmem:[#allocation5 + $0xd0] sm:$0xff]  ;;  %s8815_s6 = scalar_lea.vmem %s9538_s22, 256  ;;  %p9637_p9 = scmp.ne.s32.totalorder %s9623_s14, 0 }
  0xa5   : > { %6461 = vmatpush3.msra.mxu0 %v525_v3  ;;  %v521_v11 = vld [vmem:[#allocation5 + $0x50] sm:$0xff]  ;;  %v536_v12 = vld [vmem:[#allocation5 + $0xc8] sm:$0xff]  ;;  %v535_v15 = vld [vmem:[#allocation5 + $0xc0] sm:$0xff]  ;;  %p8816_p10 = scmp.ne.s32.totalorder %s9538_s22, %s8815_s6  ;;  %s8910_s13 = smov [#allocation16]  }
  0xa6   : > { %6462 = vmatprep.subr.mxu0 %v540_v4  ;;  %v508_v13 = vld [vmem:[%s9174_s26 + $0x8] sm:$0xff]  ;;  %v850_v17 = vld [vmem:[#allocation8 + $0xf0] sm:$0xff]  ;;  %v534_v19 = vld [vmem:[#allocation5 + $0xb8] sm:$0xff] }
  0xa7   : > { %6463 = vmatpush3.msra.mxu0 %v524_v5  ;;  %v520_v14 = vld [vmem:[#allocation5 + $0x48] sm:$0xff]  ;;  %607 = vmatprep.mubr.f32.mxu0 %v508_v13  ;;  %v519_v18 = vld [vmem:[#allocation5 + $0x40] sm:$0xff]  ;;  %v849_v20 = vld [vmem:[#allocation8 + $0xe8] sm:$0xff]  ;;  %p8817_p12 = pnand %p8816_p10, %p9637_p9 }
  0xa8   : > { %6464 = vmatprep.subr.mxu0 %v539_v6  ;;  %v851_v16 = vld [vmem:[#allocation8 + $0xf8] sm:$0xff]  ;;  %v518_v21 = vld [vmem:[#allocation5 + $0x38] sm:$0xff]  ;;  %v533_v22 = vld [vmem:[#allocation5 + $0xb0] sm:$0xff] }
  0xa9   : > { %6465 = vmatpush3.msra.mxu0 %v523_v7  ;;  %7188 = vmatprep.subr.mxu1 %v851_v16  ;;  %v848_v23 = vld [vmem:[#allocation8 + $0xe0] sm:$0xff]  ;;  %v532_v25 = vld [vmem:[#allocation5 + $0xa8] sm:$0xff]  ;;  %v531_v28 = vld [vmem:[#allocation5 + $0xa0] sm:$0xff]  ;;  %p8818_p0 = pneg %p8817_p12 }
  0xaa   : > { %6466 = vmatprep.subr.mxu0 %v538_v8  ;;  %7189 = vmatpush3.msra.mxu1 %v851_v16  ;;  %v517_v24 = vld [vmem:[#allocation5 + $0x30] sm:$0xff]  ;;  %v847_v26 = vld [vmem:[#allocation8 + $0xd8] sm:$0xff]  ;;  %v846_v29 = vld [vmem:[#allocation8 + $0xd0] sm:$0xff] }
  0xab   : > { %6467 = vmatpush3.msra.mxu0 %v522_v9  ;;  %7190 = vmatprep.subr.mxu1 %v850_v17  ;;  %v516_v27 = vld [vmem:[#allocation5 + $0x28] sm:$0xff]  ;;  %v515_v30 = vld [vmem:[#allocation5 + $0x20] sm:$0xff]  ;;  %v530_v31 = vld [vmem:[#allocation5 + $0x98] sm:$0xff] }
  0xac   : > { %6468 = vmatprep.subr.mxu0 %v537_v10  ;;  %7191 = vmatpush3.msra.mxu1 %v850_v17  ;;  %v845_v32 = vld [vmem:[#allocation8 + $0xc8] sm:$0xff]  ;;  %v529_v34 = vld [vmem:[#allocation5 + $0x90] sm:$0xff]  ;;  %v528_v37 = vld [vmem:[#allocation5 + $0x88] sm:$0xff] }
  0xad   : > { %6469 = vmatpush3.msra.mxu0 %v521_v11  ;;  %7192 = vmatprep.subr.mxu1 %v849_v20  ;;  %v514_v33 = vld [vmem:[#allocation5 + $0x18] sm:$0xff]  ;;  %v844_v35 = vld [vmem:[#allocation8 + $0xc0] sm:$0xff]  ;;  %v512_v38 = vld [vmem:[#allocation5 + $0x8] sm:$0xff] }
  0xae   : > { %6470 = vmatprep.subr.mxu0 %v536_v12  ;;  %7193 = vmatpush3.msra.mxu1 %v849_v20  ;;  %v513_v36 = vld [vmem:[#allocation5 + $0x10] sm:$0xff]  ;;  %v527_v39 = vld [vmem:[#allocation5 + $0x80] sm:$0xff]  ;;  %v510_v42 = vld [vmem:[%s9174_s26 + $0x18] sm:$0xff] }
  0xaf   : > { %6471 = vmatpush3.msra.mxu0 %v520_v14  ;;  %7194 = vmatprep.subr.mxu1 %v848_v23  ;;  %v511_v40 = vld [vmem:[#allocation5] sm:$0xff]  ;;  %v509_v43 = vld [vmem:[%s9174_s26 + $0x10] sm:$0xff]  ;;  %v843_v44 = vld [vmem:[#allocation8 + $0xb8] sm:$0xff] }
  0xb0   : > { %6472 = vmatprep.subr.mxu0 %v535_v15  ;;  %7195 = vmatpush3.msra.mxu1 %v848_v23  ;;  %v507_v41 = vld [vmem:[%s9174_s26] sm:$0xff]  ;;  %v841_v46 = vld [vmem:[#allocation8 + $0xa8] sm:$0xff]  ;;  %v840_v47 = vld [vmem:[#allocation8 + $0xa0] sm:$0xff]  ;;  %s8819_s26 = sshll.u32 %s8910_s13, 4  ;;  %s8820_s26 = int_to_ptr.vmem [resolvable:$false] %s8819_s26 }
  0xb1   : > { %6473 = vmatpush3.msra.mxu0 %v519_v18  ;;  %7196 = vmatprep.subr.mxu1 %v847_v26  ;;  %v842_v45 = vld [vmem:[#allocation8 + $0xb0] sm:$0xff]  ;;  %v839_v48 = vld [vmem:[#allocation8 + $0x98] sm:$0xff]  ;;  %v837_v50 = vld [vmem:[#allocation8 + $0x88] sm:$0xff]  ;;  %s8821_s1 = scalar_lea.vmem %s8820_s26, 512  ;;  %p8822_p1 = scmp.lt.s32.totalorder %s9538_s22, %s8820_s26 }
  0xb2   : > { %6474 = vmatprep.subr.mxu0 %v534_v19  ;;  %7197 = vmatpush3.msra.mxu1 %v847_v26  ;;  %v838_v49 = vld [vmem:[#allocation8 + $0x90] sm:$0xff]  ;;  %v836_v51 = vld [vmem:[#allocation8 + $0x80] sm:$0xff]  ;;  %v652_v6 = vld [vmem:[#allocation7 + $0x8] sm:$0xff]  ;;  %p8823_p3 = scmp.lt.s32.totalorder %s8821_s1, %s8815_s6 }
  0xb3   : > { %6475 = vmatpush3.msra.mxu0 %v518_v21  ;;  %7198 = vmatprep.subr.mxu1 %v846_v29  ;;  %v651_v52 = vld [vmem:[#allocation7] sm:$0xff]  ;;  %v752_v7 = vld [vmem:[#allocation7 + $0x10] sm:$0xff]  ;;  %v753_v8 = vld [vmem:[#allocation7 + $0x18] sm:$0xff] }
  0xb4   : > { %6476 = vmatprep.subr.mxu0 %v533_v22  ;;  %7199 = vmatpush3.msra.mxu1 %v846_v29  ;;  %v6361_v55 = vld [vmem:[%s9588_s2] ss:$0 sm:$0xff]  ;;  %v6363_v59 = vld [vmem:[%s9588_s2 + $0x1] ss:$0 sm:$0xff]  ;;  %v6365_v0 = vld [vmem:[%s9588_s2 + $0x2] ss:$0 sm:$0xff]  ;;  %p8824_p4 = por %p8823_p3, %p8822_p1 }
  0xb5   : > { %6477 = vmatpush3.msra.mxu0 %v517_v24  ;;  %7200 = vmatprep.subr.mxu1 %v845_v32  ;;  %v750_v9 = vld [vmem:[#allocation8 + $0x78] sm:$0xff]  ;;  %v749_v10 = vld [vmem:[#allocation8 + $0x70] sm:$0xff]  ;;  %v748_v11 = vld [vmem:[#allocation8 + $0x68] sm:$0xff] }
  0xb6   : > { %6478 = vmatprep.subr.mxu0 %v532_v25  ;;  %7201 = vmatpush3.msra.mxu1 %v845_v32  ;;  %v747_v12 = vld [vmem:[#allocation8 + $0x60] sm:$0xff]  ;;  %v746_v13 = vld [vmem:[#allocation8 + $0x58] sm:$0xff]  ;;  %v745_v14 = vld [vmem:[#allocation8 + $0x50] sm:$0xff]  ;;  %p8825_p8 = pnand %p8824_p4, %p8818_p0 }
  0xb7   : > { %6479 = vmatpush3.msra.mxu0 %v516_v27  ;;  %7202 = vmatprep.subr.mxu1 %v844_v35  ;;  %v744_v15 = vld [vmem:[#allocation8 + $0x48] sm:$0xff]  ;;  %v743_v16 = vld [vmem:[#allocation8 + $0x40] sm:$0xff]  ;;  %v742_v17 = vld [vmem:[#allocation8 + $0x38] sm:$0xff] }
  0xb8   : > { %6480 = vmatprep.subr.mxu0 %v531_v28  ;;  %7203 = vmatpush3.msra.mxu1 %v844_v35  ;;  %v741_v18 = vld [vmem:[#allocation8 + $0x30] sm:$0xff]  ;;  %v740_v19 = vld [vmem:[#allocation8 + $0x28] sm:$0xff]  ;;  %v739_v20 = vld [vmem:[#allocation8 + $0x20] sm:$0xff] }
  0xb9   : > { %6481 = vmatpush3.msra.mxu0 %v515_v30  ;;  %7204 = vmatprep.subr.mxu1 %v843_v44  ;;  %v738_v21 = vld [vmem:[#allocation8 + $0x18] sm:$0xff]  ;;  %v737_v22 = vld [vmem:[#allocation8 + $0x10] sm:$0xff]  ;;  %v736_v23 = vld [vmem:[#allocation8 + $0x8] sm:$0xff] }
  0xba   : > { %6482 = vmatprep.subr.mxu0 %v530_v31  ;;  %7205 = vmatpush3.msra.mxu1 %v843_v44  ;;  %v735_v24 = vld [vmem:[#allocation8] sm:$0xff]  ;;  %v1003_v29 = vld [vmem:[#allocation7 + $0x20] sm:$0xff]  ;;  %v1004_v30 = vld [vmem:[#allocation7 + $0x28] sm:$0xff] }
  0xbb   : > { %6483 = vmatpush3.msra.mxu0 %v514_v33  ;;  %7206 = vmatprep.subr.mxu1 %v842_v45  ;;  %v1102_v31 = vld [vmem:[#allocation8 + $0x178] sm:$0xff]  ;;  %v1101_v32 = vld [vmem:[#allocation8 + $0x170] sm:$0xff]  ;;  %v1100_v33 = vld [vmem:[#allocation8 + $0x168] sm:$0xff] }
  0xbc   : > { %6484 = vmatprep.subr.mxu0 %v529_v34  ;;  %7207 = vmatpush3.msra.mxu1 %v842_v45  ;;  %v1099_v34 = vld [vmem:[#allocation8 + $0x160] sm:$0xff]  ;;  %v1098_v35 = vld [vmem:[#allocation8 + $0x158] sm:$0xff]  ;;  %v1089_v44 = vld [vmem:[#allocation8 + $0x110] sm:$0xff] }
  0xbd   : > { %6485 = vmatpush3.msra.mxu0 %v513_v36  ;;  %7208 = vmatprep.subr.mxu1 %v841_v46  ;;  %v1097_v36 = vld [vmem:[#allocation8 + $0x150] sm:$0xff]  ;;  %v1088_v45 = vld [vmem:[#allocation8 + $0x108] sm:$0xff] }
  0xbe   : > { %6486 = vmatprep.subr.mxu0 %v528_v37  ;;  %7209 = vmatpush3.msra.mxu1 %v841_v46  ;;  %v1096_v37 = vld [vmem:[#allocation8 + $0x148] sm:$0xff]  ;;  %v1087_v46 = vld [vmem:[#allocation8 + $0x100] sm:$0xff] }
  0xbf   : > { %6487 = vmatpush3.msra.mxu0 %v512_v38  ;;  %7210 = vmatprep.subr.mxu1 %v840_v47  ;;  %v1095_v38 = vld [vmem:[#allocation8 + $0x140] sm:$0xff] }
  0xc0   : > { %6488 = vmatprep.subr.mxu0 %v527_v39  ;;  %7211 = vmatpush3.msra.mxu1 %v840_v47  ;;  %v1094_v39 = vld [vmem:[#allocation8 + $0x138] sm:$0xff] }
  0xc1   : > { %6489 = vmatpush3.msra.mxu0 %v511_v40  ;;  %7212 = vmatprep.subr.mxu1 %v839_v48  ;;  %v1093_v40 = vld [vmem:[#allocation8 + $0x130] sm:$0xff]  ;;  %v1311_v47 = vld [vmem:[#allocation13 + $0x78] sm:$0xff] }
  0xc2   : > { %608 = vmatmul.mubr.f32.vlgmr.msra.gmra.mxu0 %v507_v41  ;;  %7213 = vmatpush3.msra.mxu1 %v839_v48  ;;  %v1092_v41 = vld [vmem:[#allocation8 + $0x128] sm:$0xff] }
  0xc3   : > { %612 = vmatprep.mubr.f32.mxu0 %v510_v42  ;;  %7214 = vmatprep.subr.mxu1 %v838_v49  ;;  %v1091_v42 = vld [vmem:[#allocation8 + $0x120] sm:$0xff] }
  0xc4   : > { %7215 = vmatpush3.msra.mxu1 %v838_v49 }
  0xc5   : > { %7216 = vmatprep.subr.mxu1 %v837_v50 }
  0xc6   : > { %613 = vmatmul.mubr.f32.gmra.mxu0 %v509_v43  ;;  %7217 = vmatpush3.msra.mxu1 %v837_v50  ;;  %v1090_v43 = vld [vmem:[#allocation8 + $0x118] sm:$0xff] }
  0xc7   : > { %7218 = vmatprep.subr.mxu1 %v836_v51  ;;  %7178 = vmatprep.mubr.msk.f32.mxu0 %vm653_vm0, %v651_v52  ;;  %v1310_v52 = vld [vmem:[#allocation13 + $0x70] sm:$0xff] }
  0xc8   : > { %7219 = vmatpush3.msra.mxu1 %v836_v51 }
 0x182   : > { %v6490_v53 = vpop.f32.mrf.mxu0 }
 0x184   : > { %v6491_v54 = vpop.f32.mrf.mxu0 }
 0x185   : > { %v6492_v56 = vadd.f32 %v6491_v54, %v6490_v53  ;;  %v1309_v53 = vld [vmem:[#allocation13 + $0x68] sm:$0xff]  ;;  %v1308_v54 = vld [vmem:[#allocation13 + $0x60] sm:$0xff] }
 0x186   : > { %v6493_v57 = vpop.f32.mrf.mxu0 }
 0x187   : > { %v625_v58 = vmul.f32 %v6492_v56, %v6361_v55  ;;  %v1306_v56 = vld [vmem:[#allocation13 + $0x50] sm:$0xff] }
 0x188   : > { %v6494_v60 = vpop.f32.mrf.mxu0 }
 0x189   : > { %v6495_v61 = vadd.f32 %v6494_v60, %v6493_v57  ;;  %v635_v62 = vadd.f32 %v6363_v59, %v625_v58  ;;  %v1305_v57 = vld [vmem:[#allocation13 + $0x48] sm:$0xff]  ;;  %v1304_v58 = vld [vmem:[#allocation13 + $0x40] sm:$0xff]  ;;  %v1302_v60 = vld [vmem:[#allocation13 + $0x30] sm:$0xff] }
 0x18b   : > { %v626_v63 = vmul.f32 %v6495_v61, %v6361_v55  ;;  %v647_v2 = vmul.f32 %v6365_v0, %v635_v62  ;;  %vm637_vm2 = vcmp.ge.f32.partialorder %v635_v62, 0.0  ;;  %v1307_v55 = vld [vmem:[#allocation13 + $0x58] sm:$0xff]  ;;  %v1301_v61 = vld [vmem:[#allocation13 + $0x28] sm:$0xff] }
 0x18d   : > { %v636_v1 = vadd.f32 %v6363_v59, %v626_v63  ;;  %v9214_v5 = vsel %vm637_vm2, %v635_v62, %v647_v2  ;;  %v1303_v59 = vld [vmem:[#allocation13 + $0x38] sm:$0xff]  ;;  %v1300_v62 = vld [vmem:[#allocation13 + $0x20] sm:$0xff] }
 0x18e   : > { %v1299_v63 = vld [vmem:[#allocation13 + $0x18] sm:$0xff]  ;;  %v1296_v2 = vld [vmem:[#allocation13] sm:$0xff] }
 0x18f   : > { %vm638_vm1 = vcmp.ge.f32.partialorder %v636_v1, 0.0  ;;  %v648_v3 = vmul.f32 %v6365_v0, %v636_v1  ;;  %v1298_v0 = vld [vmem:[#allocation13 + $0x10] sm:$0xff] }
 0x191   : > { %v9210_v4 = vsel %vm638_vm1, %v636_v1, %v648_v3  ;;  %v1297_v1 = vld [vmem:[#allocation13 + $0x8] sm:$0xff]  ;;  %v9232_v3 = vld [vmem:[#allocation11] sm:$0xff] }
 0x192   : > { %7174 = vmatprep.subr.mxu0 %v9210_v4  ;;  %7258 = vmatprep.subr.mxu1 %v9210_v4 }
 0x193   : > { %7175 = vmatpush3.msra.mxu0 %v9210_v4 }
 0x194   : > { %7176 = vmatprep.subr.mxu0 %v9214_v5 }
 0x195   : > { %7177 = vmatpush3.msra.mxu0 %v9214_v5 }
 0x196   : > { %7179 = vmatmul.mubr.msk.f32.vlgmr.msra.gmra.mxu0 %vm653_vm0, %v652_v6  ;;  %7181 = vmatprep.subr.mxu0 %v9210_v4 }
 0x197   : > { %7182 = vmatpush3.msra.mxu0 %v9210_v4  ;;  %7185 = vmatprep.mubr.msk.f32.mxu0 %vm653_vm0, %v752_v7 }
 0x198   : > { %7183 = vmatprep.subr.mxu0 %v9214_v5 }
 0x199   : > { %7184 = vmatpush3.msra.mxu0 %v9214_v5 }
 0x19a   : > { %7186 = vmatmul.mubr.msk.f32.vlgmr.msra.gmra.mxu0 %vm653_vm0, %v753_v8  ;;  %7223 = vmatprep.subr.mxu0 %v750_v9 }
 0x19b   : > { %7224 = vmatpush3.msra.mxu0 %v750_v9 }
 0x19c   : > { %7225 = vmatprep.subr.mxu0 %v749_v10 }
 0x19d   : > { %7226 = vmatpush3.msra.mxu0 %v749_v10  ;;  %v6372_v10 = vld [vmem:[#allocation10] ss:$0 sm:$0xff] }
 0x19e   : > { %7227 = vmatprep.subr.mxu0 %v748_v11 }
 0x19f   : > { %7228 = vmatpush3.msra.mxu0 %v748_v11 }
 0x1a0   : > { %7229 = vmatprep.subr.mxu0 %v747_v12 }
 0x1a1   : > { %7230 = vmatpush3.msra.mxu0 %v747_v12 }
 0x1a2   : > { %7231 = vmatprep.subr.mxu0 %v746_v13 }
 0x1a3   : > { %7232 = vmatpush3.msra.mxu0 %v746_v13  ;;  %v6373_v13 = vld [vmem:[#allocation10 + $0x1] ss:$0 sm:$0xff] }
 0x1a4   : > { %7233 = vmatprep.subr.mxu0 %v745_v14 }
 0x1a5   : > { %7234 = vmatpush3.msra.mxu0 %v745_v14 }
 0x1a6   : > { %7235 = vmatprep.subr.mxu0 %v744_v15 }
 0x1a7   : > { %7236 = vmatpush3.msra.mxu0 %v744_v15 }
 0x1a8   : > { %7237 = vmatprep.subr.mxu0 %v743_v16 }
 0x1a9   : > { %7238 = vmatpush3.msra.mxu0 %v743_v16 }
 0x1aa   : > { %7239 = vmatprep.subr.mxu0 %v742_v17 }
 0x1ab   : > { %7240 = vmatpush3.msra.mxu0 %v742_v17  ;;  %v6374_v17 = vld [vmem:[#allocation10 + $0x2] ss:$0 sm:$0xff] }
 0x1ac   : > { %7241 = vmatprep.subr.mxu0 %v741_v18 }
 0x1ad   : > { %7242 = vmatpush3.msra.mxu0 %v741_v18 }
 0x1ae   : > { %7243 = vmatprep.subr.mxu0 %v740_v19 }
 0x1af   : > { %7244 = vmatpush3.msra.mxu0 %v740_v19 }
 0x1b0   : > { %7245 = vmatprep.subr.mxu0 %v739_v20 }
 0x1b1   : > { %7246 = vmatpush3.msra.mxu0 %v739_v20 }
 0x1b2   : > { %7247 = vmatprep.subr.mxu0 %v738_v21 }
 0x1b3   : > { %7248 = vmatpush3.msra.mxu0 %v738_v21 }
 0x1b4   : > { %7249 = vmatprep.subr.mxu0 %v737_v22 }
 0x1b5   : > { %7250 = vmatpush3.msra.mxu0 %v737_v22 }
 0x1b6   : > { %7251 = vmatprep.subr.mxu0 %v736_v23 }
 0x1b7   : > { %7252 = vmatpush3.msra.mxu0 %v736_v23 }
 0x1b8   : > { %7253 = vmatprep.subr.mxu0 %v735_v24 }
 0x1b9   : > { %7254 = vmatpush3.msra.mxu0 %v735_v24 }
 0x256   : > { %v7180_v25 = vpop.f32.mrf.mxu0 }
 0x258   : > { %v726_v26 = vpop.f32.mrf.mxu0 }
 0x259   : > { %7255 = vmatprep.mubr.f32.mxu0 %v726_v26  ;;  %v9245_v26 = vld [vmem:[#allocation11 + $0x10] sm:$0xff] }
 0x25a   : > { %v7187_v27 = vpop.f32.mrf.mxu0  ;;  %7256 = vmatmul.mubr.f32.vlgmr.msra.gmra.mxu0 %v7180_v25  ;;  %v9242_v25 = vld [vmem:[#allocation11 + $0x8] sm:$0xff] }
 0x25b   : > { %7304 = vmatprep.mubr.msk.f32.mxu0 %vm653_vm0, %v9232_v3 }
 0x25c   : > { %v826_v28 = vpop.f32.mrf.mxu0 }
 0x25d   : > { %7220 = vmatprep.mubr.f32.mxu1 %v826_v28  ;;  %v1412_v28 = vld [vmem:[#allocation13 + $0xf8] sm:$0xff] }
 0x25e   : > { %7221 = vmatmul.mubr.f32.vlgmr.msra.gmra.mxu1 %v7187_v27  ;;  %v9254_v27 = vld [vmem:[#allocation11 + $0x18] sm:$0xff] }
 0x25f   : > { %7259 = vmatpush3.msra.mxu1 %v9210_v4  ;;  %7262 = vmatprep.mubr.msk.f32.mxu1 %vm653_vm0, %v1003_v29  ;;  %v1411_v29 = vld [vmem:[#allocation13 + $0xf0] sm:$0xff] }
 0x260   : > { %7260 = vmatprep.subr.mxu1 %v9214_v5 }
 0x261   : > { %7261 = vmatpush3.msra.mxu1 %v9214_v5 }
 0x262   : > { %7263 = vmatmul.mubr.msk.f32.vlgmr.msra.gmra.mxu1 %vm653_vm0, %v1004_v30  ;;  %7265 = vmatprep.subr.mxu1 %v1102_v31  ;;  %v1410_v30 = vld [vmem:[#allocation13 + $0xe8] sm:$0xff] }
 0x263   : > { %7266 = vmatpush3.msra.mxu1 %v1102_v31  ;;  %v1409_v31 = vld [vmem:[#allocation13 + $0xe0] sm:$0xff] }
 0x264   : > { %7267 = vmatprep.subr.mxu1 %v1101_v32 }
 0x265   : > { %7268 = vmatpush3.msra.mxu1 %v1101_v32  ;;  %v1408_v32 = vld [vmem:[#allocation13 + $0xd8] sm:$0xff] }
 0x266   : > { %7269 = vmatprep.subr.mxu1 %v1100_v33 }
 0x267   : > { %7270 = vmatpush3.msra.mxu1 %v1100_v33  ;;  %v1407_v33 = vld [vmem:[#allocation13 + $0xd0] sm:$0xff] }
 0x268   : > { %7271 = vmatprep.subr.mxu1 %v1099_v34 }
 0x269   : > { %7272 = vmatpush3.msra.mxu1 %v1099_v34  ;;  %v1406_v34 = vld [vmem:[#allocation13 + $0xc8] sm:$0xff] }
 0x26a   : > { %7273 = vmatprep.subr.mxu1 %v1098_v35 }
 0x26b   : > { %7274 = vmatpush3.msra.mxu1 %v1098_v35  ;;  %v1405_v35 = vld [vmem:[#allocation13 + $0xc0] sm:$0xff] }
 0x26c   : > { %7275 = vmatprep.subr.mxu1 %v1097_v36 }
 0x26d   : > { %7276 = vmatpush3.msra.mxu1 %v1097_v36  ;;  %v1404_v36 = vld [vmem:[#allocation13 + $0xb8] sm:$0xff] }
 0x26e   : > { %7277 = vmatprep.subr.mxu1 %v1096_v37 }
 0x26f   : > { %7278 = vmatpush3.msra.mxu1 %v1096_v37  ;;  %v1403_v37 = vld [vmem:[#allocation13 + $0xb0] sm:$0xff] }
 0x270   : > { %7279 = vmatprep.subr.mxu1 %v1095_v38 }
 0x271   : > { %7280 = vmatpush3.msra.mxu1 %v1095_v38  ;;  %v1402_v38 = vld [vmem:[#allocation13 + $0xa8] sm:$0xff] }
 0x272   : > { %7281 = vmatprep.subr.mxu1 %v1094_v39 }
 0x273   : > { %7282 = vmatpush3.msra.mxu1 %v1094_v39  ;;  %v1401_v39 = vld [vmem:[#allocation13 + $0xa0] sm:$0xff] }
 0x274   : > { %7283 = vmatprep.subr.mxu1 %v1093_v40 }
 0x275   : > { %7284 = vmatpush3.msra.mxu1 %v1093_v40  ;;  %v1400_v40 = vld [vmem:[#allocation13 + $0x98] sm:$0xff] }
 0x276   : > { %7285 = vmatprep.subr.mxu1 %v1092_v41 }
 0x277   : > { %7286 = vmatpush3.msra.mxu1 %v1092_v41  ;;  %v1399_v41 = vld [vmem:[#allocation13 + $0x90] sm:$0xff] }
 0x278   : > { %7287 = vmatprep.subr.mxu1 %v1091_v42 }
 0x279   : > { %7288 = vmatpush3.msra.mxu1 %v1091_v42  ;;  %v1398_v42 = vld [vmem:[#allocation13 + $0x88] sm:$0xff] }
 0x27a   : > { %7289 = vmatprep.subr.mxu1 %v1090_v43 }
 0x27b   : > { %7290 = vmatpush3.msra.mxu1 %v1090_v43  ;;  %v1397_v43 = vld [vmem:[#allocation13 + $0x80] sm:$0xff] }
 0x27c   : > { %7291 = vmatprep.subr.mxu1 %v1089_v44 }
 0x27d   : > { %7292 = vmatpush3.msra.mxu1 %v1089_v44 }
 0x27e   : > { %7293 = vmatprep.subr.mxu1 %v1088_v45 }
 0x27f   : > { %7294 = vmatpush3.msra.mxu1 %v1088_v45 }
 0x280   : > { %7295 = vmatprep.subr.mxu1 %v1087_v46 }
 0x281   : > { %7296 = vmatpush3.msra.mxu1 %v1087_v46  ;;  %v1742_v46 = vld [vmem:[#allocation7 + $0x30] sm:$0xff] }
 0x282   : > { %7349 = vmatprep.subr.mxu1 %v1311_v47 }
 0x31a   : > { %v7257_v6 = vpop.f32.mrf.mxu0 }
 0x31c   : > { %v993_v8 = vpop.f32.mrf.mxu0 }
 0x31e   : > { %v7222_v48 = vpop.f32.mrf.mxu1 }
 0x31f   : > { %v999_v7 = vadd.f32 %v7257_v6, %v7222_v48  ;;  %v1657_v6 = vld [vmem:[#allocation13 + $0x148] sm:$0xff] }
 0x320   : > { %v918_v49 = vpop.f32.mrf.mxu1 }
 0x321   : > { %v994_v11 = vadd.f32 %v993_v8, %v918_v49  ;;  %v1743_v49 = vld [vmem:[#allocation7 + $0x38] sm:$0xff]  ;;  %v1656_v8 = vld [vmem:[#allocation13 + $0x140] sm:$0xff] }
 0x322   : > { %v7264_v50 = vpop.f32.mrf.mxu1 }
 0x324   : > { %v1077_v51 = vpop.f32.mrf.mxu1 }
 0x325   : > { %7297 = vmatprep.mubr.f32.mxu1 %v1077_v51  ;;  %v1843_v51 = vld [vmem:[#allocation7 + $0x40] sm:$0xff] }
 0x326   : > { %7298 = vmatmul.mubr.f32.vlgmr.msra.gmra.mxu1 %v7264_v50  ;;  %v9268_v50 = vld [vmem:[#allocation11 + $0x20] sm:$0xff] }
 0x327   : > { %7350 = vmatpush3.msra.mxu1 %v1311_v47 }
 0x328   : > { %7351 = vmatprep.subr.mxu1 %v1310_v52 }
 0x329   : > { %7352 = vmatpush3.msra.mxu1 %v1310_v52  ;;  %v1942_v52 = vld [vmem:[#allocation8 + $0x278] sm:$0xff] }
 0x32a   : > { %7353 = vmatprep.subr.mxu1 %v1309_v53 }
 0x32b   : > { %7354 = vmatpush3.msra.mxu1 %v1309_v53  ;;  %v9274_v53 = vld [vmem:[#allocation11 + $0x28] sm:$0xff] }
 0x32c   : > { %7355 = vmatprep.subr.mxu1 %v1308_v54 }
 0x32d   : > { %7356 = vmatpush3.msra.mxu1 %v1308_v54  ;;  %v1844_v54 = vld [vmem:[#allocation7 + $0x48] sm:$0xff] }
 0x32e   : > { %7357 = vmatprep.subr.mxu1 %v1307_v55 }
 0x32f   : > { %7358 = vmatpush3.msra.mxu1 %v1307_v55  ;;  %v1663_v55 = vld [vmem:[#allocation13 + $0x178] sm:$0xff] }
 0x330   : > { %7359 = vmatprep.subr.mxu1 %v1306_v56 }
 0x331   : > { %7360 = vmatpush3.msra.mxu1 %v1306_v56  ;;  %v1941_v56 = vld [vmem:[#allocation8 + $0x270] sm:$0xff] }
 0x332   : > { %7361 = vmatprep.subr.mxu1 %v1305_v57 }
 0x333   : > { %7362 = vmatpush3.msra.mxu1 %v1305_v57  ;;  %v1662_v57 = vld [vmem:[#allocation13 + $0x170] sm:$0xff] }
 0x334   : > { %7363 = vmatprep.subr.mxu1 %v1304_v58 }
 0x335   : > { %7364 = vmatpush3.msra.mxu1 %v1304_v58  ;;  %v1940_v58 = vld [vmem:[#allocation8 + $0x268] sm:$0xff] }
 0x336   : > { %7365 = vmatprep.subr.mxu1 %v1303_v59 }
 0x337   : > { %7366 = vmatpush3.msra.mxu1 %v1303_v59  ;;  %v1661_v59 = vld [vmem:[#allocation13 + $0x168] sm:$0xff] }
 0x338   : > { %7367 = vmatprep.subr.mxu1 %v1302_v60 }
 0x339   : > { %7368 = vmatpush3.msra.mxu1 %v1302_v60  ;;  %v1939_v60 = vld [vmem:[#allocation8 + $0x260] sm:$0xff] }
 0x33a   : > { %7369 = vmatprep.subr.mxu1 %v1301_v61 }
 0x33b   : > { %7370 = vmatpush3.msra.mxu1 %v1301_v61  ;;  %v1660_v61 = vld [vmem:[#allocation13 + $0x160] sm:$0xff] }
 0x33c   : > { %7371 = vmatprep.subr.mxu1 %v1300_v62 }
 0x33d   : > { %7372 = vmatpush3.msra.mxu1 %v1300_v62  ;;  %v1938_v62 = vld [vmem:[#allocation8 + $0x258] sm:$0xff] }
 0x33e   : > { %7373 = vmatprep.subr.mxu1 %v1299_v63 }
 0x33f   : > { %7374 = vmatpush3.msra.mxu1 %v1299_v63  ;;  %v1659_v63 = vld [vmem:[#allocation13 + $0x158] sm:$0xff] }
 0x340   : > { %7375 = vmatprep.subr.mxu1 %v1298_v0 }
 0x341   : > { %7376 = vmatpush3.msra.mxu1 %v1298_v0  ;;  %v1937_v0 = vld [vmem:[#allocation8 + $0x250] sm:$0xff] }
 0x342   : > { %7377 = vmatprep.subr.mxu1 %v1297_v1 }
 0x343   : > { %7378 = vmatpush3.msra.mxu1 %v1297_v1  ;;  %v1658_v1 = vld [vmem:[#allocation13 + $0x150] sm:$0xff] }
 0x344   : > { %7379 = vmatprep.subr.mxu1 %v1296_v2 }
 0x345   : > { %7380 = vmatpush3.msra.mxu1 %v1296_v2  ;;  %v1936_v2 = vld [vmem:[#allocation8 + $0x248] sm:$0xff] }
 0x346   : > { %7426 = vmatprep.subr.mxu1 %v9210_v4 }
 0x3e6   : > { %v7299_v9 = vpop.f32.mrf.mxu1 }
 0x3e7   : > { %v1179_v12 = vadd.f32 %v7299_v9, %v999_v7  ;;  %v1935_v7 = vld [vmem:[#allocation8 + $0x240] sm:$0xff]  ;;  %v1934_v9 = vld [vmem:[#allocation8 + $0x238] sm:$0xff] }
 0x3e8   : > { %v1169_v14 = vpop.f32.mrf.mxu1 }
 0x3e9   : > { %v1188_v15 = vmul.f32 %v6372_v10, %v1179_v12  ;;  %v1178_v16 = vadd.f32 %v1169_v14, %v994_v11  ;;  %v1933_v11 = vld [vmem:[#allocation8 + $0x230] sm:$0xff]  ;;  %v1653_v14 = vld [vmem:[#allocation13 + $0x128] sm:$0xff] }
 0x3ea   : > { %v1654_v12 = vld [vmem:[#allocation13 + $0x130] sm:$0xff] }
 0x3eb   : > { %v1198_v18 = vadd.f32 %v6373_v13, %v1188_v15  ;;  %v1187_v19 = vmul.f32 %v6372_v10, %v1178_v16  ;;  %v1655_v10 = vld [vmem:[#allocation13 + $0x138] sm:$0xff]  ;;  %v1931_v15 = vld [vmem:[#allocation8 + $0x220] sm:$0xff] }
 0x3ec   : > { %v1930_v16 = vld [vmem:[#allocation8 + $0x218] sm:$0xff] }
 0x3ed   : > { %vm1200_vm3 = vcmp.ge.f32.partialorder %v1198_v18, 0.0  ;;  %v1210_v20 = vmul.f32 %v6374_v17, %v1198_v18  ;;  %v1197_v21 = vadd.f32 %v6373_v13, %v1187_v19  ;;  %v1932_v13 = vld [vmem:[#allocation8 + $0x228] sm:$0xff]  ;;  %v1927_v19 = vld [vmem:[#allocation8 + $0x200] sm:$0xff] }
 0x3ef   : > { %vm1199_vm4 = vcmp.ge.f32.partialorder %v1197_v21, 0.0  ;;  %v1209_v22 = vmul.f32 %v6374_v17, %v1197_v21  ;;  %v9236_v23 = vsel %vm1200_vm3, %v1198_v18, %v1210_v20  ;;  %v1929_v17 = vld [vmem:[#allocation8 + $0x210] sm:$0xff]  ;;  %v1928_v18 = vld [vmem:[#allocation8 + $0x208] sm:$0xff]  ;;  %v1652_v20 = vld [vmem:[#allocation13 + $0x120] sm:$0xff] }
 0x3f0   : > { %7300 = vmatprep.subr.mxu0 %v9236_v23 }
 0x3f1   : > { %7301 = vmatpush3.msra.mxu0 %v9236_v23  ;;  %v9240_v24 = vsel %vm1199_vm4, %v1197_v21, %v1209_v22  ;;  %v1651_v21 = vld [vmem:[#allocation13 + $0x118] sm:$0xff]  ;;  %v1650_v22 = vld [vmem:[#allocation13 + $0x110] sm:$0xff] }
 0x3f2   : > { %7302 = vmatprep.subr.mxu0 %v9240_v24 }
 0x3f3   : > { %7303 = vmatpush3.msra.mxu0 %v9240_v24 }
 0x3f4   : > { %7305 = vmatmul.mubr.msk.f32.vlgmr.msra.gmra.mxu0 %vm653_vm0, %v9242_v25  ;;  %7307 = vmatprep.subr.mxu0 %v9236_v23 }
 0x3f5   : > { %7308 = vmatpush3.msra.mxu0 %v9236_v23  ;;  %7311 = vmatprep.mubr.msk.f32.mxu0 %vm653_vm0, %v9245_v26 }
 0x3f6   : > { %7309 = vmatprep.subr.mxu0 %v9240_v24 }
 0x3f7   : > { %7310 = vmatpush3.msra.mxu0 %v9240_v24 }
 0x3f8   : > { %7312 = vmatmul.mubr.msk.f32.vlgmr.msra.gmra.mxu0 %vm653_vm0, %v9254_v27  ;;  %7314 = vmatprep.subr.mxu0 %v1412_v28 }
 0x3f9   : > { %7315 = vmatpush3.msra.mxu0 %v1412_v28  ;;  %v1841_v28 = vld [vmem:[#allocation8 + $0x1f8] sm:$0xff] }
 0x3fa   : > { %7316 = vmatprep.subr.mxu0 %v1411_v29 }
 0x3fb   : > { %7317 = vmatpush3.msra.mxu0 %v1411_v29 }
 0x3fc   : > { %7318 = vmatprep.subr.mxu0 %v1410_v30 }
 0x3fd   : > { %7319 = vmatpush3.msra.mxu0 %v1410_v30 }
 0x3fe   : > { %7320 = vmatprep.subr.mxu0 %v1409_v31 }
 0x3ff   : > { %7321 = vmatpush3.msra.mxu0 %v1409_v31 }
 0x400   : > { %7322 = vmatprep.subr.mxu0 %v1408_v32 }
 0x401   : > { %7323 = vmatpush3.msra.mxu0 %v1408_v32 }
 0x402   : > { %7324 = vmatprep.subr.mxu0 %v1407_v33 }
 0x403   : > { %7325 = vmatpush3.msra.mxu0 %v1407_v33 }
 0x404   : > { %7326 = vmatprep.subr.mxu0 %v1406_v34 }
 0x405   : > { %7327 = vmatpush3.msra.mxu0 %v1406_v34 }
 0x406   : > { %7328 = vmatprep.subr.mxu0 %v1405_v35 }
 0x407   : > { %7329 = vmatpush3.msra.mxu0 %v1405_v35 }
 0x408   : > { %7330 = vmatprep.subr.mxu0 %v1404_v36 }
 0x409   : > { %7331 = vmatpush3.msra.mxu0 %v1404_v36 }
 0x40a   : > { %7332 = vmatprep.subr.mxu0 %v1403_v37 }
 0x40b   : > { %7333 = vmatpush3.msra.mxu0 %v1403_v37 }
 0x40c   : > { %7334 = vmatprep.subr.mxu0 %v1402_v38 }
 0x40d   : > { %7335 = vmatpush3.msra.mxu0 %v1402_v38 }
 0x40e   : > { %7336 = vmatprep.subr.mxu0 %v1401_v39 }
 0x40f   : > { %7337 = vmatpush3.msra.mxu0 %v1401_v39 }
 0x410   : > { %7338 = vmatprep.subr.mxu0 %v1400_v40 }
 0x411   : > { %7339 = vmatpush3.msra.mxu0 %v1400_v40 }
 0x412   : > { %7340 = vmatprep.subr.mxu0 %v1399_v41 }
 0x413   : > { %7341 = vmatpush3.msra.mxu0 %v1399_v41  ;;  %v1840_v41 = vld [vmem:[#allocation8 + $0x1f0] sm:$0xff] }
 0x414   : > { %7342 = vmatprep.subr.mxu0 %v1398_v42 }
 0x415   : > { %7343 = vmatpush3.msra.mxu0 %v1398_v42  ;;  %v1839_v42 = vld [vmem:[#allocation8 + $0x1e8] sm:$0xff] }
 0x416   : > { %7344 = vmatprep.subr.mxu0 %v1397_v43 }
 0x417   : > { %7345 = vmatpush3.msra.mxu0 %v1397_v43  ;;  %v2094_v43 = vld [vmem:[#allocation7 + $0x50] sm:$0xff] }
 0x418   : > { %7384 = vmatprep.subr.mxu0 %v9236_v23 }
 0x4b4   : > { %v7306_v44 = vpop.f32.mrf.mxu0 }
 0x4b6   : > { %v1287_v45 = vpop.f32.mrf.mxu0 }
 0x4b7   : > { %7381 = vmatprep.mubr.f32.mxu1 %v1287_v45  ;;  %v1838_v45 = vld [vmem:[#allocation8 + $0x1e0] sm:$0xff] }
 0x4b8   : > { %v7313_v47 = vpop.f32.mrf.mxu0  ;;  %7382 = vmatmul.mubr.f32.vlgmr.msra.gmra.mxu1 %v7306_v44  ;;  %v2095_v44 = vld [vmem:[#allocation7 + $0x58] sm:$0xff] }
 0x4b9   : > { %7427 = vmatpush3.msra.mxu1 %v9210_v4  ;;  %7430 = vmatprep.mubr.msk.f32.mxu1 %vm653_vm0, %v1742_v46  ;;  %v2193_v46 = vld [vmem:[#allocation8 + $0x2f8] sm:$0xff] }
 0x4ba   : > { %7428 = vmatprep.subr.mxu1 %v9214_v5  ;;  %v1387_v48 = vpop.f32.mrf.mxu0 }
 0x4bb   : > { %7429 = vmatpush3.msra.mxu1 %v9214_v5  ;;  %7346 = vmatprep.mubr.f32.mxu0 %v1387_v48  ;;  %v2192_v48 = vld [vmem:[#allocation8 + $0x2f0] sm:$0xff] }
 0x4bc   : > { %7433 = vmatprep.subr.mxu1 %v9210_v4  ;;  %7347 = vmatmul.mubr.f32.vlgmr.msra.gmra.mxu0 %v7313_v47  ;;  %v1837_v47 = vld [vmem:[#allocation8 + $0x1d8] sm:$0xff] }
 0x4bd   : > { %7385 = vmatpush3.msra.mxu0 %v9236_v23  ;;  %7431 = vmatmul.mubr.msk.f32.vlgmr.msra.gmra.mxu1 %vm653_vm0, %v1743_v49  ;;  %v1649_v23 = vld [vmem:[#allocation13 + $0x108] sm:$0xff]  ;;  %v1836_v49 = vld [vmem:[#allocation8 + $0x1d0] sm:$0xff] }
 0x4be   : > { %7434 = vmatpush3.msra.mxu1 %v9210_v4  ;;  %7386 = vmatprep.subr.mxu0 %v9240_v24 }
 0x4bf   : > { %7435 = vmatprep.subr.mxu1 %v9214_v5  ;;  %7387 = vmatpush3.msra.mxu0 %v9240_v24  ;;  %v1648_v24 = vld [vmem:[#allocation13 + $0x100] sm:$0xff] }
 0x4c0   : > { %7436 = vmatpush3.msra.mxu1 %v9214_v5  ;;  %7388 = vmatprep.mubr.msk.f32.mxu0 %vm653_vm0, %v9268_v50 }
 0x4c1   : > { %7437 = vmatprep.mubr.msk.f32.mxu1 %vm653_vm0, %v1843_v51  ;;  %7440 = vmatprep.subr.mxu1 %v1942_v52  ;;  %v2191_v51 = vld [vmem:[#allocation8 + $0x2e8] sm:$0xff] }
 0x4c2   : > { %7389 = vmatmul.mubr.msk.f32.vlgmr.msra.gmra.mxu0 %vm653_vm0, %v9274_v53  ;;  %7438 = vmatmul.mubr.msk.f32.vlgmr.msra.gmra.mxu1 %vm653_vm0, %v1844_v54  ;;  %v2190_v54 = vld [vmem:[#allocation8 + $0x2e0] sm:$0xff] }
 0x4c3   : > { %7441 = vmatpush3.msra.mxu1 %v1942_v52  ;;  %7391 = vmatprep.subr.mxu0 %v1663_v55  ;;  %v1835_v52 = vld [vmem:[#allocation8 + $0x1c8] sm:$0xff] }
 0x4c4   : > { %7442 = vmatprep.subr.mxu1 %v1941_v56  ;;  %7392 = vmatpush3.msra.mxu0 %v1663_v55  ;;  %v1834_v55 = vld [vmem:[#allocation8 + $0x1c0] sm:$0xff] }
 0x4c5   : > { %7443 = vmatpush3.msra.mxu1 %v1941_v56  ;;  %7393 = vmatprep.subr.mxu0 %v1662_v57  ;;  %v2189_v56 = vld [vmem:[#allocation8 + $0x2d8] sm:$0xff] }
 0x4c6   : > { %7444 = vmatprep.subr.mxu1 %v1940_v58  ;;  %7394 = vmatpush3.msra.mxu0 %v1662_v57  ;;  %v1833_v57 = vld [vmem:[#allocation8 + $0x1b8] sm:$0xff] }
 0x4c7   : > { %7445 = vmatpush3.msra.mxu1 %v1940_v58  ;;  %7395 = vmatprep.subr.mxu0 %v1661_v59  ;;  %v2188_v58 = vld [vmem:[#allocation8 + $0x2d0] sm:$0xff] }
 0x4c8   : > { %7446 = vmatprep.subr.mxu1 %v1939_v60  ;;  %7396 = vmatpush3.msra.mxu0 %v1661_v59  ;;  %v1832_v59 = vld [vmem:[#allocation8 + $0x1b0] sm:$0xff] }
 0x4c9   : > { %7447 = vmatpush3.msra.mxu1 %v1939_v60  ;;  %7397 = vmatprep.subr.mxu0 %v1660_v61  ;;  %v2187_v60 = vld [vmem:[#allocation8 + $0x2c8] sm:$0xff] }
 0x4ca   : > { %7448 = vmatprep.subr.mxu1 %v1938_v62  ;;  %7398 = vmatpush3.msra.mxu0 %v1660_v61  ;;  %v1831_v61 = vld [vmem:[#allocation8 + $0x1a8] sm:$0xff] }
 0x4cb   : > { %7449 = vmatpush3.msra.mxu1 %v1938_v62  ;;  %7399 = vmatprep.subr.mxu0 %v1659_v63  ;;  %v2186_v62 = vld [vmem:[#allocation8 + $0x2c0] sm:$0xff] }
 0x4cc   : > { %7450 = vmatprep.subr.mxu1 %v1937_v0  ;;  %7400 = vmatpush3.msra.mxu0 %v1659_v63  ;;  %v1830_v63 = vld [vmem:[#allocation8 + $0x1a0] sm:$0xff] }
 0x4cd   : > { %7451 = vmatpush3.msra.mxu1 %v1937_v0  ;;  %7401 = vmatprep.subr.mxu0 %v1658_v1  ;;  %v2185_v0 = vld [vmem:[#allocation8 + $0x2b8] sm:$0xff] }
 0x4ce   : > { %7452 = vmatprep.subr.mxu1 %v1936_v2  ;;  %7402 = vmatpush3.msra.mxu0 %v1658_v1  ;;  %v1829_v1 = vld [vmem:[#allocation8 + $0x198] sm:$0xff] }
 0x4cf   : > { %7453 = vmatpush3.msra.mxu1 %v1936_v2  ;;  %7403 = vmatprep.subr.mxu0 %v1657_v6  ;;  %v2184_v2 = vld [vmem:[#allocation8 + $0x2b0] sm:$0xff] }
 0x4d0   : > { %7454 = vmatprep.subr.mxu1 %v1935_v7  ;;  %7404 = vmatpush3.msra.mxu0 %v1657_v6  ;;  %v1828_v6 = vld [vmem:[#allocation8 + $0x190] sm:$0xff] }
 0x4d1   : > { %7455 = vmatpush3.msra.mxu1 %v1935_v7  ;;  %7405 = vmatprep.subr.mxu0 %v1656_v8  ;;  %v2183_v7 = vld [vmem:[#allocation8 + $0x2a8] sm:$0xff] }
 0x4d2   : > { %7456 = vmatprep.subr.mxu1 %v1934_v9  ;;  %7406 = vmatpush3.msra.mxu0 %v1656_v8  ;;  %v1827_v8 = vld [vmem:[#allocation8 + $0x188] sm:$0xff] }
 0x4d3   : > { %7457 = vmatpush3.msra.mxu1 %v1934_v9  ;;  %7407 = vmatprep.subr.mxu0 %v1655_v10  ;;  %v2182_v9 = vld [vmem:[#allocation8 + $0x2a0] sm:$0xff] }
 0x4d4   : > { %7458 = vmatprep.subr.mxu1 %v1933_v11  ;;  %7408 = vmatpush3.msra.mxu0 %v1655_v10  ;;  %v1826_v10 = vld [vmem:[#allocation8 + $0x180] sm:$0xff] }
 0x4d5   : > { %7459 = vmatpush3.msra.mxu1 %v1933_v11  ;;  %7409 = vmatprep.subr.mxu0 %v1654_v12  ;;  %v2181_v11 = vld [vmem:[#allocation8 + $0x298] sm:$0xff] }
 0x4d6   : > { %7460 = vmatprep.subr.mxu1 %v1932_v13  ;;  %7410 = vmatpush3.msra.mxu0 %v1654_v12  ;;  %v2180_v12 = vld [vmem:[#allocation8 + $0x290] sm:$0xff] }
 0x4d7   : > { %7461 = vmatpush3.msra.mxu1 %v1932_v13  ;;  %7411 = vmatprep.subr.mxu0 %v1653_v14  ;;  %v2179_v13 = vld [vmem:[#allocation8 + $0x288] sm:$0xff] }
 0x4d8   : > { %7462 = vmatprep.subr.mxu1 %v1931_v15  ;;  %7412 = vmatpush3.msra.mxu0 %v1653_v14  ;;  %v2178_v14 = vld [vmem:[#allocation8 + $0x280] sm:$0xff] }
 0x4d9   : > { %7463 = vmatpush3.msra.mxu1 %v1931_v15  ;;  %7413 = vmatprep.subr.mxu0 %v1652_v20 }
 0x4da   : > { %7464 = vmatprep.subr.mxu1 %v1930_v16  ;;  %7414 = vmatpush3.msra.mxu0 %v1652_v20 }
 0x4db   : > { %7465 = vmatpush3.msra.mxu1 %v1930_v16  ;;  %7415 = vmatprep.subr.mxu0 %v1651_v21 }
 0x4dc   : > { %7466 = vmatprep.subr.mxu1 %v1929_v17  ;;  %7416 = vmatpush3.msra.mxu0 %v1651_v21 }
 0x4dd   : > { %7467 = vmatpush3.msra.mxu1 %v1929_v17  ;;  %7417 = vmatprep.subr.mxu0 %v1650_v22 }
 0x4de   : > { %7468 = vmatprep.subr.mxu1 %v1928_v18  ;;  %7418 = vmatpush3.msra.mxu0 %v1650_v22 }
 0x4df   : > { %7469 = vmatpush3.msra.mxu1 %v1928_v18  ;;  %7419 = vmatprep.subr.mxu0 %v1649_v23 }
 0x4e0   : > { %7470 = vmatprep.subr.mxu1 %v1927_v19  ;;  %7420 = vmatpush3.msra.mxu0 %v1649_v23 }
 0x4e1   : > { %7471 = vmatpush3.msra.mxu1 %v1927_v19  ;;  %7421 = vmatprep.subr.mxu0 %v1648_v24 }
 0x4e2   : > { %7510 = vmatprep.subr.mxu1 %v9210_v4  ;;  %7422 = vmatpush3.msra.mxu0 %v1648_v24 }
 0x4e3   : > { %7475 = vmatprep.subr.mxu0 %v1841_v28 }
 0x578   : > { %v7383_v29 = vpop.f32.mrf.mxu1 }
 0x57a   : > { %v1554_v30 = vpop.f32.mrf.mxu1 }
 0x57c   : > { %v7348_v31 = vpop.f32.mrf.mxu0 }
 0x57d   : > { %v9284_v32 = vadd.f32 %v7383_v29, %v7348_v31  ;;  %v9286_v33 = vpop.f32.mrf.mxu1  ;;  %v6387_v29 = vld [vmem:[#allocation10 + $0x3] ss:$0 sm:$0xff] }
 0x57e   : > { %v1479_v34 = vpop.f32.mrf.mxu0 }
 0x57f   : > { %v9288_v35 = vadd.f32 %v1554_v30, %v1479_v34  ;;  %v1816_v36 = vpop.f32.mrf.mxu1 }
 0x582   : > { %v7390_v37 = vpop.f32.mrf.mxu0  ;;  %v7439_v38 = vpop.f32.mrf.mxu1 }
 0x584   : > { %v1638_v39 = vpop.f32.mrf.mxu0  ;;  %v1917_v40 = vpop.f32.mrf.mxu1 }
 0x585   : > { %7423 = vmatprep.mubr.f32.mxu0 %v1638_v39  ;;  %7472 = vmatprep.mubr.f32.mxu1 %v1917_v40 }
 0x586   : > { %7424 = vmatmul.mubr.f32.vlgmr.msra.gmra.mxu0 %v7390_v37  ;;  %7473 = vmatmul.mubr.f32.vlgmr.msra.gmra.mxu1 %v7439_v38 }
 0x587   : > { %7476 = vmatpush3.msra.mxu0 %v1841_v28  ;;  %7511 = vmatpush3.msra.mxu1 %v9210_v4 }
 0x588   : > { %7477 = vmatprep.subr.mxu0 %v1840_v41  ;;  %7507 = vmatprep.mubr.f32.mxu0 %v1816_v36 }
 0x589   : > { %7512 = vmatprep.subr.mxu1 %v9214_v5  ;;  %7478 = vmatpush3.msra.mxu0 %v1840_v41 }
 0x58a   : > { %7513 = vmatpush3.msra.mxu1 %v9214_v5  ;;  %7479 = vmatprep.subr.mxu0 %v1839_v42 }
 0x58b   : > { %7514 = vmatprep.mubr.msk.f32.mxu1 %vm653_vm0, %v2094_v43  ;;  %7480 = vmatpush3.msra.mxu0 %v1839_v42  ;;  %v2396_v43 = vld [vmem:[#allocation13 + $0x1f8] sm:$0xff] }
 0x58c   : > { %7515 = vmatmul.mubr.msk.f32.vlgmr.msra.gmra.mxu1 %vm653_vm0, %v2095_v44  ;;  %7481 = vmatprep.subr.mxu0 %v1838_v45  ;;  %v2565_v44 = vld [vmem:[#allocation13 + $0x278] sm:$0xff] }
 0x58d   : > { %7482 = vmatpush3.msra.mxu0 %v1838_v45  ;;  %7517 = vmatprep.subr.mxu1 %v2193_v46  ;;  %v2395_v45 = vld [vmem:[#allocation13 + $0x1f0] sm:$0xff] }
 0x58e   : > { %7483 = vmatprep.subr.mxu0 %v1837_v47  ;;  %7518 = vmatpush3.msra.mxu1 %v2193_v46  ;;  %v2564_v46 = vld [vmem:[#allocation13 + $0x270] sm:$0xff] }
 0x58f   : > { %7484 = vmatpush3.msra.mxu0 %v1837_v47  ;;  %7519 = vmatprep.subr.mxu1 %v2192_v48  ;;  %v2394_v47 = vld [vmem:[#allocation13 + $0x1e8] sm:$0xff] }
 0x590   : > { %7485 = vmatprep.subr.mxu0 %v1836_v49  ;;  %7520 = vmatpush3.msra.mxu1 %v2192_v48  ;;  %v2563_v48 = vld [vmem:[#allocation13 + $0x268] sm:$0xff] }
 0x591   : > { %7486 = vmatpush3.msra.mxu0 %v1836_v49  ;;  %7521 = vmatprep.subr.mxu1 %v2191_v51  ;;  %v2393_v49 = vld [vmem:[#allocation13 + $0x1e0] sm:$0xff] }
 0x592   : > { %7487 = vmatprep.subr.mxu0 %v1835_v52  ;;  %7522 = vmatpush3.msra.mxu1 %v2191_v51  ;;  %v2562_v51 = vld [vmem:[#allocation13 + $0x260] sm:$0xff] }
 0x593   : > { %7488 = vmatpush3.msra.mxu0 %v1835_v52  ;;  %7523 = vmatprep.subr.mxu1 %v2190_v54  ;;  %v2561_v52 = vld [vmem:[#allocation13 + $0x258] sm:$0xff] }
 0x594   : > { %7489 = vmatprep.subr.mxu0 %v1834_v55  ;;  %7524 = vmatpush3.msra.mxu1 %v2190_v54  ;;  %v2560_v54 = vld [vmem:[#allocation13 + $0x250] sm:$0xff] }
 0x595   : > { %7490 = vmatpush3.msra.mxu0 %v1834_v55  ;;  %7525 = vmatprep.subr.mxu1 %v2189_v56  ;;  %v2390_v55 = vld [vmem:[#allocation13 + $0x1c8] sm:$0xff] }
 0x596   : > { %7491 = vmatprep.subr.mxu0 %v1833_v57  ;;  %7526 = vmatpush3.msra.mxu1 %v2189_v56  ;;  %v2559_v56 = vld [vmem:[#allocation13 + $0x248] sm:$0xff] }
 0x597   : > { %7492 = vmatpush3.msra.mxu0 %v1833_v57  ;;  %7527 = vmatprep.subr.mxu1 %v2188_v58  ;;  %v2389_v57 = vld [vmem:[#allocation13 + $0x1c0] sm:$0xff] }
 0x598   : > { %7493 = vmatprep.subr.mxu0 %v1832_v59  ;;  %7528 = vmatpush3.msra.mxu1 %v2188_v58  ;;  %v2558_v58 = vld [vmem:[#allocation13 + $0x240] sm:$0xff] }
 0x599   : > { %7494 = vmatpush3.msra.mxu0 %v1832_v59  ;;  %7529 = vmatprep.subr.mxu1 %v2187_v60  ;;  %v2388_v59 = vld [vmem:[#allocation13 + $0x1b8] sm:$0xff] }
 0x59a   : > { %7495 = vmatprep.subr.mxu0 %v1831_v61  ;;  %7530 = vmatpush3.msra.mxu1 %v2187_v60  ;;  %v2557_v60 = vld [vmem:[#allocation13 + $0x238] sm:$0xff] }
 0x59b   : > { %7496 = vmatpush3.msra.mxu0 %v1831_v61  ;;  %7531 = vmatprep.subr.mxu1 %v2186_v62  ;;  %v2387_v61 = vld [vmem:[#allocation13 + $0x1b0] sm:$0xff] }
 0x59c   : > { %7497 = vmatprep.subr.mxu0 %v1830_v63  ;;  %7532 = vmatpush3.msra.mxu1 %v2186_v62  ;;  %v2556_v62 = vld [vmem:[#allocation13 + $0x230] sm:$0xff] }
 0x59d   : > { %7498 = vmatpush3.msra.mxu0 %v1830_v63  ;;  %7533 = vmatprep.subr.mxu1 %v2185_v0  ;;  %v2386_v63 = vld [vmem:[#allocation13 + $0x1a8] sm:$0xff] }
 0x59e   : > { %7499 = vmatprep.subr.mxu0 %v1829_v1  ;;  %7534 = vmatpush3.msra.mxu1 %v2185_v0  ;;  %v2555_v0 = vld [vmem:[#allocation13 + $0x228] sm:$0xff] }
 0x59f   : > { %7500 = vmatpush3.msra.mxu0 %v1829_v1  ;;  %7535 = vmatprep.subr.mxu1 %v2184_v2  ;;  %v2385_v1 = vld [vmem:[#allocation13 + $0x1a0] sm:$0xff] }
 0x5a0   : > { %7501 = vmatprep.subr.mxu0 %v1828_v6  ;;  %7536 = vmatpush3.msra.mxu1 %v2184_v2  ;;  %v2554_v2 = vld [vmem:[#allocation13 + $0x220] sm:$0xff] }
 0x5a1   : > { %7502 = vmatpush3.msra.mxu0 %v1828_v6  ;;  %7537 = vmatprep.subr.mxu1 %v2183_v7  ;;  %v2384_v6 = vld [vmem:[#allocation13 + $0x198] sm:$0xff] }
 0x5a2   : > { %7503 = vmatprep.subr.mxu0 %v1827_v8  ;;  %7538 = vmatpush3.msra.mxu1 %v2183_v7  ;;  %v2553_v7 = vld [vmem:[#allocation13 + $0x218] sm:$0xff] }
 0x5a3   : > { %7504 = vmatpush3.msra.mxu0 %v1827_v8  ;;  %7539 = vmatprep.subr.mxu1 %v2182_v9  ;;  %v2383_v8 = vld [vmem:[#allocation13 + $0x190] sm:$0xff] }
 0x5a4   : > { %7505 = vmatprep.subr.mxu0 %v1826_v10  ;;  %7540 = vmatpush3.msra.mxu1 %v2182_v9  ;;  %v2552_v9 = vld [vmem:[#allocation13 + $0x210] sm:$0xff] }
 0x5a5   : > { %7506 = vmatpush3.msra.mxu0 %v1826_v10  ;;  %7541 = vmatprep.subr.mxu1 %v2181_v11  ;;  %v2382_v10 = vld [vmem:[#allocation13 + $0x188] sm:$0xff] }
 0x5a6   : > { %7508 = vmatmul.mubr.f32.vlgmr.msra.gmra.mxu0 %v9286_v33  ;;  %7542 = vmatpush3.msra.mxu1 %v2181_v11  ;;  %v2551_v11 = vld [vmem:[#allocation13 + $0x208] sm:$0xff] }
 0x5a7   : > { %7556 = vmatprep.mubr.msk.f32.mxu0 %vm653_vm0, %v9232_v3  ;;  %7543 = vmatprep.subr.mxu1 %v2180_v12 }
 0x5a8   : > { %7544 = vmatpush3.msra.mxu1 %v2180_v12  ;;  %v2381_v12 = vld [vmem:[#allocation13 + $0x180] sm:$0xff] }
 0x5a9   : > { %7545 = vmatprep.subr.mxu1 %v2179_v13 }
 0x5aa   : > { %7546 = vmatpush3.msra.mxu1 %v2179_v13  ;;  %v2550_v13 = vld [vmem:[#allocation13 + $0x200] sm:$0xff] }
 0x5ab   : > { %7547 = vmatprep.subr.mxu1 %v2178_v14 }
 0x5ac   : > { %7548 = vmatpush3.msra.mxu1 %v2178_v14 }
 0x646   : > { %v7425_v15 = vpop.f32.mrf.mxu0  ;;  %v7474_v16 = vpop.f32.mrf.mxu1 }
 0x647   : > { %v9299_v17 = vadd.f32 %v7425_v15, %v9284_v32  ;;  %v6388_v32 = vld [vmem:[#allocation10 + $0x4] ss:$0 sm:$0xff] }
 0x648   : > { %v1730_v18 = vpop.f32.mrf.mxu0  ;;  %v2009_v19 = vpop.f32.mrf.mxu1 }
 0x649   : > { %v9302_v3 = vadd.f32 %v1730_v18, %v9288_v35  ;;  %v6389_v35 = vld [vmem:[#allocation10 + $0x5] ss:$0 sm:$0xff] }
 0x64c   : > { %v7516_v20 = vpop.f32.mrf.mxu1 }
 0x64e   : > { %v2168_v21 = vpop.f32.mrf.mxu1 }
 0x64f   : > { %7549 = vmatprep.mubr.f32.mxu1 %v2168_v21  ;;  %v2914_v21 = vld [vmem:[#allocation7 + $0x70] sm:$0xff] }
 0x650   : > { %7550 = vmatmul.mubr.f32.vlgmr.msra.gmra.mxu1 %v7516_v20  ;;  %v2814_v20 = vld [vmem:[#allocation7 + $0x68] sm:$0xff] }
 0x651   : > { %7598 = vmatprep.mubr.msk.f32.mxu1 %vm653_vm0, %v9245_v26 }
 0x666   : > { %v7509_v22 = vpop.f32.mrf.mxu0 }
 0x667   : > { %v2090_v24 = vadd.f32 %v7509_v22, %v7474_v16  ;;  %v2734_v22 = vld [vmem:[#allocation13 + $0x2f8] sm:$0xff] }
 0x668   : > { %v2084_v23 = vpop.f32.mrf.mxu0 }
 0x669   : > { %v2085_v30 = vadd.f32 %v2084_v23, %v2009_v19  ;;  %v2813_v19 = vld [vmem:[#allocation7 + $0x60] sm:$0xff]  ;;  %v3013_v23 = vld [vmem:[#allocation8 + $0x3f8] sm:$0xff] }
 0x710   : > { %v7551_v28 = vpop.f32.mrf.mxu1 }
 0x711   : > { %v2270_v31 = vadd.f32 %v7551_v28, %v2090_v24  ;;  %v2915_v24 = vld [vmem:[#allocation7 + $0x78] sm:$0xff]  ;;  %v3012_v28 = vld [vmem:[#allocation8 + $0x3f0] sm:$0xff] }
 0x712   : > { %v2260_v33 = vpop.f32.mrf.mxu1 }
 0x713   : > { %v2280_v34 = vmul.f32 %v6387_v29, %v2270_v31  ;;  %v2269_v36 = vadd.f32 %v2260_v33, %v2085_v30  ;;  %v2731_v30 = vld [vmem:[#allocation13 + $0x2e0] sm:$0xff]  ;;  %v3009_v33 = vld [vmem:[#allocation8 + $0x3d8] sm:$0xff] }
 0x714   : > { %v3010_v31 = vld [vmem:[#allocation8 + $0x3e0] sm:$0xff] }
 0x715   : > { %v2290_v37 = vadd.f32 %v6388_v32, %v2280_v34  ;;  %v2279_v38 = vmul.f32 %v6387_v29, %v2269_v36  ;;  %v3011_v29 = vld [vmem:[#allocation8 + $0x3e8] sm:$0xff]  ;;  %v2729_v34 = vld [vmem:[#allocation13 + $0x2d0] sm:$0xff] }
 0x716   : > { %v3008_v36 = vld [vmem:[#allocation8 + $0x3d0] sm:$0xff] }
 0x717   : > { %vm2292_vm5 = vcmp.ge.f32.partialorder %v2290_v37, 0.0  ;;  %v2302_v39 = vmul.f32 %v6389_v35, %v2290_v37  ;;  %v2289_v40 = vadd.f32 %v6388_v32, %v2279_v38  ;;  %v2730_v32 = vld [vmem:[#allocation13 + $0x2d8] sm:$0xff]  ;;  %v2727_v38 = vld [vmem:[#allocation13 + $0x2c0] sm:$0xff] }
 0x719   : > { %vm2291_vm6 = vcmp.ge.f32.partialorder %v2289_v40, 0.0  ;;  %v2301_v41 = vmul.f32 %v6389_v35, %v2289_v40  ;;  %v9306_v26 = vsel %vm2292_vm5, %v2290_v37, %v2302_v39  ;;  %v2728_v35 = vld [vmem:[#allocation13 + $0x2c8] sm:$0xff]  ;;  %v3006_v39 = vld [vmem:[#allocation8 + $0x3c0] sm:$0xff] }
 0x71a   : > { %7552 = vmatprep.subr.mxu0 %v9306_v26  ;;  %7594 = vmatprep.subr.mxu1 %v9306_v26  ;;  %v3007_v37 = vld [vmem:[#allocation8 + $0x3c8] sm:$0xff] }
 0x71b   : > { %7553 = vmatpush3.msra.mxu0 %v9306_v26  ;;  %7595 = vmatpush3.msra.mxu1 %v9306_v26  ;;  %v9312_v42 = vsel %vm2291_vm6, %v2289_v40, %v2301_v41  ;;  %v2726_v40 = vld [vmem:[#allocation13 + $0x2b8] sm:$0xff] }
 0x71c   : > { %7554 = vmatprep.subr.mxu0 %v9312_v42  ;;  %7596 = vmatprep.subr.mxu1 %v9312_v42  ;;  %v3005_v41 = vld [vmem:[#allocation8 + $0x3b8] sm:$0xff] }
 0x71d   : > { %7555 = vmatpush3.msra.mxu0 %v9312_v42  ;;  %7597 = vmatpush3.msra.mxu1 %v9312_v42 }
 0x71e   : > { %7557 = vmatmul.mubr.msk.f32.vlgmr.msra.gmra.mxu0 %vm653_vm0, %v9242_v25  ;;  %7559 = vmatprep.subr.mxu0 %v2396_v43  ;;  %v2392_v25 = vld [vmem:[#allocation13 + $0x1d8] sm:$0xff] }
 0x71f   : > { %7599 = vmatmul.mubr.msk.f32.vlgmr.msra.gmra.mxu1 %vm653_vm0, %v9254_v27  ;;  %7601 = vmatprep.subr.mxu1 %v2565_v44  ;;  %v2391_v27 = vld [vmem:[#allocation13 + $0x1d0] sm:$0xff] }
 0x720   : > { %7560 = vmatpush3.msra.mxu0 %v2396_v43  ;;  %7602 = vmatpush3.msra.mxu1 %v2565_v44  ;;  %v2724_v43 = vld [vmem:[#allocation13 + $0x2a8] sm:$0xff] }
 0x721   : > { %7561 = vmatprep.subr.mxu0 %v2395_v45  ;;  %7603 = vmatprep.subr.mxu1 %v2564_v46  ;;  %v3003_v44 = vld [vmem:[#allocation8 + $0x3a8] sm:$0xff] }
 0x722   : > { %7562 = vmatpush3.msra.mxu0 %v2395_v45  ;;  %7604 = vmatpush3.msra.mxu1 %v2564_v46  ;;  %v2723_v45 = vld [vmem:[#allocation13 + $0x2a0] sm:$0xff] }
 0x723   : > { %7563 = vmatprep.subr.mxu0 %v2394_v47  ;;  %7605 = vmatprep.subr.mxu1 %v2563_v48  ;;  %v3002_v46 = vld [vmem:[#allocation8 + $0x3a0] sm:$0xff] }
 0x724   : > { %7564 = vmatpush3.msra.mxu0 %v2394_v47  ;;  %7606 = vmatpush3.msra.mxu1 %v2563_v48  ;;  %v2722_v47 = vld [vmem:[#allocation13 + $0x298] sm:$0xff] }
 0x725   : > { %7565 = vmatprep.subr.mxu0 %v2393_v49  ;;  %7607 = vmatprep.subr.mxu1 %v2562_v51  ;;  %v3001_v48 = vld [vmem:[#allocation8 + $0x398] sm:$0xff] }
 0x726   : > { %7566 = vmatpush3.msra.mxu0 %v2393_v49  ;;  %7608 = vmatpush3.msra.mxu1 %v2562_v51  ;;  %v3000_v49 = vld [vmem:[#allocation8 + $0x390] sm:$0xff]  ;;  %v2999_v51 = vld [vmem:[#allocation8 + $0x388] sm:$0xff] }
 0x727   : > { %7567 = vmatprep.subr.mxu0 %v2392_v25  ;;  %7609 = vmatprep.subr.mxu1 %v2561_v52 }
 0x728   : > { %7568 = vmatpush3.msra.mxu0 %v2392_v25  ;;  %7610 = vmatpush3.msra.mxu1 %v2561_v52  ;;  %v2998_v25 = vld [vmem:[#allocation8 + $0x380] sm:$0xff]  ;;  %v2721_v52 = vld [vmem:[#allocation13 + $0x290] sm:$0xff] }
 0x729   : > { %7569 = vmatprep.subr.mxu0 %v2391_v27  ;;  %7611 = vmatprep.subr.mxu1 %v2560_v54 }
 0x72a   : > { %7570 = vmatpush3.msra.mxu0 %v2391_v27  ;;  %7612 = vmatpush3.msra.mxu1 %v2560_v54  ;;  %v2720_v27 = vld [vmem:[#allocation13 + $0x288] sm:$0xff]  ;;  %v2719_v54 = vld [vmem:[#allocation13 + $0x280] sm:$0xff] }
 0x72b   : > { %7571 = vmatprep.subr.mxu0 %v2390_v55  ;;  %7613 = vmatprep.subr.mxu1 %v2559_v56 }
 0x72c   : > { %7572 = vmatpush3.msra.mxu0 %v2390_v55  ;;  %7614 = vmatpush3.msra.mxu1 %v2559_v56  ;;  %v2912_v55 = vld [vmem:[#allocation8 + $0x378] sm:$0xff] }
 0x72d   : > { %7573 = vmatprep.subr.mxu0 %v2389_v57  ;;  %7615 = vmatprep.subr.mxu1 %v2558_v58 }
 0x72e   : > { %7574 = vmatpush3.msra.mxu0 %v2389_v57  ;;  %7616 = vmatpush3.msra.mxu1 %v2558_v58 }
 0x72f   : > { %7575 = vmatprep.subr.mxu0 %v2388_v59  ;;  %7617 = vmatprep.subr.mxu1 %v2557_v60 }
 0x730   : > { %7576 = vmatpush3.msra.mxu0 %v2388_v59  ;;  %7618 = vmatpush3.msra.mxu1 %v2557_v60 }
 0x731   : > { %7577 = vmatprep.subr.mxu0 %v2387_v61  ;;  %7619 = vmatprep.subr.mxu1 %v2556_v62 }
 0x732   : > { %7578 = vmatpush3.msra.mxu0 %v2387_v61  ;;  %7620 = vmatpush3.msra.mxu1 %v2556_v62 }
 0x733   : > { %7579 = vmatprep.subr.mxu0 %v2386_v63  ;;  %7621 = vmatprep.subr.mxu1 %v2555_v0 }
 0x734   : > { %7580 = vmatpush3.msra.mxu0 %v2386_v63  ;;  %7622 = vmatpush3.msra.mxu1 %v2555_v0 }
 0x735   : > { %7581 = vmatprep.subr.mxu0 %v2385_v1  ;;  %7623 = vmatprep.subr.mxu1 %v2554_v2 }
 0x736   : > { %7582 = vmatpush3.msra.mxu0 %v2385_v1  ;;  %7624 = vmatpush3.msra.mxu1 %v2554_v2 }
 0x737   : > { %7583 = vmatprep.subr.mxu0 %v2384_v6  ;;  %7625 = vmatprep.subr.mxu1 %v2553_v7 }
 0x738   : > { %7584 = vmatpush3.msra.mxu0 %v2384_v6  ;;  %7626 = vmatpush3.msra.mxu1 %v2553_v7  ;;  %v2911_v7 = vld [vmem:[#allocation8 + $0x370] sm:$0xff] }
 0x739   : > { %7585 = vmatprep.subr.mxu0 %v2383_v8  ;;  %7627 = vmatprep.subr.mxu1 %v2552_v9 }
 0x73a   : > { %7586 = vmatpush3.msra.mxu0 %v2383_v8  ;;  %7628 = vmatpush3.msra.mxu1 %v2552_v9 }
 0x73b   : > { %7587 = vmatprep.subr.mxu0 %v2382_v10  ;;  %7629 = vmatprep.subr.mxu1 %v2551_v11 }
 0x73c   : > { %7588 = vmatpush3.msra.mxu0 %v2382_v10  ;;  %7630 = vmatpush3.msra.mxu1 %v2551_v11  ;;  %v2908_v10 = vld [vmem:[#allocation8 + $0x358] sm:$0xff]  ;;  %v3165_v11 = vld [vmem:[#allocation7 + $0x80] sm:$0xff] }
 0x73d   : > { %7589 = vmatprep.subr.mxu0 %v2381_v12  ;;  %7631 = vmatprep.subr.mxu1 %v2550_v13 }
 0x73e   : > { %7590 = vmatpush3.msra.mxu0 %v2381_v12  ;;  %7632 = vmatpush3.msra.mxu1 %v2550_v13  ;;  %v3166_v12 = vld [vmem:[#allocation7 + $0x88] sm:$0xff]  ;;  %v2907_v13 = vld [vmem:[#allocation8 + $0x350] sm:$0xff] }
 0x73f   : > { %7636 = vmatprep.subr.mxu0 %v9306_v26  ;;  %7678 = vmatprep.subr.mxu1 %v9210_v4 }
 0x7de   : > { %v7558_v14 = vpop.f32.mrf.mxu0 }
 0x7df   : > { %v7600_v15 = vpop.f32.mrf.mxu1 }
 0x7e0   : > { %v2371_v16 = vpop.f32.mrf.mxu0 }
 0x7e1   : > { %v2540_v18 = vpop.f32.mrf.mxu1  ;;  %7591 = vmatprep.mubr.f32.mxu0 %v2371_v16  ;;  %v3263_v16 = vld [vmem:[#allocation8 + $0x470] sm:$0xff] }
 0x7e2   : > { %7633 = vmatprep.mubr.f32.mxu1 %v2540_v18  ;;  %7592 = vmatmul.mubr.f32.vlgmr.msra.gmra.mxu0 %v7558_v14  ;;  %v3264_v14 = vld [vmem:[#allocation8 + $0x478] sm:$0xff]  ;;  %v2905_v18 = vld [vmem:[#allocation8 + $0x340] sm:$0xff] }
 0x7e3   : > { %7634 = vmatmul.mubr.f32.vlgmr.msra.gmra.mxu1 %v7600_v15  ;;  %7637 = vmatpush3.msra.mxu0 %v9306_v26  ;;  %v2725_v26 = vld [vmem:[#allocation13 + $0x2b0] sm:$0xff]  ;;  %v2906_v15 = vld [vmem:[#allocation8 + $0x348] sm:$0xff] }
 0x7e4   : > { %7679 = vmatpush3.msra.mxu1 %v9210_v4  ;;  %7638 = vmatprep.subr.mxu0 %v9312_v42 }
 0x7e5   : > { %7680 = vmatprep.subr.mxu1 %v9214_v5  ;;  %7639 = vmatpush3.msra.mxu0 %v9312_v42  ;;  %v3004_v42 = vld [vmem:[#allocation8 + $0x3b0] sm:$0xff] }
 0x7e6   : > { %7681 = vmatpush3.msra.mxu1 %v9214_v5  ;;  %7640 = vmatprep.mubr.msk.f32.mxu0 %vm653_vm0, %v9268_v50  ;;  %v2733_v50 = vld [vmem:[#allocation13 + $0x2f0] sm:$0xff] }
 0x7e7   : > { %7682 = vmatprep.mubr.msk.f32.mxu1 %vm653_vm0, %v2813_v19  ;;  %7685 = vmatprep.subr.mxu1 %v9210_v4  ;;  %v3262_v19 = vld [vmem:[#allocation8 + $0x468] sm:$0xff] }
 0x7e8   : > { %7641 = vmatmul.mubr.msk.f32.vlgmr.msra.gmra.mxu0 %vm653_vm0, %v9274_v53  ;;  %7683 = vmatmul.mubr.msk.f32.vlgmr.msra.gmra.mxu1 %vm653_vm0, %v2814_v20  ;;  %v2732_v53 = vld [vmem:[#allocation13 + $0x2e8] sm:$0xff]  ;;  %v2904_v20 = vld [vmem:[#allocation8 + $0x338] sm:$0xff] }
 0x7e9   : > { %7686 = vmatpush3.msra.mxu1 %v9210_v4  ;;  %7689 = vmatprep.mubr.msk.f32.mxu1 %vm653_vm0, %v2914_v21  ;;  %v3261_v21 = vld [vmem:[#allocation8 + $0x460] sm:$0xff] }
 0x7ea   : > { %7687 = vmatprep.subr.mxu1 %v9214_v5  ;;  %7643 = vmatprep.subr.mxu0 %v2734_v22 }
 0x7eb   : > { %7688 = vmatpush3.msra.mxu1 %v9214_v5  ;;  %7644 = vmatpush3.msra.mxu0 %v2734_v22  ;;  %v2903_v22 = vld [vmem:[#allocation8 + $0x330] sm:$0xff] }
 0x7ec   : > { %7692 = vmatprep.subr.mxu1 %v3013_v23  ;;  %7690 = vmatmul.mubr.msk.f32.vlgmr.msra.gmra.mxu1 %vm653_vm0, %v2915_v24  ;;  %v2902_v24 = vld [vmem:[#allocation8 + $0x328] sm:$0xff] }
 0x7ed   : > { %7693 = vmatpush3.msra.mxu1 %v3013_v23  ;;  %7645 = vmatprep.subr.mxu0 %v2733_v50  ;;  %v3260_v23 = vld [vmem:[#allocation8 + $0x458] sm:$0xff] }
 0x7ee   : > { %7694 = vmatprep.subr.mxu1 %v3012_v28  ;;  %7646 = vmatpush3.msra.mxu0 %v2733_v50  ;;  %v3259_v50 = vld [vmem:[#allocation8 + $0x450] sm:$0xff] }
 0x7ef   : > { %7695 = vmatpush3.msra.mxu1 %v3012_v28  ;;  %7647 = vmatprep.subr.mxu0 %v2732_v53  ;;  %v2901_v28 = vld [vmem:[#allocation8 + $0x320] sm:$0xff] }
 0x7f0   : > { %7696 = vmatprep.subr.mxu1 %v3011_v29  ;;  %7648 = vmatpush3.msra.mxu0 %v2732_v53  ;;  %v3258_v53 = vld [vmem:[#allocation8 + $0x448] sm:$0xff] }
 0x7f1   : > { %7697 = vmatpush3.msra.mxu1 %v3011_v29  ;;  %7649 = vmatprep.subr.mxu0 %v2731_v30  ;;  %v2900_v29 = vld [vmem:[#allocation8 + $0x318] sm:$0xff] }
 0x7f2   : > { %7698 = vmatprep.subr.mxu1 %v3010_v31  ;;  %7650 = vmatpush3.msra.mxu0 %v2731_v30  ;;  %v3257_v30 = vld [vmem:[#allocation8 + $0x440] sm:$0xff] }
 0x7f3   : > { %7699 = vmatpush3.msra.mxu1 %v3010_v31  ;;  %7651 = vmatprep.subr.mxu0 %v2730_v32  ;;  %v2899_v31 = vld [vmem:[#allocation8 + $0x310] sm:$0xff] }
 0x7f4   : > { %7700 = vmatprep.subr.mxu1 %v3009_v33  ;;  %7652 = vmatpush3.msra.mxu0 %v2730_v32  ;;  %v3256_v32 = vld [vmem:[#allocation8 + $0x438] sm:$0xff] }
 0x7f5   : > { %7701 = vmatpush3.msra.mxu1 %v3009_v33  ;;  %7653 = vmatprep.subr.mxu0 %v2729_v34  ;;  %v2898_v33 = vld [vmem:[#allocation8 + $0x308] sm:$0xff] }
 0x7f6   : > { %7702 = vmatprep.subr.mxu1 %v3008_v36  ;;  %7654 = vmatpush3.msra.mxu0 %v2729_v34  ;;  %v3255_v34 = vld [vmem:[#allocation8 + $0x430] sm:$0xff] }
 0x7f7   : > { %7703 = vmatpush3.msra.mxu1 %v3008_v36  ;;  %7655 = vmatprep.subr.mxu0 %v2728_v35  ;;  %v2897_v36 = vld [vmem:[#allocation8 + $0x300] sm:$0xff] }
 0x7f8   : > { %7704 = vmatprep.subr.mxu1 %v3007_v37  ;;  %7656 = vmatpush3.msra.mxu0 %v2728_v35  ;;  %v9357_v35 = vld [vmem:[#allocation11] sm:$0xff] }
 0x7f9   : > { %7705 = vmatpush3.msra.mxu1 %v3007_v37  ;;  %7657 = vmatprep.subr.mxu0 %v2727_v38  ;;  %v3254_v37 = vld [vmem:[#allocation8 + $0x428] sm:$0xff] }
 0x7fa   : > { %7706 = vmatprep.subr.mxu1 %v3006_v39  ;;  %7658 = vmatpush3.msra.mxu0 %v2727_v38  ;;  %v3253_v38 = vld [vmem:[#allocation8 + $0x420] sm:$0xff] }
 0x7fb   : > { %7707 = vmatpush3.msra.mxu1 %v3006_v39  ;;  %7659 = vmatprep.subr.mxu0 %v2726_v40  ;;  %v3252_v39 = vld [vmem:[#allocation8 + $0x418] sm:$0xff] }
 0x7fc   : > { %7708 = vmatprep.subr.mxu1 %v3005_v41  ;;  %7660 = vmatpush3.msra.mxu0 %v2726_v40  ;;  %v3251_v40 = vld [vmem:[#allocation8 + $0x410] sm:$0xff] }
 0x7fd   : > { %7709 = vmatpush3.msra.mxu1 %v3005_v41  ;;  %7661 = vmatprep.subr.mxu0 %v2725_v26  ;;  %v3250_v41 = vld [vmem:[#allocation8 + $0x408] sm:$0xff] }
 0x7fe   : > { %7710 = vmatprep.subr.mxu1 %v3004_v42  ;;  %7662 = vmatpush3.msra.mxu0 %v2725_v26  ;;  %v3249_v26 = vld [vmem:[#allocation8 + $0x400] sm:$0xff] }
 0x7ff   : > { %7711 = vmatpush3.msra.mxu1 %v3004_v42  ;;  %7663 = vmatprep.subr.mxu0 %v2724_v43 }
 0x800   : > { %7712 = vmatprep.subr.mxu1 %v3003_v44  ;;  %7664 = vmatpush3.msra.mxu0 %v2724_v43 }
 0x801   : > { %7713 = vmatpush3.msra.mxu1 %v3003_v44  ;;  %7665 = vmatprep.subr.mxu0 %v2723_v45 }
 0x802   : > { %7714 = vmatprep.subr.mxu1 %v3002_v46  ;;  %7666 = vmatpush3.msra.mxu0 %v2723_v45 }
 0x803   : > { %7715 = vmatpush3.msra.mxu1 %v3002_v46  ;;  %7667 = vmatprep.subr.mxu0 %v2722_v47 }
 0x804   : > { %7716 = vmatprep.subr.mxu1 %v3001_v48  ;;  %7668 = vmatpush3.msra.mxu0 %v2722_v47 }
 0x805   : > { %7717 = vmatpush3.msra.mxu1 %v3001_v48  ;;  %7669 = vmatprep.subr.mxu0 %v2721_v52 }
 0x806   : > { %7718 = vmatprep.subr.mxu1 %v3000_v49  ;;  %7670 = vmatpush3.msra.mxu0 %v2721_v52 }
 0x807   : > { %7719 = vmatpush3.msra.mxu1 %v3000_v49  ;;  %7671 = vmatprep.subr.mxu0 %v2720_v27 }
 0x808   : > { %7720 = vmatprep.subr.mxu1 %v2999_v51  ;;  %7672 = vmatpush3.msra.mxu0 %v2720_v27 }
 0x809   : > { %7721 = vmatpush3.msra.mxu1 %v2999_v51  ;;  %7673 = vmatprep.subr.mxu0 %v2719_v54  ;;  %v9367_v51 = vld [vmem:[#allocation11 + $0x10] sm:$0xff] }
 0x80a   : > { %7722 = vmatprep.subr.mxu1 %v2998_v25  ;;  %7674 = vmatpush3.msra.mxu0 %v2719_v54 }
 0x80b   : > { %7723 = vmatpush3.msra.mxu1 %v2998_v25  ;;  %7727 = vmatprep.subr.mxu0 %v2912_v55 }
 0x80c   : > { %7762 = vmatprep.subr.mxu1 %v9210_v4 }
 0x8a2   : > { %v7593_v56 = vpop.f32.mrf.mxu0 }
 0x8a3   : > { %v2473_v57 = vadd.f32 %v7593_v56, %v9299_v17  ;;  %v7635_v58 = vpop.f32.mrf.mxu1  ;;  %v2910_v17 = vld [vmem:[#allocation8 + $0x368] sm:$0xff] }
 0x8a4   : > { %v2463_v59 = vpop.f32.mrf.mxu0 }
 0x8a5   : > { %v9344_v60 = vadd.f32 %v7635_v58, %v2473_v57  ;;  %v2472_v61 = vadd.f32 %v2463_v59, %v9302_v3  ;;  %v2632_v62 = vpop.f32.mrf.mxu1  ;;  %v2909_v3 = vld [vmem:[#allocation8 + $0x360] sm:$0xff] }
 0x8a6   : > { %v6403_v58 = vld [vmem:[#allocation10 + $0x7] ss:$0 sm:$0xff] }
 0x8a7   : > { %v9347_v63 = vadd.f32 %v2632_v62, %v2472_v61  ;;  %v6404_v62 = vld [vmem:[#allocation10 + $0x8] ss:$0 sm:$0xff] }
 0x8a8   : > { %v7642_v0 = vpop.f32.mrf.mxu0  ;;  %v9349_v1 = vpop.f32.mrf.mxu1 }
 0x8aa   : > { %v2709_v2 = vpop.f32.mrf.mxu0  ;;  %v2887_v6 = vpop.f32.mrf.mxu1 }
 0x8ab   : > { %7675 = vmatprep.mubr.f32.mxu0 %v2709_v2 }
 0x8ac   : > { %7676 = vmatmul.mubr.f32.vlgmr.msra.gmra.mxu0 %v7642_v0  ;;  %v7691_v8 = vpop.f32.mrf.mxu1 }
 0x8ad   : > { %7728 = vmatpush3.msra.mxu0 %v2912_v55  ;;  %7759 = vmatprep.mubr.f32.mxu0 %v2887_v6  ;;  %v6402_v55 = vld [vmem:[#allocation10 + $0x6] ss:$0 sm:$0xff] }
 0x8ae   : > { %7729 = vmatprep.subr.mxu0 %v2911_v7  ;;  %v2988_v9 = vpop.f32.mrf.mxu1 }
 0x8af   : > { %7730 = vmatpush3.msra.mxu0 %v2911_v7  ;;  %7724 = vmatprep.mubr.f32.mxu1 %v2988_v9  ;;  %v3636_v9 = vld [vmem:[#allocation13 + $0x3f8] sm:$0xff] }
 0x8b0   : > { %7731 = vmatprep.subr.mxu0 %v2910_v17  ;;  %7725 = vmatmul.mubr.f32.vlgmr.msra.gmra.mxu1 %v7691_v8 }
 0x8b1   : > { %7732 = vmatpush3.msra.mxu0 %v2910_v17  ;;  %7763 = vmatpush3.msra.mxu1 %v9210_v4  ;;  %v3467_v17 = vld [vmem:[#allocation13 + $0x378] sm:$0xff] }
 0x8b2   : > { %7733 = vmatprep.subr.mxu0 %v2909_v3  ;;  %7764 = vmatprep.subr.mxu1 %v9214_v5 }
 0x8b3   : > { %7734 = vmatpush3.msra.mxu0 %v2909_v3  ;;  %7765 = vmatpush3.msra.mxu1 %v9214_v5  ;;  %v9383_v3 = vld [vmem:[#allocation11 + $0x8] sm:$0xff] }
 0x8b4   : > { %7735 = vmatprep.subr.mxu0 %v2908_v10  ;;  %7766 = vmatprep.mubr.msk.f32.mxu1 %vm653_vm0, %v3165_v11  ;;  %v3635_v11 = vld [vmem:[#allocation13 + $0x3f0] sm:$0xff] }
 0x8b5   : > { %7736 = vmatpush3.msra.mxu0 %v2908_v10  ;;  %7767 = vmatmul.mubr.msk.f32.vlgmr.msra.gmra.mxu1 %vm653_vm0, %v3166_v12  ;;  %v3466_v10 = vld [vmem:[#allocation13 + $0x370] sm:$0xff]  ;;  %v9387_v12 = vld [vmem:[#allocation11 + $0x18] sm:$0xff] }
 0x8b6   : > { %7737 = vmatprep.subr.mxu0 %v2907_v13  ;;  %7769 = vmatprep.subr.mxu1 %v3264_v14 }
 0x8b7   : > { %7738 = vmatpush3.msra.mxu0 %v2907_v13  ;;  %7770 = vmatpush3.msra.mxu1 %v3264_v14  ;;  %v3465_v13 = vld [vmem:[#allocation13 + $0x368] sm:$0xff] }
 0x8b8   : > { %7739 = vmatprep.subr.mxu0 %v2906_v15  ;;  %7771 = vmatprep.subr.mxu1 %v3263_v16  ;;  %v3634_v14 = vld [vmem:[#allocation13 + $0x3e8] sm:$0xff] }
 0x8b9   : > { %7740 = vmatpush3.msra.mxu0 %v2906_v15  ;;  %7772 = vmatpush3.msra.mxu1 %v3263_v16  ;;  %v3464_v15 = vld [vmem:[#allocation13 + $0x360] sm:$0xff] }
 0x8ba   : > { %7741 = vmatprep.subr.mxu0 %v2905_v18  ;;  %7773 = vmatprep.subr.mxu1 %v3262_v19  ;;  %v3633_v16 = vld [vmem:[#allocation13 + $0x3e0] sm:$0xff] }
 0x8bb   : > { %7742 = vmatpush3.msra.mxu0 %v2905_v18  ;;  %7774 = vmatpush3.msra.mxu1 %v3262_v19  ;;  %v3463_v18 = vld [vmem:[#allocation13 + $0x358] sm:$0xff] }
 0x8bc   : > { %7743 = vmatprep.subr.mxu0 %v2904_v20  ;;  %7775 = vmatprep.subr.mxu1 %v3261_v21  ;;  %v3632_v19 = vld [vmem:[#allocation13 + $0x3d8] sm:$0xff] }
 0x8bd   : > { %7744 = vmatpush3.msra.mxu0 %v2904_v20  ;;  %7776 = vmatpush3.msra.mxu1 %v3261_v21  ;;  %v3462_v20 = vld [vmem:[#allocation13 + $0x350] sm:$0xff] }
 0x8be   : > { %7745 = vmatprep.subr.mxu0 %v2903_v22  ;;  %7777 = vmatprep.subr.mxu1 %v3260_v23  ;;  %v3631_v21 = vld [vmem:[#allocation13 + $0x3d0] sm:$0xff] }
 0x8bf   : > { %7746 = vmatpush3.msra.mxu0 %v2903_v22  ;;  %7778 = vmatpush3.msra.mxu1 %v3260_v23  ;;  %v3461_v22 = vld [vmem:[#allocation13 + $0x348] sm:$0xff] }
 0x8c0   : > { %7747 = vmatprep.subr.mxu0 %v2902_v24  ;;  %7779 = vmatprep.subr.mxu1 %v3259_v50  ;;  %v3630_v23 = vld [vmem:[#allocation13 + $0x3c8] sm:$0xff] }
 0x8c1   : > { %7748 = vmatpush3.msra.mxu0 %v2902_v24  ;;  %7780 = vmatpush3.msra.mxu1 %v3259_v50  ;;  %v3460_v24 = vld [vmem:[#allocation13 + $0x340] sm:$0xff] }
 0x8c2   : > { %7749 = vmatprep.subr.mxu0 %v2901_v28  ;;  %7781 = vmatprep.subr.mxu1 %v3258_v53  ;;  %v3629_v50 = vld [vmem:[#allocation13 + $0x3c0] sm:$0xff] }
 0x8c3   : > { %7750 = vmatpush3.msra.mxu0 %v2901_v28  ;;  %7782 = vmatpush3.msra.mxu1 %v3258_v53  ;;  %v3459_v28 = vld [vmem:[#allocation13 + $0x338] sm:$0xff] }
 0x8c4   : > { %7751 = vmatprep.subr.mxu0 %v2900_v29  ;;  %7783 = vmatprep.subr.mxu1 %v3257_v30  ;;  %v3628_v53 = vld [vmem:[#allocation13 + $0x3b8] sm:$0xff] }
 0x8c5   : > { %7752 = vmatpush3.msra.mxu0 %v2900_v29  ;;  %7784 = vmatpush3.msra.mxu1 %v3257_v30  ;;  %v3458_v29 = vld [vmem:[#allocation13 + $0x330] sm:$0xff] }
 0x8c6   : > { %7753 = vmatprep.subr.mxu0 %v2899_v31  ;;  %7785 = vmatprep.subr.mxu1 %v3256_v32  ;;  %v3627_v30 = vld [vmem:[#allocation13 + $0x3b0] sm:$0xff] }
 0x8c7   : > { %7754 = vmatpush3.msra.mxu0 %v2899_v31  ;;  %7786 = vmatpush3.msra.mxu1 %v3256_v32  ;;  %v3457_v31 = vld [vmem:[#allocation13 + $0x328] sm:$0xff] }
 0x8c8   : > { %7755 = vmatprep.subr.mxu0 %v2898_v33  ;;  %7787 = vmatprep.subr.mxu1 %v3255_v34  ;;  %v3626_v32 = vld [vmem:[#allocation13 + $0x3a8] sm:$0xff] }
 0x8c9   : > { %7756 = vmatpush3.msra.mxu0 %v2898_v33  ;;  %7788 = vmatpush3.msra.mxu1 %v3255_v34  ;;  %v3456_v33 = vld [vmem:[#allocation13 + $0x320] sm:$0xff] }
 0x8ca   : > { %7757 = vmatprep.subr.mxu0 %v2897_v36  ;;  %7789 = vmatprep.subr.mxu1 %v3254_v37  ;;  %v3625_v34 = vld [vmem:[#allocation13 + $0x3a0] sm:$0xff] }
 0x8cb   : > { %7758 = vmatpush3.msra.mxu0 %v2897_v36  ;;  %7790 = vmatpush3.msra.mxu1 %v3254_v37  ;;  %v3455_v36 = vld [vmem:[#allocation13 + $0x318] sm:$0xff] }
 0x8cc   : > { %7760 = vmatmul.mubr.f32.vlgmr.msra.gmra.mxu0 %v9349_v1  ;;  %7791 = vmatprep.subr.mxu1 %v3253_v38  ;;  %v3624_v37 = vld [vmem:[#allocation13 + $0x398] sm:$0xff] }
 0x8cd   : > { %7808 = vmatprep.mubr.msk.f32.mxu0 %vm653_vm0, %v9357_v35  ;;  %7792 = vmatpush3.msra.mxu1 %v3253_v38  ;;  %v3454_v38 = vld [vmem:[#allocation13 + $0x310] sm:$0xff] }
 0x8ce   : > { %7793 = vmatprep.subr.mxu1 %v3252_v39 }
 0x8cf   : > { %7794 = vmatpush3.msra.mxu1 %v3252_v39  ;;  %v3623_v39 = vld [vmem:[#allocation13 + $0x390] sm:$0xff] }
 0x8d0   : > { %7795 = vmatprep.subr.mxu1 %v3251_v40 }
 0x8d1   : > { %7796 = vmatpush3.msra.mxu1 %v3251_v40  ;;  %v3453_v40 = vld [vmem:[#allocation13 + $0x308] sm:$0xff] }
 0x8d2   : > { %7797 = vmatprep.subr.mxu1 %v3250_v41 }
 0x8d3   : > { %7798 = vmatpush3.msra.mxu1 %v3250_v41  ;;  %v3622_v41 = vld [vmem:[#allocation13 + $0x388] sm:$0xff] }
 0x8d4   : > { %7799 = vmatprep.subr.mxu1 %v3249_v26 }
 0x8d5   : > { %7800 = vmatpush3.msra.mxu1 %v3249_v26  ;;  %v3452_v26 = vld [vmem:[#allocation13 + $0x300] sm:$0xff] }
 0x96c   : > { %v7677_v42 = vpop.f32.mrf.mxu0 }
 0x96d   : > { %v9362_v43 = vadd.f32 %v7677_v42, %v9344_v60  ;;  %v3621_v42 = vld [vmem:[#allocation13 + $0x380] sm:$0xff] }
 0x96e   : > { %v2801_v44 = vpop.f32.mrf.mxu0 }
 0x96f   : > { %v9365_v45 = vadd.f32 %v2801_v44, %v9347_v63 }
 0x970   : > { %v7726_v46 = vpop.f32.mrf.mxu1 }
 0x972   : > { %v3080_v47 = vpop.f32.mrf.mxu1 }
 0x975   : > { %v7768_v48 = vpop.f32.mrf.mxu1 }
 0x977   : > { %v3239_v49 = vpop.f32.mrf.mxu1 }
 0x978   : > { %7801 = vmatprep.mubr.f32.mxu1 %v3239_v49  ;;  %v3884_v49 = vld [vmem:[#allocation7 + $0x90] sm:$0xff] }
 0x979   : > { %7802 = vmatmul.mubr.f32.vlgmr.msra.gmra.mxu1 %v7768_v48 }
 0x97a   : > { %7850 = vmatprep.mubr.msk.f32.mxu1 %vm653_vm0, %v9367_v51 }
 0x98c   : > { %v7761_v25 = vpop.f32.mrf.mxu0 }
 0x98d   : > { %v3161_v27 = vadd.f32 %v7761_v25, %v7726_v46  ;;  %v3885_v25 = vld [vmem:[#allocation7 + $0x98] sm:$0xff] }
 0x98e   : > { %v3155_v52 = vpop.f32.mrf.mxu0 }
 0x98f   : > { %v3156_v56 = vadd.f32 %v3155_v52, %v3080_v47  ;;  %v9399_v52 = vld [vmem:[#allocation11 + $0x20] sm:$0xff] }
 0xa39   : > { %v7803_v54 = vpop.f32.mrf.mxu1 }
 0xa3a   : > { %v3341_v57 = vadd.f32 %v7803_v54, %v3161_v27  ;;  %v3985_v27 = vld [vmem:[#allocation7 + $0xa0] sm:$0xff]  ;;  %v3805_v54 = vld [vmem:[#allocation13 + $0x478] sm:$0xff] }
 0xa3b   : > { %v3331_v59 = vpop.f32.mrf.mxu1 }
 0xa3c   : > { %v3351_v60 = vmul.f32 %v6402_v55, %v3341_v57  ;;  %v3340_v61 = vadd.f32 %v3331_v59, %v3156_v56  ;;  %v4084_v56 = vld [vmem:[#allocation8 + $0x578] sm:$0xff]  ;;  %v4083_v59 = vld [vmem:[#allocation8 + $0x570] sm:$0xff] }
 0xa3d   : > { %v3986_v57 = vld [vmem:[#allocation7 + $0xa8] sm:$0xff] }
 0xa3e   : > { %v3361_v63 = vadd.f32 %v6403_v58, %v3351_v60  ;;  %v3350_v0 = vmul.f32 %v6402_v55, %v3340_v61  ;;  %v9405_v55 = vld [vmem:[#allocation11 + $0x28] sm:$0xff]  ;;  %v3803_v60 = vld [vmem:[#allocation13 + $0x468] sm:$0xff] }
 0xa3f   : > { %v4082_v61 = vld [vmem:[#allocation8 + $0x568] sm:$0xff] }
 0xa40   : > { %vm3363_vm7 = vcmp.ge.f32.partialorder %v3361_v63, 0.0  ;;  %v3373_v1 = vmul.f32 %v6404_v62, %v3361_v63  ;;  %v3360_v2 = vadd.f32 %v6403_v58, %v3350_v0  ;;  %v3804_v58 = vld [vmem:[#allocation13 + $0x470] sm:$0xff]  ;;  %v3801_v0 = vld [vmem:[#allocation13 + $0x458] sm:$0xff] }
 0xa42   : > { %vm3362_vm8 = vcmp.ge.f32.partialorder %v3360_v2, 0.0  ;;  %v3372_v6 = vmul.f32 %v6404_v62, %v3360_v2  ;;  %v9371_v7 = vsel %vm3363_vm7, %v3361_v63, %v3373_v1  ;;  %v3802_v62 = vld [vmem:[#allocation13 + $0x460] sm:$0xff]  ;;  %v4080_v1 = vld [vmem:[#allocation8 + $0x558] sm:$0xff] }
 0xa43   : > { %7804 = vmatprep.subr.mxu0 %v9371_v7  ;;  %7846 = vmatprep.subr.mxu1 %v9371_v7  ;;  %v4081_v63 = vld [vmem:[#allocation8 + $0x560] sm:$0xff] }
 0xa44   : > { %7805 = vmatpush3.msra.mxu0 %v9371_v7  ;;  %7847 = vmatpush3.msra.mxu1 %v9371_v7  ;;  %v9377_v8 = vsel %vm3362_vm8, %v3360_v2, %v3372_v6  ;;  %v3800_v2 = vld [vmem:[#allocation13 + $0x450] sm:$0xff] }
 0xa45   : > { %7806 = vmatprep.subr.mxu0 %v9377_v8  ;;  %7848 = vmatprep.subr.mxu1 %v9377_v8  ;;  %v4079_v6 = vld [vmem:[#allocation8 + $0x550] sm:$0xff] }
 0xa46   : > { %7807 = vmatpush3.msra.mxu0 %v9377_v8  ;;  %7849 = vmatpush3.msra.mxu1 %v9377_v8 }
 0xa47   : > { %7809 = vmatmul.mubr.msk.f32.vlgmr.msra.gmra.mxu0 %vm653_vm0, %v9383_v3  ;;  %7811 = vmatprep.subr.mxu0 %v3467_v17 }
 0xa48   : > { %7851 = vmatmul.mubr.msk.f32.vlgmr.msra.gmra.mxu1 %vm653_vm0, %v9387_v12  ;;  %7853 = vmatprep.subr.mxu1 %v3636_v9 }
 0xa49   : > { %7812 = vmatpush3.msra.mxu0 %v3467_v17  ;;  %7854 = vmatpush3.msra.mxu1 %v3636_v9  ;;  %v3798_v17 = vld [vmem:[#allocation13 + $0x440] sm:$0xff] }
 0xa4a   : > { %7813 = vmatprep.subr.mxu0 %v3466_v10  ;;  %7855 = vmatprep.subr.mxu1 %v3635_v11  ;;  %v4077_v9 = vld [vmem:[#allocation8 + $0x540] sm:$0xff] }
 0xa4b   : > { %7814 = vmatpush3.msra.mxu0 %v3466_v10  ;;  %7856 = vmatpush3.msra.mxu1 %v3635_v11  ;;  %v3797_v10 = vld [vmem:[#allocation13 + $0x438] sm:$0xff] }
 0xa4c   : > { %7815 = vmatprep.subr.mxu0 %v3465_v13  ;;  %7857 = vmatprep.subr.mxu1 %v3634_v14  ;;  %v4076_v11 = vld [vmem:[#allocation8 + $0x538] sm:$0xff] }
 0xa4d   : > { %7816 = vmatpush3.msra.mxu0 %v3465_v13  ;;  %7858 = vmatpush3.msra.mxu1 %v3634_v14  ;;  %v3796_v13 = vld [vmem:[#allocation13 + $0x430] sm:$0xff] }
 0xa4e   : > { %7817 = vmatprep.subr.mxu0 %v3464_v15  ;;  %7859 = vmatprep.subr.mxu1 %v3633_v16  ;;  %v4075_v14 = vld [vmem:[#allocation8 + $0x530] sm:$0xff] }
 0xa4f   : > { %7818 = vmatpush3.msra.mxu0 %v3464_v15  ;;  %7860 = vmatpush3.msra.mxu1 %v3633_v16  ;;  %v3795_v15 = vld [vmem:[#allocation13 + $0x428] sm:$0xff] }
 0xa50   : > { %7819 = vmatprep.subr.mxu0 %v3463_v18  ;;  %7861 = vmatprep.subr.mxu1 %v3632_v19  ;;  %v4074_v16 = vld [vmem:[#allocation8 + $0x528] sm:$0xff] }
 0xa51   : > { %7820 = vmatpush3.msra.mxu0 %v3463_v18  ;;  %7862 = vmatpush3.msra.mxu1 %v3632_v19  ;;  %v3794_v18 = vld [vmem:[#allocation13 + $0x420] sm:$0xff] }
 0xa52   : > { %7821 = vmatprep.subr.mxu0 %v3462_v20  ;;  %7863 = vmatprep.subr.mxu1 %v3631_v21  ;;  %v4073_v19 = vld [vmem:[#allocation8 + $0x520] sm:$0xff] }
 0xa53   : > { %7822 = vmatpush3.msra.mxu0 %v3462_v20  ;;  %7864 = vmatpush3.msra.mxu1 %v3631_v21  ;;  %v3793_v20 = vld [vmem:[#allocation13 + $0x418] sm:$0xff] }
 0xa54   : > { %7823 = vmatprep.subr.mxu0 %v3461_v22  ;;  %7865 = vmatprep.subr.mxu1 %v3630_v23  ;;  %v4072_v21 = vld [vmem:[#allocation8 + $0x518] sm:$0xff] }
 0xa55   : > { %7824 = vmatpush3.msra.mxu0 %v3461_v22  ;;  %7866 = vmatpush3.msra.mxu1 %v3630_v23  ;;  %v4071_v22 = vld [vmem:[#allocation8 + $0x510] sm:$0xff]  ;;  %v4070_v23 = vld [vmem:[#allocation8 + $0x508] sm:$0xff] }
 0xa56   : > { %7825 = vmatprep.subr.mxu0 %v3460_v24  ;;  %7867 = vmatprep.subr.mxu1 %v3629_v50 }
 0xa57   : > { %7826 = vmatpush3.msra.mxu0 %v3460_v24  ;;  %7868 = vmatpush3.msra.mxu1 %v3629_v50  ;;  %v4069_v24 = vld [vmem:[#allocation8 + $0x500] sm:$0xff]  ;;  %v3792_v50 = vld [vmem:[#allocation13 + $0x410] sm:$0xff] }
 0xa58   : > { %7827 = vmatprep.subr.mxu0 %v3459_v28  ;;  %7869 = vmatprep.subr.mxu1 %v3628_v53 }
 0xa59   : > { %7828 = vmatpush3.msra.mxu0 %v3459_v28  ;;  %7870 = vmatpush3.msra.mxu1 %v3628_v53  ;;  %v3791_v28 = vld [vmem:[#allocation13 + $0x408] sm:$0xff]  ;;  %v3790_v53 = vld [vmem:[#allocation13 + $0x400] sm:$0xff] }
 0xa5a   : > { %7829 = vmatprep.subr.mxu0 %v3458_v29  ;;  %7871 = vmatprep.subr.mxu1 %v3627_v30 }
 0xa5b   : > { %7830 = vmatpush3.msra.mxu0 %v3458_v29  ;;  %7872 = vmatpush3.msra.mxu1 %v3627_v30  ;;  %v3983_v29 = vld [vmem:[#allocation8 + $0x4f8] sm:$0xff] }
 0xa5c   : > { %7831 = vmatprep.subr.mxu0 %v3457_v31  ;;  %7873 = vmatprep.subr.mxu1 %v3626_v32 }
 0xa5d   : > { %7832 = vmatpush3.msra.mxu0 %v3457_v31  ;;  %7874 = vmatpush3.msra.mxu1 %v3626_v32 }
 0xa5e   : > { %7833 = vmatprep.subr.mxu0 %v3456_v33  ;;  %7875 = vmatprep.subr.mxu1 %v3625_v34 }
 0xa5f   : > { %7834 = vmatpush3.msra.mxu0 %v3456_v33  ;;  %7876 = vmatpush3.msra.mxu1 %v3625_v34 }
 0xa60   : > { %7835 = vmatprep.subr.mxu0 %v3455_v36  ;;  %7877 = vmatprep.subr.mxu1 %v3624_v37 }
 0xa61   : > { %7836 = vmatpush3.msra.mxu0 %v3455_v36  ;;  %7878 = vmatpush3.msra.mxu1 %v3624_v37 }
 0xa62   : > { %7837 = vmatprep.subr.mxu0 %v3454_v38  ;;  %7879 = vmatprep.subr.mxu1 %v3623_v39 }
 0xa63   : > { %7838 = vmatpush3.msra.mxu0 %v3454_v38  ;;  %7880 = vmatpush3.msra.mxu1 %v3623_v39 }
 0xa64   : > { %7839 = vmatprep.subr.mxu0 %v3453_v40  ;;  %7881 = vmatprep.subr.mxu1 %v3622_v41 }
 0xa65   : > { %7840 = vmatpush3.msra.mxu0 %v3453_v40  ;;  %7882 = vmatpush3.msra.mxu1 %v3622_v41 }
 0xa66   : > { %7841 = vmatprep.subr.mxu0 %v3452_v26  ;;  %7883 = vmatprep.subr.mxu1 %v3621_v42 }
 0xa67   : > { %7842 = vmatpush3.msra.mxu0 %v3452_v26  ;;  %7884 = vmatpush3.msra.mxu1 %v3621_v42  ;;  %v3982_v42 = vld [vmem:[#allocation8 + $0x4f0] sm:$0xff] }
 0xa68   : > { %7888 = vmatprep.subr.mxu0 %v9371_v7  ;;  %7930 = vmatprep.subr.mxu1 %v9210_v4 }
 0xb07   : > { %v7810_v44 = vpop.f32.mrf.mxu0 }
 0xb08   : > { %v7852_v46 = vpop.f32.mrf.mxu1 }
 0xb09   : > { %v3442_v47 = vpop.f32.mrf.mxu0 }
 0xb0a   : > { %v3611_v48 = vpop.f32.mrf.mxu1  ;;  %7843 = vmatprep.mubr.f32.mxu0 %v3442_v47  ;;  %v3979_v47 = vld [vmem:[#allocation8 + $0x4d8] sm:$0xff] }
 0xb0b   : > { %7885 = vmatprep.mubr.f32.mxu1 %v3611_v48  ;;  %7844 = vmatmul.mubr.f32.vlgmr.msra.gmra.mxu0 %v7810_v44  ;;  %v4236_v48 = vld [vmem:[#allocation7 + $0xb0] sm:$0xff] }
 0xb0c   : > { %7886 = vmatmul.mubr.f32.vlgmr.msra.gmra.mxu1 %v7852_v46  ;;  %7889 = vmatpush3.msra.mxu0 %v9371_v7  ;;  %v3799_v7 = vld [vmem:[#allocation13 + $0x448] sm:$0xff] }
 0xb0d   : > { %7931 = vmatpush3.msra.mxu1 %v9210_v4  ;;  %7890 = vmatprep.subr.mxu0 %v9377_v8 }
 0xb0e   : > { %7932 = vmatprep.subr.mxu1 %v9214_v5  ;;  %7891 = vmatpush3.msra.mxu0 %v9377_v8  ;;  %v4078_v8 = vld [vmem:[#allocation8 + $0x548] sm:$0xff] }
 0xb0f   : > { %7933 = vmatpush3.msra.mxu1 %v9214_v5  ;;  %7892 = vmatprep.mubr.msk.f32.mxu0 %vm653_vm0, %v9399_v52 }
 0xb10   : > { %7934 = vmatprep.mubr.msk.f32.mxu1 %vm653_vm0, %v3884_v49  ;;  %7937 = vmatprep.subr.mxu1 %v9210_v4  ;;  %v4237_v49 = vld [vmem:[#allocation7 + $0xb8] sm:$0xff] }
 0xb11   : > { %7893 = vmatmul.mubr.msk.f32.vlgmr.msra.gmra.mxu0 %vm653_vm0, %v9405_v55  ;;  %7935 = vmatmul.mubr.msk.f32.vlgmr.msra.gmra.mxu1 %vm653_vm0, %v3885_v25  ;;  %v3978_v25 = vld [vmem:[#allocation8 + $0x4d0] sm:$0xff] }
 0xb12   : > { %7938 = vmatpush3.msra.mxu1 %v9210_v4  ;;  %7941 = vmatprep.mubr.msk.f32.mxu1 %vm653_vm0, %v3985_v27  ;;  %v4335_v27 = vld [vmem:[#allocation8 + $0x5f8] sm:$0xff] }
 0xb13   : > { %7939 = vmatprep.subr.mxu1 %v9214_v5  ;;  %7895 = vmatprep.subr.mxu0 %v3805_v54 }
 0xb14   : > { %7940 = vmatpush3.msra.mxu1 %v9214_v5  ;;  %7896 = vmatpush3.msra.mxu0 %v3805_v54  ;;  %v3977_v54 = vld [vmem:[#allocation8 + $0x4c8] sm:$0xff] }
 0xb15   : > { %7944 = vmatprep.subr.mxu1 %v4084_v56  ;;  %7942 = vmatmul.mubr.msk.f32.vlgmr.msra.gmra.mxu1 %vm653_vm0, %v3986_v57  ;;  %v3976_v57 = vld [vmem:[#allocation8 + $0x4c0] sm:$0xff] }
 0xb16   : > { %7945 = vmatpush3.msra.mxu1 %v4084_v56  ;;  %7897 = vmatprep.subr.mxu0 %v3804_v58  ;;  %v4334_v56 = vld [vmem:[#allocation8 + $0x5f0] sm:$0xff] }
 0xb17   : > { %7946 = vmatprep.subr.mxu1 %v4083_v59  ;;  %7898 = vmatpush3.msra.mxu0 %v3804_v58  ;;  %v4333_v58 = vld [vmem:[#allocation8 + $0x5e8] sm:$0xff] }
 0xb18   : > { %7947 = vmatpush3.msra.mxu1 %v4083_v59  ;;  %7899 = vmatprep.subr.mxu0 %v3803_v60  ;;  %v3975_v59 = vld [vmem:[#allocation8 + $0x4b8] sm:$0xff] }
 0xb19   : > { %7948 = vmatprep.subr.mxu1 %v4082_v61  ;;  %7900 = vmatpush3.msra.mxu0 %v3803_v60  ;;  %v4332_v60 = vld [vmem:[#allocation8 + $0x5e0] sm:$0xff] }
 0xb1a   : > { %7949 = vmatpush3.msra.mxu1 %v4082_v61  ;;  %7901 = vmatprep.subr.mxu0 %v3802_v62  ;;  %v3974_v61 = vld [vmem:[#allocation8 + $0x4b0] sm:$0xff] }
 0xb1b   : > { %7950 = vmatprep.subr.mxu1 %v4081_v63  ;;  %7902 = vmatpush3.msra.mxu0 %v3802_v62  ;;  %v4331_v62 = vld [vmem:[#allocation8 + $0x5d8] sm:$0xff] }
 0xb1c   : > { %7951 = vmatpush3.msra.mxu1 %v4081_v63  ;;  %7903 = vmatprep.subr.mxu0 %v3801_v0  ;;  %v3973_v63 = vld [vmem:[#allocation8 + $0x4a8] sm:$0xff] }
 0xb1d   : > { %7952 = vmatprep.subr.mxu1 %v4080_v1  ;;  %7904 = vmatpush3.msra.mxu0 %v3801_v0  ;;  %v4330_v0 = vld [vmem:[#allocation8 + $0x5d0] sm:$0xff] }
 0xb1e   : > { %7953 = vmatpush3.msra.mxu1 %v4080_v1  ;;  %7905 = vmatprep.subr.mxu0 %v3800_v2  ;;  %v3972_v1 = vld [vmem:[#allocation8 + $0x4a0] sm:$0xff] }
 0xb1f   : > { %7954 = vmatprep.subr.mxu1 %v4079_v6  ;;  %7906 = vmatpush3.msra.mxu0 %v3800_v2  ;;  %v4329_v2 = vld [vmem:[#allocation8 + $0x5c8] sm:$0xff] }
 0xb20   : > { %7955 = vmatpush3.msra.mxu1 %v4079_v6  ;;  %7907 = vmatprep.subr.mxu0 %v3799_v7  ;;  %v3971_v6 = vld [vmem:[#allocation8 + $0x498] sm:$0xff] }
 0xb21   : > { %7956 = vmatprep.subr.mxu1 %v4078_v8  ;;  %7908 = vmatpush3.msra.mxu0 %v3799_v7  ;;  %v4328_v7 = vld [vmem:[#allocation8 + $0x5c0] sm:$0xff] }
 0xb22   : > { %7957 = vmatpush3.msra.mxu1 %v4078_v8  ;;  %7909 = vmatprep.subr.mxu0 %v3798_v17  ;;  %v3970_v8 = vld [vmem:[#allocation8 + $0x490] sm:$0xff] }
 0xb23   : > { %7958 = vmatprep.subr.mxu1 %v4077_v9  ;;  %7910 = vmatpush3.msra.mxu0 %v3798_v17  ;;  %v4327_v17 = vld [vmem:[#allocation8 + $0x5b8] sm:$0xff] }
 0xb24   : > { %7959 = vmatpush3.msra.mxu1 %v4077_v9  ;;  %7911 = vmatprep.subr.mxu0 %v3797_v10  ;;  %v3969_v9 = vld [vmem:[#allocation8 + $0x488] sm:$0xff] }
 0xb25   : > { %7960 = vmatprep.subr.mxu1 %v4076_v11  ;;  %7912 = vmatpush3.msra.mxu0 %v3797_v10  ;;  %v4326_v10 = vld [vmem:[#allocation8 + $0x5b0] sm:$0xff] }
 0xb26   : > { %7961 = vmatpush3.msra.mxu1 %v4076_v11  ;;  %7913 = vmatprep.subr.mxu0 %v3796_v13  ;;  %v3968_v11 = vld [vmem:[#allocation8 + $0x480] sm:$0xff] }
 0xb27   : > { %7962 = vmatprep.subr.mxu1 %v4075_v14  ;;  %7914 = vmatpush3.msra.mxu0 %v3796_v13  ;;  %v4325_v13 = vld [vmem:[#allocation8 + $0x5a8] sm:$0xff] }
 0xb28   : > { %7963 = vmatpush3.msra.mxu1 %v4075_v14  ;;  %7915 = vmatprep.subr.mxu0 %v3795_v15  ;;  %v4324_v14 = vld [vmem:[#allocation8 + $0x5a0] sm:$0xff] }
 0xb29   : > { %7964 = vmatprep.subr.mxu1 %v4074_v16  ;;  %7916 = vmatpush3.msra.mxu0 %v3795_v15  ;;  %v4323_v15 = vld [vmem:[#allocation8 + $0x598] sm:$0xff] }
 0xb2a   : > { %7965 = vmatpush3.msra.mxu1 %v4074_v16  ;;  %7917 = vmatprep.subr.mxu0 %v3794_v18  ;;  %v4322_v16 = vld [vmem:[#allocation8 + $0x590] sm:$0xff] }
 0xb2b   : > { %7966 = vmatprep.subr.mxu1 %v4073_v19  ;;  %7918 = vmatpush3.msra.mxu0 %v3794_v18  ;;  %v4321_v18 = vld [vmem:[#allocation8 + $0x588] sm:$0xff] }
 0xb2c   : > { %7967 = vmatpush3.msra.mxu1 %v4073_v19  ;;  %7919 = vmatprep.subr.mxu0 %v3793_v20  ;;  %v4320_v19 = vld [vmem:[#allocation8 + $0x580] sm:$0xff] }
 0xb2d   : > { %7968 = vmatprep.subr.mxu1 %v4072_v21  ;;  %7920 = vmatpush3.msra.mxu0 %v3793_v20 }
 0xb2e   : > { %7969 = vmatpush3.msra.mxu1 %v4072_v21  ;;  %7921 = vmatprep.subr.mxu0 %v3792_v50 }
 0xb2f   : > { %7970 = vmatprep.subr.mxu1 %v4071_v22  ;;  %7922 = vmatpush3.msra.mxu0 %v3792_v50 }
 0xb30   : > { %7971 = vmatpush3.msra.mxu1 %v4071_v22  ;;  %7923 = vmatprep.subr.mxu0 %v3791_v28 }
 0xb31   : > { %7972 = vmatprep.subr.mxu1 %v4070_v23  ;;  %7924 = vmatpush3.msra.mxu0 %v3791_v28 }
 0xb32   : > { %7973 = vmatpush3.msra.mxu1 %v4070_v23  ;;  %7925 = vmatprep.subr.mxu0 %v3790_v53 }
 0xb33   : > { %7974 = vmatprep.subr.mxu1 %v4069_v24  ;;  %7926 = vmatpush3.msra.mxu0 %v3790_v53 }
 0xb34   : > { %7975 = vmatpush3.msra.mxu1 %v4069_v24  ;;  %7979 = vmatprep.subr.mxu0 %v3983_v29 }
 0xb35   : > { %8014 = vmatprep.subr.mxu1 %v9210_v4 }
 0xbcb   : > { %v7845_v30 = vpop.f32.mrf.mxu0 }
 0xbcc   : > { %v3544_v31 = vadd.f32 %v7845_v30, %v9362_v43  ;;  %v7887_v32 = vpop.f32.mrf.mxu1  ;;  %v3981_v43 = vld [vmem:[#allocation8 + $0x4e8] sm:$0xff] }
 0xbcd   : > { %v3534_v33 = vpop.f32.mrf.mxu0 }
 0xbce   : > { %v9417_v34 = vadd.f32 %v7887_v32, %v3544_v31  ;;  %v3543_v36 = vadd.f32 %v3534_v33, %v9365_v45  ;;  %v3703_v37 = vpop.f32.mrf.mxu1  ;;  %v3980_v45 = vld [vmem:[#allocation8 + $0x4e0] sm:$0xff]  ;;  %v6417_v32 = vld [vmem:[#allocation10 + $0x9] ss:$0 sm:$0xff] }
 0xbd0   : > { %v9420_v38 = vadd.f32 %v3703_v37, %v3543_v36  ;;  %v6418_v36 = vld [vmem:[#allocation10 + $0xa] ss:$0 sm:$0xff] }
 0xbd1   : > { %v7894_v39 = vpop.f32.mrf.mxu0  ;;  %v9422_v40 = vpop.f32.mrf.mxu1 }
 0xbd3   : > { %v3780_v41 = vpop.f32.mrf.mxu0  ;;  %v3958_v26 = vpop.f32.mrf.mxu1 }
 0xbd4   : > { %7927 = vmatprep.mubr.f32.mxu0 %v3780_v41 }
 0xbd5   : > { %7928 = vmatmul.mubr.f32.vlgmr.msra.gmra.mxu0 %v7894_v39  ;;  %v7943_v44 = vpop.f32.mrf.mxu1 }
 0xbd6   : > { %7980 = vmatpush3.msra.mxu0 %v3983_v29  ;;  %8011 = vmatprep.mubr.f32.mxu0 %v3958_v26 }
 0xbd7   : > { %7981 = vmatprep.subr.mxu0 %v3982_v42  ;;  %v4059_v46 = vpop.f32.mrf.mxu1 }
 0xbd8   : > { %7982 = vmatpush3.msra.mxu0 %v3982_v42  ;;  %7976 = vmatprep.mubr.f32.mxu1 %v4059_v46 }
 0xbd9   : > { %7983 = vmatprep.subr.mxu0 %v3981_v43  ;;  %7977 = vmatmul.mubr.f32.vlgmr.msra.gmra.mxu1 %v7943_v44 }
 0xbda   : > { %7984 = vmatpush3.msra.mxu0 %v3981_v43  ;;  %8015 = vmatpush3.msra.mxu1 %v9210_v4 }
 0xbdb   : > { %7985 = vmatprep.subr.mxu0 %v3980_v45  ;;  %8016 = vmatprep.subr.mxu1 %v9214_v5 }
 0xbdc   : > { %7986 = vmatpush3.msra.mxu0 %v3980_v45  ;;  %8017 = vmatpush3.msra.mxu1 %v9214_v5  ;;  %v4538_v45 = vld [vmem:[#allocation13 + $0x4f8] sm:$0xff] }
 0xbdd   : > { %7987 = vmatprep.subr.mxu0 %v3979_v47  ;;  %8018 = vmatprep.mubr.msk.f32.mxu1 %vm653_vm0, %v4236_v48  ;;  %v4537_v48 = vld [vmem:[#allocation13 + $0x4f0] sm:$0xff] }
 0xbde   : > { %7988 = vmatpush3.msra.mxu0 %v3979_v47  ;;  %8019 = vmatmul.mubr.msk.f32.vlgmr.msra.gmra.mxu1 %vm653_vm0, %v4237_v49  ;;  %v4707_v47 = vld [vmem:[#allocation13 + $0x578] sm:$0xff]  ;;  %v4706_v49 = vld [vmem:[#allocation13 + $0x570] sm:$0xff] }
 0xbdf   : > { %7989 = vmatprep.subr.mxu0 %v3978_v25  ;;  %8021 = vmatprep.subr.mxu1 %v4335_v27 }
 0xbe0   : > { %7990 = vmatpush3.msra.mxu0 %v3978_v25  ;;  %8022 = vmatpush3.msra.mxu1 %v4335_v27  ;;  %v4536_v25 = vld [vmem:[#allocation13 + $0x4e8] sm:$0xff] }
 0xbe1   : > { %7991 = vmatprep.subr.mxu0 %v3977_v54  ;;  %8023 = vmatprep.subr.mxu1 %v4334_v56  ;;  %v4705_v27 = vld [vmem:[#allocation13 + $0x568] sm:$0xff] }
 0xbe2   : > { %7992 = vmatpush3.msra.mxu0 %v3977_v54  ;;  %8024 = vmatpush3.msra.mxu1 %v4334_v56  ;;  %v4535_v54 = vld [vmem:[#allocation13 + $0x4e0] sm:$0xff] }
 0xbe3   : > { %7993 = vmatprep.subr.mxu0 %v3976_v57  ;;  %8025 = vmatprep.subr.mxu1 %v4333_v58  ;;  %v4704_v56 = vld [vmem:[#allocation13 + $0x560] sm:$0xff] }
 0xbe4   : > { %7994 = vmatpush3.msra.mxu0 %v3976_v57  ;;  %8026 = vmatpush3.msra.mxu1 %v4333_v58  ;;  %v4703_v57 = vld [vmem:[#allocation13 + $0x558] sm:$0xff]  ;;  %v4702_v58 = vld [vmem:[#allocation13 + $0x550] sm:$0xff] }
 0xbe5   : > { %7995 = vmatprep.subr.mxu0 %v3975_v59  ;;  %8027 = vmatprep.subr.mxu1 %v4332_v60 }
 0xbe6   : > { %7996 = vmatpush3.msra.mxu0 %v3975_v59  ;;  %8028 = vmatpush3.msra.mxu1 %v4332_v60  ;;  %v4532_v59 = vld [vmem:[#allocation13 + $0x4c8] sm:$0xff] }
 0xbe7   : > { %7997 = vmatprep.subr.mxu0 %v3974_v61  ;;  %8029 = vmatprep.subr.mxu1 %v4331_v62  ;;  %v4701_v60 = vld [vmem:[#allocation13 + $0x548] sm:$0xff] }
 0xbe8   : > { %7998 = vmatpush3.msra.mxu0 %v3974_v61  ;;  %8030 = vmatpush3.msra.mxu1 %v4331_v62  ;;  %v4531_v61 = vld [vmem:[#allocation13 + $0x4c0] sm:$0xff] }
 0xbe9   : > { %7999 = vmatprep.subr.mxu0 %v3973_v63  ;;  %8031 = vmatprep.subr.mxu1 %v4330_v0  ;;  %v4700_v62 = vld [vmem:[#allocation13 + $0x540] sm:$0xff] }
 0xbea   : > { %8000 = vmatpush3.msra.mxu0 %v3973_v63  ;;  %8032 = vmatpush3.msra.mxu1 %v4330_v0  ;;  %v4530_v63 = vld [vmem:[#allocation13 + $0x4b8] sm:$0xff] }
 0xbeb   : > { %8001 = vmatprep.subr.mxu0 %v3972_v1  ;;  %8033 = vmatprep.subr.mxu1 %v4329_v2  ;;  %v4699_v0 = vld [vmem:[#allocation13 + $0x538] sm:$0xff] }
 0xbec   : > { %8002 = vmatpush3.msra.mxu0 %v3972_v1  ;;  %8034 = vmatpush3.msra.mxu1 %v4329_v2  ;;  %v4529_v1 = vld [vmem:[#allocation13 + $0x4b0] sm:$0xff] }
 0xbed   : > { %8003 = vmatprep.subr.mxu0 %v3971_v6  ;;  %8035 = vmatprep.subr.mxu1 %v4328_v7  ;;  %v4698_v2 = vld [vmem:[#allocation13 + $0x530] sm:$0xff] }
 0xbee   : > { %8004 = vmatpush3.msra.mxu0 %v3971_v6  ;;  %8036 = vmatpush3.msra.mxu1 %v4328_v7  ;;  %v4528_v6 = vld [vmem:[#allocation13 + $0x4a8] sm:$0xff] }
 0xbef   : > { %8005 = vmatprep.subr.mxu0 %v3970_v8  ;;  %8037 = vmatprep.subr.mxu1 %v4327_v17  ;;  %v4697_v7 = vld [vmem:[#allocation13 + $0x528] sm:$0xff] }
 0xbf0   : > { %8006 = vmatpush3.msra.mxu0 %v3970_v8  ;;  %8038 = vmatpush3.msra.mxu1 %v4327_v17  ;;  %v4527_v8 = vld [vmem:[#allocation13 + $0x4a0] sm:$0xff] }
 0xbf1   : > { %8007 = vmatprep.subr.mxu0 %v3969_v9  ;;  %8039 = vmatprep.subr.mxu1 %v4326_v10  ;;  %v4696_v17 = vld [vmem:[#allocation13 + $0x520] sm:$0xff] }
 0xbf2   : > { %8008 = vmatpush3.msra.mxu0 %v3969_v9  ;;  %8040 = vmatpush3.msra.mxu1 %v4326_v10  ;;  %v4526_v9 = vld [vmem:[#allocation13 + $0x498] sm:$0xff] }
 0xbf3   : > { %8009 = vmatprep.subr.mxu0 %v3968_v11  ;;  %8041 = vmatprep.subr.mxu1 %v4325_v13  ;;  %v4695_v10 = vld [vmem:[#allocation13 + $0x518] sm:$0xff] }
 0xbf4   : > { %8010 = vmatpush3.msra.mxu0 %v3968_v11  ;;  %8042 = vmatpush3.msra.mxu1 %v4325_v13  ;;  %v4525_v11 = vld [vmem:[#allocation13 + $0x490] sm:$0xff] }
 0xbf5   : > { %8012 = vmatmul.mubr.f32.vlgmr.msra.gmra.mxu0 %v9422_v40  ;;  %8043 = vmatprep.subr.mxu1 %v4324_v14  ;;  %v6419_v40 = vld [vmem:[#allocation10 + $0xb] ss:$0 sm:$0xff]  ;;  %v4694_v13 = vld [vmem:[#allocation13 + $0x510] sm:$0xff] }
 0xbf6   : > { %8060 = vmatprep.mubr.msk.f32.mxu0 %vm653_vm0, %v9357_v35  ;;  %8044 = vmatpush3.msra.mxu1 %v4324_v14  ;;  %v4524_v14 = vld [vmem:[#allocation13 + $0x488] sm:$0xff] }
 0xbf7   : > { %8045 = vmatprep.subr.mxu1 %v4323_v15 }
 0xbf8   : > { %8046 = vmatpush3.msra.mxu1 %v4323_v15  ;;  %v4693_v15 = vld [vmem:[#allocation13 + $0x508] sm:$0xff] }
 0xbf9   : > { %8047 = vmatprep.subr.mxu1 %v4322_v16 }
 0xbfa   : > { %8048 = vmatpush3.msra.mxu1 %v4322_v16  ;;  %v4523_v16 = vld [vmem:[#allocation13 + $0x480] sm:$0xff] }
 0xbfb   : > { %8049 = vmatprep.subr.mxu1 %v4321_v18 }
 0xbfc   : > { %8050 = vmatpush3.msra.mxu1 %v4321_v18  ;;  %v4692_v18 = vld [vmem:[#allocation13 + $0x500] sm:$0xff] }
 0xbfd   : > { %8051 = vmatprep.subr.mxu1 %v4320_v19 }
 0xbfe   : > { %8052 = vmatpush3.msra.mxu1 %v4320_v19 }
 0xc95   : > { %v7929_v20 = vpop.f32.mrf.mxu0 }
 0xc96   : > { %v9433_v35 = vadd.f32 %v7929_v20, %v9417_v34 }
 0xc97   : > { %v3872_v21 = vpop.f32.mrf.mxu0 }
 0xc98   : > { %v9436_v22 = vadd.f32 %v3872_v21, %v9420_v38 }
 0xc99   : > { %v7978_v23 = vpop.f32.mrf.mxu1 }
 0xc9b   : > { %v4151_v24 = vpop.f32.mrf.mxu1 }
 0xc9e   : > { %v8020_v50 = vpop.f32.mrf.mxu1 }
 0xca0   : > { %v4310_v28 = vpop.f32.mrf.mxu1 }
 0xca1   : > { %8053 = vmatprep.mubr.f32.mxu1 %v4310_v28  ;;  %v5056_v28 = vld [vmem:[#allocation7 + $0xd0] sm:$0xff] }
 0xca2   : > { %8054 = vmatmul.mubr.f32.vlgmr.msra.gmra.mxu1 %v8020_v50  ;;  %v4956_v50 = vld [vmem:[#allocation7 + $0xc8] sm:$0xff] }
 0xca3   : > { %8102 = vmatprep.mubr.msk.f32.mxu1 %vm653_vm0, %v9367_v51 }
 0xcb5   : > { %v8013_v53 = vpop.f32.mrf.mxu0 }
 0xcb6   : > { %v4232_v30 = vadd.f32 %v8013_v53, %v7978_v23  ;;  %v4876_v53 = vld [vmem:[#allocation13 + $0x5f8] sm:$0xff] }
 0xcb7   : > { %v4226_v29 = vpop.f32.mrf.mxu0 }
 0xcb8   : > { %v4227_v33 = vadd.f32 %v4226_v29, %v4151_v24  ;;  %v4955_v24 = vld [vmem:[#allocation7 + $0xc0] sm:$0xff]  ;;  %v5057_v29 = vld [vmem:[#allocation7 + $0xd8] sm:$0xff] }
 0xd62   : > { %v8055_v31 = vpop.f32.mrf.mxu1 }
 0xd63   : > { %v4412_v34 = vadd.f32 %v8055_v31, %v4232_v30  ;;  %v4875_v30 = vld [vmem:[#allocation13 + $0x5f0] sm:$0xff]  ;;  %v4872_v31 = vld [vmem:[#allocation13 + $0x5d8] sm:$0xff] }
 0xd64   : > { %v4402_v37 = vpop.f32.mrf.mxu1 }
 0xd65   : > { %v4422_v38 = vmul.f32 %v6417_v32, %v4412_v34  ;;  %v4411_v39 = vadd.f32 %v4402_v37, %v4227_v33  ;;  %v4870_v33 = vld [vmem:[#allocation13 + $0x5c8] sm:$0xff]  ;;  %v4869_v34 = vld [vmem:[#allocation13 + $0x5c0] sm:$0xff]  ;;  %v4867_v37 = vld [vmem:[#allocation13 + $0x5b0] sm:$0xff] }
 0xd67   : > { %v4432_v41 = vadd.f32 %v6418_v36, %v4422_v38  ;;  %v4421_v26 = vmul.f32 %v6417_v32, %v4411_v39  ;;  %v4871_v32 = vld [vmem:[#allocation13 + $0x5d0] sm:$0xff]  ;;  %v4866_v38 = vld [vmem:[#allocation13 + $0x5a8] sm:$0xff]  ;;  %v4865_v39 = vld [vmem:[#allocation13 + $0x5a0] sm:$0xff] }
 0xd69   : > { %vm4434_vm9 = vcmp.ge.f32.partialorder %v4432_v41, 0.0  ;;  %v4444_v42 = vmul.f32 %v6419_v40, %v4432_v41  ;;  %v4431_v44 = vadd.f32 %v6418_v36, %v4421_v26  ;;  %v4868_v36 = vld [vmem:[#allocation13 + $0x5b8] sm:$0xff]  ;;  %v4863_v26 = vld [vmem:[#allocation13 + $0x590] sm:$0xff] }
 0xd6b   : > { %vm4433_vm10 = vcmp.ge.f32.partialorder %v4431_v44, 0.0  ;;  %v4443_v43 = vmul.f32 %v6419_v40, %v4431_v44  ;;  %v9440_v51 = vsel %vm4434_vm9, %v4432_v41, %v4444_v42  ;;  %v4864_v40 = vld [vmem:[#allocation13 + $0x598] sm:$0xff]  ;;  %v5053_v42 = vld [vmem:[#allocation8 + $0x670] sm:$0xff] }
 0xd6c   : > { %8056 = vmatprep.subr.mxu0 %v9440_v51  ;;  %8098 = vmatprep.subr.mxu1 %v9440_v51  ;;  %v5054_v41 = vld [vmem:[#allocation8 + $0x678] sm:$0xff] }
 0xd6d   : > { %8057 = vmatpush3.msra.mxu0 %v9440_v51  ;;  %8099 = vmatpush3.msra.mxu1 %v9440_v51  ;;  %v9446_v46 = vsel %vm4433_vm10, %v4431_v44, %v4443_v43  ;;  %v4862_v44 = vld [vmem:[#allocation13 + $0x588] sm:$0xff] }
 0xd6e   : > { %8058 = vmatprep.subr.mxu0 %v9446_v46  ;;  %8100 = vmatprep.subr.mxu1 %v9446_v46  ;;  %v5052_v43 = vld [vmem:[#allocation8 + $0x668] sm:$0xff] }
 0xd6f   : > { %8059 = vmatpush3.msra.mxu0 %v9446_v46  ;;  %8101 = vmatpush3.msra.mxu1 %v9446_v46 }
 0xd70   : > { %8061 = vmatmul.mubr.msk.f32.vlgmr.msra.gmra.mxu0 %vm653_vm0, %v9383_v3  ;;  %8063 = vmatprep.subr.mxu0 %v4538_v45  ;;  %v4534_v3 = vld [vmem:[#allocation13 + $0x4d8] sm:$0xff] }
 0xd71   : > { %8103 = vmatmul.mubr.msk.f32.vlgmr.msra.gmra.mxu1 %vm653_vm0, %v9387_v12  ;;  %8105 = vmatprep.subr.mxu1 %v4707_v47  ;;  %v4533_v12 = vld [vmem:[#allocation13 + $0x4d0] sm:$0xff] }
 0xd72   : > { %8064 = vmatpush3.msra.mxu0 %v4538_v45  ;;  %8106 = vmatpush3.msra.mxu1 %v4707_v47  ;;  %v5050_v45 = vld [vmem:[#allocation8 + $0x658] sm:$0xff] }
 0xd73   : > { %8065 = vmatprep.subr.mxu0 %v4537_v48  ;;  %8107 = vmatprep.subr.mxu1 %v4706_v49  ;;  %v5155_v47 = vld [vmem:[#allocation8 + $0x6f8] sm:$0xff] }
 0xd74   : > { %8066 = vmatpush3.msra.mxu0 %v4537_v48  ;;  %8108 = vmatpush3.msra.mxu1 %v4706_v49  ;;  %v5049_v48 = vld [vmem:[#allocation8 + $0x650] sm:$0xff]  ;;  %v5048_v49 = vld [vmem:[#allocation8 + $0x648] sm:$0xff] }
 0xd75   : > { %8067 = vmatprep.subr.mxu0 %v4536_v25  ;;  %8109 = vmatprep.subr.mxu1 %v4705_v27 }
 0xd76   : > { %8068 = vmatpush3.msra.mxu0 %v4536_v25  ;;  %8110 = vmatpush3.msra.mxu1 %v4705_v27  ;;  %v5047_v25 = vld [vmem:[#allocation8 + $0x640] sm:$0xff]  ;;  %v5046_v27 = vld [vmem:[#allocation8 + $0x638] sm:$0xff] }
 0xd77   : > { %8069 = vmatprep.subr.mxu0 %v4535_v54  ;;  %8111 = vmatprep.subr.mxu1 %v4704_v56 }
 0xd78   : > { %8070 = vmatpush3.msra.mxu0 %v4535_v54  ;;  %8112 = vmatpush3.msra.mxu1 %v4704_v56  ;;  %v5045_v54 = vld [vmem:[#allocation8 + $0x630] sm:$0xff]  ;;  %v5044_v56 = vld [vmem:[#allocation8 + $0x628] sm:$0xff] }
 0xd79   : > { %8071 = vmatprep.subr.mxu0 %v4534_v3  ;;  %8113 = vmatprep.subr.mxu1 %v4703_v57 }
 0xd7a   : > { %8072 = vmatpush3.msra.mxu0 %v4534_v3  ;;  %8114 = vmatpush3.msra.mxu1 %v4703_v57  ;;  %v5043_v3 = vld [vmem:[#allocation8 + $0x620] sm:$0xff]  ;;  %v5042_v57 = vld [vmem:[#allocation8 + $0x618] sm:$0xff] }
 0xd7b   : > { %8073 = vmatprep.subr.mxu0 %v4533_v12  ;;  %8115 = vmatprep.subr.mxu1 %v4702_v58 }
 0xd7c   : > { %8074 = vmatpush3.msra.mxu0 %v4533_v12  ;;  %8116 = vmatpush3.msra.mxu1 %v4702_v58  ;;  %v5041_v12 = vld [vmem:[#allocation8 + $0x610] sm:$0xff]  ;;  %v5040_v58 = vld [vmem:[#allocation8 + $0x608] sm:$0xff] }
 0xd7d   : > { %8075 = vmatprep.subr.mxu0 %v4532_v59  ;;  %8117 = vmatprep.subr.mxu1 %v4701_v60 }
 0xd7e   : > { %8076 = vmatpush3.msra.mxu0 %v4532_v59  ;;  %8118 = vmatpush3.msra.mxu1 %v4701_v60  ;;  %v5039_v59 = vld [vmem:[#allocation8 + $0x600] sm:$0xff] }
 0xd7f   : > { %8077 = vmatprep.subr.mxu0 %v4531_v61  ;;  %8119 = vmatprep.subr.mxu1 %v4700_v62 }
 0xd80   : > { %8078 = vmatpush3.msra.mxu0 %v4531_v61  ;;  %8120 = vmatpush3.msra.mxu1 %v4700_v62 }
 0xd81   : > { %8079 = vmatprep.subr.mxu0 %v4530_v63  ;;  %8121 = vmatprep.subr.mxu1 %v4699_v0 }
 0xd82   : > { %8080 = vmatpush3.msra.mxu0 %v4530_v63  ;;  %8122 = vmatpush3.msra.mxu1 %v4699_v0 }
 0xd83   : > { %8081 = vmatprep.subr.mxu0 %v4529_v1  ;;  %8123 = vmatprep.subr.mxu1 %v4698_v2 }
 0xd84   : > { %8082 = vmatpush3.msra.mxu0 %v4529_v1  ;;  %8124 = vmatpush3.msra.mxu1 %v4698_v2 }
 0xd85   : > { %8083 = vmatprep.subr.mxu0 %v4528_v6  ;;  %8125 = vmatprep.subr.mxu1 %v4697_v7 }
 0xd86   : > { %8084 = vmatpush3.msra.mxu0 %v4528_v6  ;;  %8126 = vmatpush3.msra.mxu1 %v4697_v7 }
 0xd87   : > { %8085 = vmatprep.subr.mxu0 %v4527_v8  ;;  %8127 = vmatprep.subr.mxu1 %v4696_v17 }
 0xd88   : > { %8086 = vmatpush3.msra.mxu0 %v4527_v8  ;;  %8128 = vmatpush3.msra.mxu1 %v4696_v17 }
 0xd89   : > { %8087 = vmatprep.subr.mxu0 %v4526_v9  ;;  %8129 = vmatprep.subr.mxu1 %v4695_v10 }
 0xd8a   : > { %8088 = vmatpush3.msra.mxu0 %v4526_v9  ;;  %8130 = vmatpush3.msra.mxu1 %v4695_v10  ;;  %v5154_v10 = vld [vmem:[#allocation8 + $0x6f0] sm:$0xff] }
 0xd8b   : > { %8089 = vmatprep.subr.mxu0 %v4525_v11  ;;  %8131 = vmatprep.subr.mxu1 %v4694_v13 }
 0xd8c   : > { %8090 = vmatpush3.msra.mxu0 %v4525_v11  ;;  %8132 = vmatpush3.msra.mxu1 %v4694_v13 }
 0xd8d   : > { %8091 = vmatprep.subr.mxu0 %v4524_v14  ;;  %8133 = vmatprep.subr.mxu1 %v4693_v15 }
 0xd8e   : > { %8092 = vmatpush3.msra.mxu0 %v4524_v14  ;;  %8134 = vmatpush3.msra.mxu1 %v4693_v15  ;;  %v5151_v14 = vld [vmem:[#allocation8 + $0x6d8] sm:$0xff]  ;;  %v5150_v15 = vld [vmem:[#allocation8 + $0x6d0] sm:$0xff] }
 0xd8f   : > { %8093 = vmatprep.subr.mxu0 %v4523_v16  ;;  %8135 = vmatprep.subr.mxu1 %v4692_v18 }
 0xd90   : > { %8094 = vmatpush3.msra.mxu0 %v4523_v16  ;;  %8136 = vmatpush3.msra.mxu1 %v4692_v18  ;;  %v5149_v16 = vld [vmem:[#allocation8 + $0x6c8] sm:$0xff]  ;;  %v5148_v18 = vld [vmem:[#allocation8 + $0x6c0] sm:$0xff] }
 0xd91   : > { %8140 = vmatprep.subr.mxu0 %v9440_v51  ;;  %8182 = vmatprep.subr.mxu1 %v9210_v4 }
 0xe30   : > { %v8062_v19 = vpop.f32.mrf.mxu0 }
 0xe31   : > { %v8104_v20 = vpop.f32.mrf.mxu1 }
 0xe32   : > { %v4513_v21 = vpop.f32.mrf.mxu0 }
 0xe33   : > { %v4682_v23 = vpop.f32.mrf.mxu1  ;;  %8095 = vmatprep.mubr.f32.mxu0 %v4513_v21  ;;  %v5145_v21 = vld [vmem:[#allocation8 + $0x6a8] sm:$0xff] }
 0xe34   : > { %8137 = vmatprep.mubr.f32.mxu1 %v4682_v23  ;;  %8096 = vmatmul.mubr.f32.vlgmr.msra.gmra.mxu0 %v8062_v19  ;;  %v5147_v19 = vld [vmem:[#allocation8 + $0x6b8] sm:$0xff]  ;;  %v5144_v23 = vld [vmem:[#allocation8 + $0x6a0] sm:$0xff] }
 0xe35   : > { %8138 = vmatmul.mubr.f32.vlgmr.msra.gmra.mxu1 %v8104_v20  ;;  %8141 = vmatpush3.msra.mxu0 %v9440_v51  ;;  %v4861_v51 = vld [vmem:[#allocation13 + $0x580] sm:$0xff]  ;;  %v5146_v20 = vld [vmem:[#allocation8 + $0x6b0] sm:$0xff] }
 0xe36   : > { %8183 = vmatpush3.msra.mxu1 %v9210_v4  ;;  %8142 = vmatprep.subr.mxu0 %v9446_v46 }
 0xe37   : > { %8184 = vmatprep.subr.mxu1 %v9214_v5  ;;  %8143 = vmatpush3.msra.mxu0 %v9446_v46  ;;  %v5051_v46 = vld [vmem:[#allocation8 + $0x660] sm:$0xff] }
 0xe38   : > { %8185 = vmatpush3.msra.mxu1 %v9214_v5  ;;  %8144 = vmatprep.mubr.msk.f32.mxu0 %vm653_vm0, %v9399_v52  ;;  %v4874_v52 = vld [vmem:[#allocation13 + $0x5e8] sm:$0xff] }
 0xe39   : > { %8186 = vmatprep.mubr.msk.f32.mxu1 %vm653_vm0, %v4955_v24  ;;  %8189 = vmatprep.subr.mxu1 %v9210_v4  ;;  %v5143_v24 = vld [vmem:[#allocation8 + $0x698] sm:$0xff] }
 0xe3a   : > { %8145 = vmatmul.mubr.msk.f32.vlgmr.msra.gmra.mxu0 %vm653_vm0, %v9405_v55  ;;  %8187 = vmatmul.mubr.msk.f32.vlgmr.msra.gmra.mxu1 %vm653_vm0, %v4956_v50  ;;  %v4873_v55 = vld [vmem:[#allocation13 + $0x5e0] sm:$0xff]  ;;  %v5142_v50 = vld [vmem:[#allocation8 + $0x690] sm:$0xff] }
 0xe3b   : > { %8190 = vmatpush3.msra.mxu1 %v9210_v4  ;;  %8193 = vmatprep.mubr.msk.f32.mxu1 %vm653_vm0, %v5056_v28  ;;  %v5141_v28 = vld [vmem:[#allocation8 + $0x688] sm:$0xff] }
 0xe3c   : > { %8191 = vmatprep.subr.mxu1 %v9214_v5  ;;  %8147 = vmatprep.subr.mxu0 %v4876_v53 }
 0xe3d   : > { %8192 = vmatpush3.msra.mxu1 %v9214_v5  ;;  %8148 = vmatpush3.msra.mxu0 %v4876_v53  ;;  %v5140_v53 = vld [vmem:[#allocation8 + $0x680] sm:$0xff] }
 0xe3e   : > { %8194 = vmatmul.mubr.msk.f32.vlgmr.msra.gmra.mxu1 %vm653_vm0, %v5057_v29  ;;  %8149 = vmatprep.subr.mxu0 %v4875_v30  ;;  %v5307_v29 = vld [vmem:[#allocation7 + $0xe0] sm:$0xff] }
 0xe3f   : > { %8150 = vmatpush3.msra.mxu0 %v4875_v30  ;;  %8231 = vmatprep.subr.mxu1 %v5054_v41  ;;  %v5308_v30 = vld [vmem:[#allocation7 + $0xe8] sm:$0xff] }
 0xe40   : > { %8151 = vmatprep.subr.mxu0 %v4874_v52  ;;  %8232 = vmatpush3.msra.mxu1 %v5054_v41  ;;  %v5394_v41 = vld [vmem:[#allocation8 + $0x718] sm:$0xff] }
 0xe41   : > { %8152 = vmatpush3.msra.mxu0 %v4874_v52  ;;  %8233 = vmatprep.subr.mxu1 %v5053_v42  ;;  %v8599_v52 = vld [vmem:[#allocation11] sm:$0xff] }
 0xe42   : > { %8153 = vmatprep.subr.mxu0 %v4873_v55  ;;  %8234 = vmatpush3.msra.mxu1 %v5053_v42  ;;  %v5392_v42 = vld [vmem:[#allocation8 + $0x708] sm:$0xff] }
 0xe43   : > { %8154 = vmatpush3.msra.mxu0 %v4873_v55  ;;  %8235 = vmatprep.subr.mxu1 %v5052_v43  ;;  %v5406_v55 = vld [vmem:[#allocation8 + $0x778] sm:$0xff] }
 0xe44   : > { %8155 = vmatprep.subr.mxu0 %v4872_v31  ;;  %8236 = vmatpush3.msra.mxu1 %v5052_v43 }
 0xe45   : > { %8156 = vmatpush3.msra.mxu0 %v4872_v31  ;;  %8237 = vmatprep.subr.mxu1 %v5051_v46  ;;  %v5405_v31 = vld [vmem:[#allocation8 + $0x770] sm:$0xff] }
 0xe46   : > { %8157 = vmatprep.subr.mxu0 %v4871_v32  ;;  %8238 = vmatpush3.msra.mxu1 %v5051_v46 }
 0xe47   : > { %8158 = vmatpush3.msra.mxu0 %v4871_v32  ;;  %8239 = vmatprep.subr.mxu1 %v5050_v45  ;;  %v5404_v32 = vld [vmem:[#allocation8 + $0x768] sm:$0xff] }
 0xe48   : > { %8159 = vmatprep.subr.mxu0 %v4870_v33  ;;  %8240 = vmatpush3.msra.mxu1 %v5050_v45 }
 0xe49   : > { %8160 = vmatpush3.msra.mxu0 %v4870_v33  ;;  %8241 = vmatprep.subr.mxu1 %v5049_v48  ;;  %v5402_v33 = vld [vmem:[#allocation8 + $0x758] sm:$0xff] }
 0xe4a   : > { %8161 = vmatprep.subr.mxu0 %v4869_v34  ;;  %8242 = vmatpush3.msra.mxu1 %v5049_v48 }
 0xe4b   : > { %8162 = vmatpush3.msra.mxu0 %v4869_v34  ;;  %8243 = vmatprep.subr.mxu1 %v5048_v49  ;;  %v5401_v34 = vld [vmem:[#allocation8 + $0x750] sm:$0xff] }
 0xe4c   : > { %8163 = vmatprep.subr.mxu0 %v4868_v36  ;;  %8244 = vmatpush3.msra.mxu1 %v5048_v49 }
 0xe4d   : > { %8164 = vmatpush3.msra.mxu0 %v4868_v36  ;;  %8245 = vmatprep.subr.mxu1 %v5047_v25  ;;  %v5399_v36 = vld [vmem:[#allocation8 + $0x740] sm:$0xff] }
 0xe4e   : > { %8165 = vmatprep.subr.mxu0 %v4867_v37  ;;  %8246 = vmatpush3.msra.mxu1 %v5047_v25 }
 0xe4f   : > { %8166 = vmatpush3.msra.mxu0 %v4867_v37  ;;  %8247 = vmatprep.subr.mxu1 %v5046_v27  ;;  %v5398_v37 = vld [vmem:[#allocation8 + $0x738] sm:$0xff] }
 0xe50   : > { %8167 = vmatprep.subr.mxu0 %v4866_v38  ;;  %8248 = vmatpush3.msra.mxu1 %v5046_v27  ;;  %v8600_v27 = vld [vmem:[#allocation11 + $0x10] sm:$0xff] }
 0xe51   : > { %8168 = vmatpush3.msra.mxu0 %v4866_v38  ;;  %8249 = vmatprep.subr.mxu1 %v5045_v54  ;;  %v5397_v38 = vld [vmem:[#allocation8 + $0x730] sm:$0xff] }
 0xe52   : > { %8169 = vmatprep.subr.mxu0 %v4865_v39  ;;  %8250 = vmatpush3.msra.mxu1 %v5045_v54 }
 0xe53   : > { %8170 = vmatpush3.msra.mxu0 %v4865_v39  ;;  %8251 = vmatprep.subr.mxu1 %v5044_v56  ;;  %v5396_v39 = vld [vmem:[#allocation8 + $0x728] sm:$0xff] }
 0xe54   : > { %8171 = vmatprep.subr.mxu0 %v4864_v40  ;;  %8252 = vmatpush3.msra.mxu1 %v5044_v56 }
 0xe55   : > { %8172 = vmatpush3.msra.mxu0 %v4864_v40  ;;  %8253 = vmatprep.subr.mxu1 %v5043_v3  ;;  %v5395_v40 = vld [vmem:[#allocation8 + $0x720] sm:$0xff] }
 0xe56   : > { %8173 = vmatprep.subr.mxu0 %v4863_v26  ;;  %8254 = vmatpush3.msra.mxu1 %v5043_v3 }
 0xe57   : > { %8174 = vmatpush3.msra.mxu0 %v4863_v26  ;;  %8255 = vmatprep.subr.mxu1 %v5042_v57  ;;  %v5393_v26 = vld [vmem:[#allocation8 + $0x710] sm:$0xff] }
 0xe58   : > { %8175 = vmatprep.subr.mxu0 %v4862_v44  ;;  %8256 = vmatpush3.msra.mxu1 %v5042_v57 }
 0xe59   : > { %8176 = vmatpush3.msra.mxu0 %v4862_v44  ;;  %8257 = vmatprep.subr.mxu1 %v5041_v12  ;;  %v5391_v44 = vld [vmem:[#allocation8 + $0x700] sm:$0xff] }
 0xe5a   : > { %8177 = vmatprep.subr.mxu0 %v4861_v51  ;;  %8258 = vmatpush3.msra.mxu1 %v5041_v12  ;;  %v6432_v12 = vld [vmem:[#allocation10 + $0xc] ss:$0 sm:$0xff] }
 0xe5b   : > { %8178 = vmatpush3.msra.mxu0 %v4861_v51  ;;  %8259 = vmatprep.subr.mxu1 %v5040_v58 }
 0xe5c   : > { %8196 = vmatprep.subr.mxu0 %v5155_v47  ;;  %8260 = vmatpush3.msra.mxu1 %v5040_v58 }
 0xe5d   : > { %8261 = vmatprep.subr.mxu1 %v5039_v59 }
 0xe5e   : > { %8262 = vmatpush3.msra.mxu1 %v5039_v59 }
 0xe5f   : > { %8273 = vmatprep.subr.mxu1 %v5406_v55 }
 0xef4   : > { %v8097_v60 = vpop.f32.mrf.mxu0 }
 0xef5   : > { %v4615_v61 = vadd.f32 %v8097_v60, %v9433_v35  ;;  %v8139_v62 = vpop.f32.mrf.mxu1  ;;  %v5153_v35 = vld [vmem:[#allocation8 + $0x6e8] sm:$0xff] }
 0xef6   : > { %v4605_v63 = vpop.f32.mrf.mxu0  ;;  %v6433_v60 = vld [vmem:[#allocation10 + $0xd] ss:$0 sm:$0xff] }
 0xef7   : > { %v4614_v0 = vadd.f32 %v4605_v63, %v9436_v22  ;;  %v9478_v1 = vadd.f32 %v8139_v62, %v4615_v61  ;;  %v4774_v2 = vpop.f32.mrf.mxu1  ;;  %v5152_v22 = vld [vmem:[#allocation8 + $0x6e0] sm:$0xff] }
 0xef9   : > { %v9480_v6 = vadd.f32 %v4774_v2, %v4614_v0  ;;  %v6434_v0 = vld [vmem:[#allocation10 + $0xe] ss:$0 sm:$0xff] }
 0xefa   : > { %v8146_v7 = vpop.f32.mrf.mxu0  ;;  %v8188_v8 = vpop.f32.mrf.mxu1 }
 0xefc   : > { %v4851_v17 = vpop.f32.mrf.mxu0  ;;  %v5029_v9 = vpop.f32.mrf.mxu1 }
 0xefd   : > { %8179 = vmatprep.mubr.f32.mxu0 %v4851_v17  ;;  %8263 = vmatprep.mubr.f32.mxu1 %v5029_v9 }
 0xefe   : > { %8180 = vmatmul.mubr.f32.vlgmr.msra.gmra.mxu0 %v8146_v7  ;;  %8264 = vmatmul.mubr.f32.vlgmr.msra.gmra.mxu1 %v8188_v8  ;;  %v8195_v11 = vpop.f32.mrf.mxu1 }
 0xeff   : > { %8197 = vmatpush3.msra.mxu0 %v5155_v47  ;;  %8274 = vmatpush3.msra.mxu1 %v5406_v55  ;;  %v5770_v55 = vld [vmem:[#allocation13 + $0x6b8] sm:$0xff] }
 0xf00   : > { %8198 = vmatprep.subr.mxu0 %v5154_v10  ;;  %v5130_v13 = vpop.f32.mrf.mxu1  ;;  %8275 = vmatprep.subr.mxu1 %v5405_v31 }
 0xf01   : > { %8199 = vmatpush3.msra.mxu0 %v5154_v10  ;;  %8228 = vmatprep.mubr.f32.mxu0 %v5130_v13  ;;  %v5609_v10 = vld [vmem:[#allocation13 + $0x678] sm:$0xff] }
 0xf02   : > { %8200 = vmatprep.subr.mxu0 %v5153_v35  ;;  %8276 = vmatpush3.msra.mxu1 %v5405_v31  ;;  %v8601_v13 = vld [vmem:[#allocation11 + $0x8] sm:$0xff]  ;;  %v5599_v31 = vld [vmem:[#allocation13 + $0x628] sm:$0xff] }
 0xf03   : > { %8201 = vmatpush3.msra.mxu0 %v5153_v35  ;;  %8277 = vmatprep.subr.mxu1 %v5404_v32  ;;  %v5778_v35 = vld [vmem:[#allocation13 + $0x6f8] sm:$0xff] }
 0xf04   : > { %8202 = vmatprep.subr.mxu0 %v5152_v22  ;;  %8278 = vmatpush3.msra.mxu1 %v5404_v32  ;;  %v5769_v32 = vld [vmem:[#allocation13 + $0x6b0] sm:$0xff] }
 0xf05   : > { %8203 = vmatpush3.msra.mxu0 %v5152_v22  ;;  %v8602_v22 = vld [vmem:[#allocation11 + $0x18] sm:$0xff] }
 0xf06   : > { %8204 = vmatprep.subr.mxu0 %v5151_v14 }
 0xf07   : > { %8205 = vmatpush3.msra.mxu0 %v5151_v14  ;;  %v5607_v14 = vld [vmem:[#allocation13 + $0x668] sm:$0xff] }
 0xf08   : > { %8206 = vmatprep.subr.mxu0 %v5150_v15 }
 0xf09   : > { %8207 = vmatpush3.msra.mxu0 %v5150_v15  ;;  %v5777_v15 = vld [vmem:[#allocation13 + $0x6f0] sm:$0xff] }
 0xf0a   : > { %8208 = vmatprep.subr.mxu0 %v5149_v16 }
 0xf0b   : > { %8209 = vmatpush3.msra.mxu0 %v5149_v16  ;;  %v5606_v16 = vld [vmem:[#allocation13 + $0x660] sm:$0xff] }
 0xf0c   : > { %8210 = vmatprep.subr.mxu0 %v5148_v18 }
 0xf0d   : > { %8211 = vmatpush3.msra.mxu0 %v5148_v18  ;;  %v5776_v18 = vld [vmem:[#allocation13 + $0x6e8] sm:$0xff] }
 0xf0e   : > { %8212 = vmatprep.subr.mxu0 %v5147_v19 }
 0xf0f   : > { %8213 = vmatpush3.msra.mxu0 %v5147_v19  ;;  %v5605_v19 = vld [vmem:[#allocation13 + $0x658] sm:$0xff] }
 0xf10   : > { %8214 = vmatprep.subr.mxu0 %v5146_v20 }
 0xf11   : > { %8215 = vmatpush3.msra.mxu0 %v5146_v20  ;;  %v5775_v20 = vld [vmem:[#allocation13 + $0x6e0] sm:$0xff] }
 0xf12   : > { %8216 = vmatprep.subr.mxu0 %v5145_v21 }
 0xf13   : > { %8217 = vmatpush3.msra.mxu0 %v5145_v21  ;;  %v5604_v21 = vld [vmem:[#allocation13 + $0x650] sm:$0xff] }
 0xf14   : > { %8218 = vmatprep.subr.mxu0 %v5144_v23 }
 0xf15   : > { %8219 = vmatpush3.msra.mxu0 %v5144_v23  ;;  %v5774_v23 = vld [vmem:[#allocation13 + $0x6d8] sm:$0xff] }
 0xf16   : > { %8220 = vmatprep.subr.mxu0 %v5143_v24 }
 0xf17   : > { %8221 = vmatpush3.msra.mxu0 %v5143_v24  ;;  %v5603_v24 = vld [vmem:[#allocation13 + $0x648] sm:$0xff] }
 0xf18   : > { %8222 = vmatprep.subr.mxu0 %v5142_v50 }
 0xf19   : > { %8223 = vmatpush3.msra.mxu0 %v5142_v50  ;;  %v5773_v50 = vld [vmem:[#allocation13 + $0x6d0] sm:$0xff] }
 0xf1a   : > { %8224 = vmatprep.subr.mxu0 %v5141_v28 }
 0xf1b   : > { %8225 = vmatpush3.msra.mxu0 %v5141_v28  ;;  %v5602_v28 = vld [vmem:[#allocation13 + $0x640] sm:$0xff] }
 0xf1c   : > { %8226 = vmatprep.subr.mxu0 %v5140_v53 }
 0xf1d   : > { %8227 = vmatpush3.msra.mxu0 %v5140_v53  ;;  %v5772_v53 = vld [vmem:[#allocation13 + $0x6c8] sm:$0xff] }
 0xf1e   : > { %8229 = vmatmul.mubr.f32.vlgmr.msra.gmra.mxu0 %v8195_v11  ;;  %8266 = vmatprep.subr.mxu0 %v9210_v4  ;;  %v5608_v11 = vld [vmem:[#allocation13 + $0x670] sm:$0xff] }
 0xf1f   : > { %8267 = vmatpush3.msra.mxu0 %v9210_v4  ;;  %8270 = vmatprep.mubr.msk.f32.mxu0 %vm653_vm0, %v5307_v29  ;;  %v5403_v4 = vld [vmem:[#allocation8 + $0x760] sm:$0xff]  ;;  %v5601_v29 = vld [vmem:[#allocation13 + $0x638] sm:$0xff] }
 0xf20   : > { %8268 = vmatprep.subr.mxu0 %v9214_v5  ;;  %8279 = vmatprep.subr.mxu1 %v5403_v4 }
 0xf21   : > { %8269 = vmatpush3.msra.mxu0 %v9214_v5  ;;  %8280 = vmatpush3.msra.mxu1 %v5403_v4  ;;  %v5400_v5 = vld [vmem:[#allocation8 + $0x748] sm:$0xff]  ;;  %v5598_v4 = vld [vmem:[#allocation13 + $0x620] sm:$0xff] }
 0xf22   : > { %8271 = vmatmul.mubr.msk.f32.vlgmr.msra.gmra.mxu0 %vm653_vm0, %v5308_v30  ;;  %8281 = vmatprep.subr.mxu1 %v5402_v33  ;;  %v5771_v30 = vld [vmem:[#allocation13 + $0x6c0] sm:$0xff] }
 0xf23   : > { %8312 = vmatprep.mubr.msk.f32.mxu0 %vm653_vm0, %v8599_v52  ;;  %8282 = vmatpush3.msra.mxu1 %v5402_v33  ;;  %v5600_v52 = vld [vmem:[#allocation13 + $0x630] sm:$0xff]  ;;  %v5768_v33 = vld [vmem:[#allocation13 + $0x6a8] sm:$0xff] }
 0xf24   : > { %8283 = vmatprep.subr.mxu1 %v5401_v34 }
 0xf25   : > { %8284 = vmatpush3.msra.mxu1 %v5401_v34  ;;  %v5597_v34 = vld [vmem:[#allocation13 + $0x618] sm:$0xff] }
 0xf26   : > { %8285 = vmatprep.subr.mxu1 %v5400_v5 }
 0xf27   : > { %8286 = vmatpush3.msra.mxu1 %v5400_v5  ;;  %v5767_v5 = vld [vmem:[#allocation13 + $0x6a0] sm:$0xff] }
 0xf28   : > { %8287 = vmatprep.subr.mxu1 %v5399_v36 }
 0xf29   : > { %8288 = vmatpush3.msra.mxu1 %v5399_v36  ;;  %v5596_v36 = vld [vmem:[#allocation13 + $0x610] sm:$0xff] }
 0xf2a   : > { %8289 = vmatprep.subr.mxu1 %v5398_v37 }
 0xf2b   : > { %8290 = vmatpush3.msra.mxu1 %v5398_v37  ;;  %v5766_v37 = vld [vmem:[#allocation13 + $0x698] sm:$0xff] }
 0xf2c   : > { %8291 = vmatprep.subr.mxu1 %v5397_v38 }
 0xf2d   : > { %8292 = vmatpush3.msra.mxu1 %v5397_v38  ;;  %v5595_v38 = vld [vmem:[#allocation13 + $0x608] sm:$0xff] }
 0xf2e   : > { %8293 = vmatprep.subr.mxu1 %v5396_v39 }
 0xf2f   : > { %8294 = vmatpush3.msra.mxu1 %v5396_v39  ;;  %v5594_v39 = vld [vmem:[#allocation13 + $0x600] sm:$0xff] }
 0xf30   : > { %8295 = vmatprep.subr.mxu1 %v5395_v40 }
 0xf31   : > { %8296 = vmatpush3.msra.mxu1 %v5395_v40  ;;  %v5765_v40 = vld [vmem:[#allocation13 + $0x690] sm:$0xff] }
 0xf32   : > { %8297 = vmatprep.subr.mxu1 %v5394_v41 }
 0xf33   : > { %8298 = vmatpush3.msra.mxu1 %v5394_v41  ;;  %v5764_v41 = vld [vmem:[#allocation13 + $0x688] sm:$0xff] }
 0xf34   : > { %8299 = vmatprep.subr.mxu1 %v5393_v26 }
 0xf35   : > { %8300 = vmatpush3.msra.mxu1 %v5393_v26  ;;  %v5763_v26 = vld [vmem:[#allocation13 + $0x680] sm:$0xff] }
 0xf36   : > { %8301 = vmatprep.subr.mxu1 %v5392_v42 }
 0xf37   : > { %8302 = vmatpush3.msra.mxu1 %v5392_v42 }
 0xf38   : > { %8303 = vmatprep.subr.mxu1 %v5391_v44 }
 0xf39   : > { %8304 = vmatpush3.msra.mxu1 %v5391_v44 }
 0xfbe   : > { %v8181_v43 = vpop.f32.mrf.mxu0  ;;  %v8265_v54 = vpop.f32.mrf.mxu1 }
 0xfbf   : > { %v9490_v51 = vadd.f32 %v8181_v43, %v9478_v1 }
 0xfc0   : > { %v4943_v46 = vpop.f32.mrf.mxu0  ;;  %v5297_v56 = vpop.f32.mrf.mxu1 }
 0xfc1   : > { %v9493_v45 = vadd.f32 %v4943_v46, %v9480_v6 }
 0xfde   : > { %v8230_v47 = vpop.f32.mrf.mxu0 }
 0xfdf   : > { %v5303_v3 = vadd.f32 %v8265_v54, %v8230_v47  ;;  %v5947_v47 = vld [vmem:[#allocation13 + $0x778] sm:$0xff]  ;;  %v5944_v54 = vld [vmem:[#allocation13 + $0x760] sm:$0xff] }
 0xfe0   : > { %v5222_v48 = vpop.f32.mrf.mxu0 }
 0xfe1   : > { %v5298_v58 = vadd.f32 %v5297_v56, %v5222_v48  ;;  %v8603_v48 = vld [vmem:[#allocation11 + $0x20] sm:$0xff]  ;;  %v5943_v56 = vld [vmem:[#allocation13 + $0x758] sm:$0xff] }
 0xfe2   : > { %v8272_v49 = vpop.f32.mrf.mxu0 }
 0xfe4   : > { %v5381_v25 = vpop.f32.mrf.mxu0 }
 0xfe5   : > { %8305 = vmatprep.mubr.f32.mxu1 %v5381_v25  ;;  %v8604_v25 = vld [vmem:[#allocation11 + $0x28] sm:$0xff] }
 0xfe6   : > { %8306 = vmatmul.mubr.f32.vlgmr.msra.gmra.mxu1 %v8272_v49  ;;  %v5946_v49 = vld [vmem:[#allocation13 + $0x770] sm:$0xff] }
 0xfe7   : > { %8354 = vmatprep.mubr.msk.f32.mxu1 %vm653_vm0, %v8600_v27  ;;  %v5945_v27 = vld [vmem:[#allocation13 + $0x768] sm:$0xff] }
0x10a6   : > { %v8307_v57 = vpop.f32.mrf.mxu1 }
0x10a7   : > { %v5483_v59 = vadd.f32 %v8307_v57, %v5303_v3  ;;  %v5942_v3 = vld [vmem:[#allocation13 + $0x750] sm:$0xff]  ;;  %v5941_v57 = vld [vmem:[#allocation13 + $0x748] sm:$0xff] }
0x10a8   : > { %v5473_v61 = vpop.f32.mrf.mxu1 }
0x10a9   : > { %v5493_v62 = vmul.f32 %v6432_v12, %v5483_v59  ;;  %v5482_v63 = vadd.f32 %v5473_v61, %v5298_v58  ;;  %v5939_v58 = vld [vmem:[#allocation13 + $0x738] sm:$0xff]  ;;  %v5938_v59 = vld [vmem:[#allocation13 + $0x730] sm:$0xff]  ;;  %v5936_v61 = vld [vmem:[#allocation13 + $0x720] sm:$0xff] }
0x10ab   : > { %v5503_v1 = vadd.f32 %v6433_v60, %v5493_v62  ;;  %v5492_v2 = vmul.f32 %v6432_v12, %v5482_v63  ;;  %v5940_v12 = vld [vmem:[#allocation13 + $0x740] sm:$0xff]  ;;  %v5935_v62 = vld [vmem:[#allocation13 + $0x718] sm:$0xff]  ;;  %v5934_v63 = vld [vmem:[#allocation13 + $0x710] sm:$0xff] }
0x10ad   : > { %vm5505_vm11 = vcmp.ge.f32.partialorder %v5503_v1, 0.0  ;;  %v5515_v6 = vmul.f32 %v6434_v0, %v5503_v1  ;;  %v5502_v7 = vadd.f32 %v6433_v60, %v5492_v2  ;;  %v5937_v60 = vld [vmem:[#allocation13 + $0x728] sm:$0xff]  ;;  %v6073_v2 = vld [vmem:[#allocation14 + $0x78] sm:$0xff] }
0x10af   : > { %vm5504_vm12 = vcmp.ge.f32.partialorder %v5502_v7, 0.0  ;;  %v5514_v8 = vmul.f32 %v6434_v0, %v5502_v7  ;;  %v9496_v17 = vsel %vm5505_vm11, %v5503_v1, %v5515_v6  ;;  %v5933_v0 = vld [vmem:[#allocation13 + $0x708] sm:$0xff]  ;;  %v5932_v1 = vld [vmem:[#allocation13 + $0x700] sm:$0xff]  ;;  %v6072_v6 = vld [vmem:[#allocation14 + $0x70] sm:$0xff] }
0x10b0   : > { %8308 = vmatprep.subr.mxu0 %v9496_v17  ;;  %8350 = vmatprep.subr.mxu1 %v9496_v17 }
0x10b1   : > { %8309 = vmatpush3.msra.mxu0 %v9496_v17  ;;  %8351 = vmatpush3.msra.mxu1 %v9496_v17  ;;  %v9502_v9 = vsel %vm5504_vm12, %v5502_v7, %v5514_v8  ;;  %v6071_v7 = vld [vmem:[#allocation14 + $0x68] sm:$0xff]  ;;  %v6070_v8 = vld [vmem:[#allocation14 + $0x60] sm:$0xff] }
0x10b2   : > { %8310 = vmatprep.subr.mxu0 %v9502_v9  ;;  %8352 = vmatprep.subr.mxu1 %v9502_v9 }
0x10b3   : > { %8311 = vmatpush3.msra.mxu0 %v9502_v9  ;;  %8353 = vmatpush3.msra.mxu1 %v9502_v9 }
0x10b4   : > { %8313 = vmatmul.mubr.msk.f32.vlgmr.msra.gmra.mxu0 %vm653_vm0, %v8601_v13  ;;  %8315 = vmatprep.subr.mxu0 %v5609_v10  ;;  %v6064_v13 = vld [vmem:[#allocation14 + $0x30] sm:$0xff] }
0x10b5   : > { %8316 = vmatpush3.msra.mxu0 %v5609_v10  ;;  %8355 = vmatmul.mubr.msk.f32.vlgmr.msra.gmra.mxu1 %vm653_vm0, %v8602_v22  ;;  %v6067_v10 = vld [vmem:[#allocation14 + $0x48] sm:$0xff] }
0x10b6   : > { %8317 = vmatprep.subr.mxu0 %v5608_v11  ;;  %8357 = vmatprep.subr.mxu1 %v5778_v35 }
0x10b7   : > { %8318 = vmatpush3.msra.mxu0 %v5608_v11  ;;  %8358 = vmatpush3.msra.mxu1 %v5778_v35  ;;  %v6066_v11 = vld [vmem:[#allocation14 + $0x40] sm:$0xff]  ;;  %v6065_v35 = vld [vmem:[#allocation14 + $0x38] sm:$0xff] }
0x10b8   : > { %8319 = vmatprep.subr.mxu0 %v5607_v14  ;;  %8359 = vmatprep.subr.mxu1 %v5777_v15 }
0x10b9   : > { %8320 = vmatpush3.msra.mxu0 %v5607_v14  ;;  %8360 = vmatpush3.msra.mxu1 %v5777_v15 }
0x10ba   : > { %8321 = vmatprep.subr.mxu0 %v5606_v16  ;;  %8361 = vmatprep.subr.mxu1 %v5776_v18 }
0x10bb   : > { %8322 = vmatpush3.msra.mxu0 %v5606_v16  ;;  %8362 = vmatpush3.msra.mxu1 %v5776_v18 }
0x10bc   : > { %8323 = vmatprep.subr.mxu0 %v5605_v19  ;;  %8363 = vmatprep.subr.mxu1 %v5775_v20 }
0x10bd   : > { %8324 = vmatpush3.msra.mxu0 %v5605_v19  ;;  %8364 = vmatpush3.msra.mxu1 %v5775_v20  ;;  %v6063_v20 = vld [vmem:[#allocation14 + $0x28] sm:$0xff] }
0x10be   : > { %8325 = vmatprep.subr.mxu0 %v5604_v21  ;;  %8365 = vmatprep.subr.mxu1 %v5774_v23 }
0x10bf   : > { %8326 = vmatpush3.msra.mxu0 %v5604_v21  ;;  %8366 = vmatpush3.msra.mxu1 %v5774_v23  ;;  %v6062_v21 = vld [vmem:[#allocation14 + $0x20] sm:$0xff]  ;;  %v6061_v23 = vld [vmem:[#allocation14 + $0x18] sm:$0xff] }
0x10c0   : > { %8327 = vmatprep.subr.mxu0 %v5603_v24  ;;  %8367 = vmatprep.subr.mxu1 %v5773_v50 }
0x10c1   : > { %8328 = vmatpush3.msra.mxu0 %v5603_v24  ;;  %8368 = vmatpush3.msra.mxu1 %v5773_v50  ;;  %v6060_v24 = vld [vmem:[#allocation14 + $0x10] sm:$0xff]  ;;  %v6059_v50 = vld [vmem:[#allocation14 + $0x8] sm:$0xff] }
0x10c2   : > { %8329 = vmatprep.subr.mxu0 %v5602_v28  ;;  %8369 = vmatprep.subr.mxu1 %v5772_v53 }
0x10c3   : > { %8330 = vmatpush3.msra.mxu0 %v5602_v28  ;;  %8370 = vmatpush3.msra.mxu1 %v5772_v53 }
0x10c4   : > { %8331 = vmatprep.subr.mxu0 %v5601_v29  ;;  %8371 = vmatprep.subr.mxu1 %v5771_v30 }
0x10c5   : > { %8332 = vmatpush3.msra.mxu0 %v5601_v29  ;;  %8372 = vmatpush3.msra.mxu1 %v5771_v30  ;;  %v6441_v30 = vld [vmem:[%s9594_s8] ss:$0 sm:$0xff] }
0x10c6   : > { %8333 = vmatprep.subr.mxu0 %v5600_v52  ;;  %8373 = vmatprep.subr.mxu1 %v5770_v55 }
0x10c7   : > { %8334 = vmatpush3.msra.mxu0 %v5600_v52  ;;  %8374 = vmatpush3.msra.mxu1 %v5770_v55 }
0x10c8   : > { %8335 = vmatprep.subr.mxu0 %v5599_v31  ;;  %8375 = vmatprep.subr.mxu1 %v5769_v32 }
0x10c9   : > { %8336 = vmatpush3.msra.mxu0 %v5599_v31  ;;  %8376 = vmatpush3.msra.mxu1 %v5769_v32  ;;  %v6443_v31 = vld [vmem:[%s9594_s8 + $0x1] ss:$0 sm:$0xff] }
0x10ca   : > { %8337 = vmatprep.subr.mxu0 %v5598_v4  ;;  %8377 = vmatprep.subr.mxu1 %v5768_v33 }
0x10cb   : > { %8338 = vmatpush3.msra.mxu0 %v5598_v4  ;;  %8378 = vmatpush3.msra.mxu1 %v5768_v33 }
0x10cc   : > { %8339 = vmatprep.subr.mxu0 %v5597_v34  ;;  %8379 = vmatprep.subr.mxu1 %v5767_v5 }
0x10cd   : > { %8340 = vmatpush3.msra.mxu0 %v5597_v34  ;;  %8380 = vmatpush3.msra.mxu1 %v5767_v5 }
0x10ce   : > { %8341 = vmatprep.subr.mxu0 %v5596_v36  ;;  %8381 = vmatprep.subr.mxu1 %v5766_v37 }
0x10cf   : > { %8342 = vmatpush3.msra.mxu0 %v5596_v36  ;;  %8382 = vmatpush3.msra.mxu1 %v5766_v37  ;;  %v6445_v36 = vld [vmem:[%s9594_s8 + $0x2] ss:$0 sm:$0xff] }
0x10d0   : > { %8343 = vmatprep.subr.mxu0 %v5595_v38  ;;  %8383 = vmatprep.subr.mxu1 %v5765_v40 }
0x10d1   : > { %8344 = vmatpush3.msra.mxu0 %v5595_v38  ;;  %8384 = vmatpush3.msra.mxu1 %v5765_v40 }
0x10d2   : > { %8345 = vmatprep.subr.mxu0 %v5594_v39  ;;  %8385 = vmatprep.subr.mxu1 %v5764_v41 }
0x10d3   : > { %8346 = vmatpush3.msra.mxu0 %v5594_v39  ;;  %8386 = vmatpush3.msra.mxu1 %v5764_v41 }
0x10d4   : > { %8392 = vmatprep.subr.mxu0 %v9496_v17  ;;  %8387 = vmatprep.subr.mxu1 %v5763_v26 }
0x10d5   : > { %8388 = vmatpush3.msra.mxu1 %v5763_v26  ;;  %v6446_v26 = vld [vmem:[%s9596_s10] ss:$0 sm:$0xff] }
0x10d6   : > { %8434 = vmatprep.subr.mxu1 %v6073_v2 }
0x1174   : > { %v8314_v42 = vpop.f32.mrf.mxu0 }
0x1175   : > { %v8356_v44 = vpop.f32.mrf.mxu1 }
0x1176   : > { %v5584_v43 = vpop.f32.mrf.mxu0 }
0x1177   : > { %8347 = vmatprep.mubr.f32.mxu0 %v5584_v43  ;;  %v5753_v46 = vpop.f32.mrf.mxu1 }
0x1178   : > { %8348 = vmatmul.mubr.f32.vlgmr.msra.gmra.mxu0 %v8314_v42  ;;  %8389 = vmatprep.mubr.f32.mxu1 %v5753_v46  ;;  %v6450_v46 = vld [vmem:[%s9596_s10 + $0x2] ss:$0 sm:$0xff] }
0x1179   : > { %8393 = vmatpush3.msra.mxu0 %v9496_v17  ;;  %8390 = vmatmul.mubr.f32.vlgmr.msra.gmra.mxu1 %v8356_v44  ;;  %v6069_v17 = vld [vmem:[#allocation14 + $0x58] sm:$0xff]  ;;  %v6448_v44 = vld [vmem:[%s9596_s10 + $0x1] ss:$0 sm:$0xff] }
0x117a   : > { %8394 = vmatprep.subr.mxu0 %v9502_v9  ;;  %8396 = vmatprep.mubr.msk.f32.mxu0 %vm653_vm0, %v8603_v48 }
0x117b   : > { %8395 = vmatpush3.msra.mxu0 %v9502_v9  ;;  %8435 = vmatpush3.msra.mxu1 %v6073_v2  ;;  %v6068_v9 = vld [vmem:[#allocation14 + $0x50] sm:$0xff] }
0x117c   : > { %8397 = vmatmul.mubr.msk.f32.vlgmr.msra.gmra.mxu0 %vm653_vm0, %v8604_v25  ;;  %8399 = vmatprep.subr.mxu0 %v5947_v47 }
0x117d   : > { %8400 = vmatpush3.msra.mxu0 %v5947_v47  ;;  %8436 = vmatprep.subr.mxu1 %v6072_v6 }
0x117e   : > { %8401 = vmatprep.subr.mxu0 %v5946_v49  ;;  %8437 = vmatpush3.msra.mxu1 %v6072_v6 }
0x117f   : > { %8402 = vmatpush3.msra.mxu0 %v5946_v49  ;;  %8438 = vmatprep.subr.mxu1 %v6071_v7 }
0x1180   : > { %8403 = vmatprep.subr.mxu0 %v5945_v27  ;;  %8439 = vmatpush3.msra.mxu1 %v6071_v7 }
0x1181   : > { %8404 = vmatpush3.msra.mxu0 %v5945_v27  ;;  %8440 = vmatprep.subr.mxu1 %v6070_v8 }
0x1182   : > { %8405 = vmatprep.subr.mxu0 %v5944_v54  ;;  %8441 = vmatpush3.msra.mxu1 %v6070_v8 }
0x1183   : > { %8406 = vmatpush3.msra.mxu0 %v5944_v54  ;;  %8442 = vmatprep.subr.mxu1 %v6069_v17 }
0x1184   : > { %8407 = vmatprep.subr.mxu0 %v5943_v56  ;;  %8443 = vmatpush3.msra.mxu1 %v6069_v17 }
0x1185   : > { %8408 = vmatpush3.msra.mxu0 %v5943_v56  ;;  %8444 = vmatprep.subr.mxu1 %v6068_v9 }
0x1186   : > { %8409 = vmatprep.subr.mxu0 %v5942_v3  ;;  %8445 = vmatpush3.msra.mxu1 %v6068_v9 }
0x1187   : > { %8410 = vmatpush3.msra.mxu0 %v5942_v3  ;;  %8446 = vmatprep.subr.mxu1 %v6067_v10 }
0x1188   : > { %8411 = vmatprep.subr.mxu0 %v5941_v57  ;;  %8447 = vmatpush3.msra.mxu1 %v6067_v10 }
0x1189   : > { %8412 = vmatpush3.msra.mxu0 %v5941_v57  ;;  %8448 = vmatprep.subr.mxu1 %v6066_v11 }
0x118a   : > { %8413 = vmatprep.subr.mxu0 %v5940_v12  ;;  %8449 = vmatpush3.msra.mxu1 %v6066_v11 }
0x118b   : > { %8414 = vmatpush3.msra.mxu0 %v5940_v12  ;;  %8450 = vmatprep.subr.mxu1 %v6065_v35 }
0x118c   : > { %8415 = vmatprep.subr.mxu0 %v5939_v58  ;;  %8451 = vmatpush3.msra.mxu1 %v6065_v35 }
0x118d   : > { %8416 = vmatpush3.msra.mxu0 %v5939_v58  ;;  %8452 = vmatprep.subr.mxu1 %v6064_v13 }
0x118e   : > { %8417 = vmatprep.subr.mxu0 %v5938_v59  ;;  %8453 = vmatpush3.msra.mxu1 %v6064_v13 }
0x118f   : > { %8418 = vmatpush3.msra.mxu0 %v5938_v59  ;;  %8454 = vmatprep.subr.mxu1 %v6063_v20 }
0x1190   : > { %8419 = vmatprep.subr.mxu0 %v5937_v60  ;;  %8455 = vmatpush3.msra.mxu1 %v6063_v20 }
0x1191   : > { %8420 = vmatpush3.msra.mxu0 %v5937_v60  ;;  %8456 = vmatprep.subr.mxu1 %v6062_v21 }
0x1192   : > { %8421 = vmatprep.subr.mxu0 %v5936_v61  ;;  %8457 = vmatpush3.msra.mxu1 %v6062_v21 }
0x1193   : > { %8422 = vmatpush3.msra.mxu0 %v5936_v61  ;;  %8458 = vmatprep.subr.mxu1 %v6061_v23 }
0x1194   : > { %8423 = vmatprep.subr.mxu0 %v5935_v62  ;;  %8459 = vmatpush3.msra.mxu1 %v6061_v23 }
0x1195   : > { %8424 = vmatpush3.msra.mxu0 %v5935_v62  ;;  %8460 = vmatprep.subr.mxu1 %v6060_v24 }
0x1196   : > { %8425 = vmatprep.subr.mxu0 %v5934_v63  ;;  %8461 = vmatpush3.msra.mxu1 %v6060_v24 }
0x1197   : > { %8426 = vmatpush3.msra.mxu0 %v5934_v63  ;;  %8462 = vmatprep.subr.mxu1 %v6059_v50 }
0x1198   : > { %8427 = vmatprep.subr.mxu0 %v5933_v0  ;;  %8463 = vmatpush3.msra.mxu1 %v6059_v50 }
0x1199   : > { %8428 = vmatpush3.msra.mxu0 %v5933_v0 }
0x119a   : > { %8429 = vmatprep.subr.mxu0 %v5932_v1 }
0x119b   : > { %8430 = vmatpush3.msra.mxu0 %v5932_v1 }
0x1238   : > { %v8349_v22 = vpop.f32.mrf.mxu0 }
0x1239   : > { %v5686_v14 = vadd.f32 %v8349_v22, %v9490_v51  ;;  %v6058_v51 = vld [vmem:[#allocation14] sm:$0xff] }
0x123a   : > { %v5676_v15 = vpop.f32.mrf.mxu0  ;;  %8464 = vmatprep.subr.mxu1 %v6058_v51 }
0x123b   : > { %v5685_v16 = vadd.f32 %v5676_v15, %v9493_v45  ;;  %8465 = vmatpush3.msra.mxu1 %v6058_v51  ;;  %v8391_v45 = vpop.f32.mrf.mxu1 }
0x123c   : > { %v8398_v18 = vpop.f32.mrf.mxu0  ;;  %v5855_v53 = vadd.f32 %v8391_v45, %v5686_v14 }
0x123d   : > { %v5845_v28 = vpop.f32.mrf.mxu1 }
0x123e   : > { %v5922_v19 = vpop.f32.mrf.mxu0  ;;  %v5854_v52 = vadd.f32 %v5845_v28, %v5685_v16 }
0x123f   : > { %8431 = vmatprep.mubr.f32.mxu0 %v5922_v19 }
0x1240   : > { %8432 = vmatmul.mubr.f32.vlgmr.msra.gmra.mxu0 %v8398_v18 }
0x1300   : > { %v8433_v29 = vpop.f32.mrf.mxu0 }
0x1301   : > { %v6024_v55 = vadd.f32 %v8433_v29, %v5855_v53 }
0x1302   : > { %v6014_v32 = vpop.f32.mrf.mxu0 }
0x1303   : > { %v6033_v4 = vmul.f32 %v6441_v30, %v6024_v55  ;;  %v6023_v33 = vadd.f32 %v6014_v32, %v5854_v52 }
0x1305   : > { %v6043_v34 = vadd.f32 %v6443_v31, %v6033_v4  ;;  %v6032_v5 = vmul.f32 %v6441_v30, %v6023_v33 }
0x1307   : > { %v6042_v37 = vadd.f32 %v6443_v31, %v6032_v5  ;;  %v6055_v38 = vmul.f32 %v6445_v36, %v6043_v34  ;;  %vm6045_vm14 = vcmp.ge.f32.partialorder %v6043_v34, 0.0 }
0x1309   : > { %vm6044_vm13 = vcmp.ge.f32.partialorder %v6042_v37, 0.0  ;;  %v6054_v39 = vmul.f32 %v6445_v36, %v6042_v37  ;;  %v6057_v41 = vsel %vm6045_vm14, %v6043_v34, %v6055_v38 }
0x130b   : > { %v6056_v40 = vsel %vm6044_vm13, %v6042_v37, %v6054_v39 }
0x130c   : > { %8466 = vmatprep.mubr.f32.mxu1 %v6056_v40 }
0x130d   : > { %8467 = vmatmul.mubr.f32.vlgmr.msra.gmra.mxu1 %v6057_v41 }
0x13cd   : > { %v8468_v42 = vpop.f32.mrf.mxu1 }
0x13ce   : > { %v6157_v43 = vmul.f32 %v8468_v42, %v6446_v26 }
0x13cf   : > { %v6140_v47 = vpop.f32.mrf.mxu1 }
0x13d0   : > { %v6167_v48 = vadd.f32 %v6448_v44, %v6157_v43  ;;  %v6156_v49 = vmul.f32 %v6446_v26, %v6140_v47 }
0x13d2   : > { %vm6169_vm15 = vcmp.ge.f32.partialorder %v6167_v48, 0.0  ;;  %v6179_v25 = vmul.f32 %v6450_v46, %v6167_v48  ;;  %v6166_v27 = vadd.f32 %v6448_v44, %v6156_v49 }
0x13d4   : > { %v6181_v54 = vsel %vm6169_vm15, %v6167_v48, %v6179_v25  ;;  %vm6168_vm0 = vcmp.ge.f32.partialorder %v6166_v27, 0.0  ;;  %v6178_v56 = vmul.f32 %v6450_v46, %v6166_v27 }
0x13d5   : > { %6183 = vst [vmem:[%s506_s27 + $0x8] sm:$0xff] %v6181_v54 }
0x13d6   : > { %v6180_v3 = vsel %vm6168_vm0, %v6166_v27, %v6178_v56 }
0x13d7   : > { %6182 = vst [vmem:[%s506_s27] sm:$0xff] %v6180_v3 }
0x13d8   : > { %8828 = shalt.err (!%p8825_p8)
}
0x13d9   : > { %s8829_s3 = scalar_lea.hbm %s9543_s29, 256  ;;  %s8833_s12 = scalar_lea.hbm %s9597_s11, 512 }
0x13da   : > { %p8830_p6 = scmp.ne.s32.totalorder %s9543_s29, %s8829_s3  ;;  %p8834_p13 = scmp.lt.s32.totalorder %s9543_s29, %s9597_s11 }
0x13db   : > { %p8835_p2 = scmp.lt.s32.totalorder %s8833_s12, %s8829_s3 }
0x13dc   : > { %p8831_p11 = pnand %p8830_p6, %p9637_p9 }
0x13dd   : > { %p8836_p5 = por %p8835_p2, %p8834_p13 }
0x13de   : > { %p8832_p7 = pneg %p8831_p11 }
0x13e0   : > { %p8837_p10 = pnand %p8836_p5, %p8832_p7 }
0x13e2   : > { %8840 = shalt.err (!%p8837_p10)
}
0x13e3   : > { %s8911_s28 = smov 128   ;;  %s8912_s4 = smov 8  }
0x13e4   : > { %8499 = dma.vmem_to_hbm [thread:$0]  (%p9637_p9), %s9538_s22, 256, %s9543_s29, %s6185_s23, %s8911_s28, %s8911_s28, %s8912_s4  }
0x13e5 PF: > { %s6213_s6 = sand.u32 1, %s8883_s17   ;;  %p9638_p12 = scmp.ne.s32.totalorder %s9624_s16, 0 }
0x13e6   : > { %p9639_p0 = scmp.ge.s32.totalorder %s8895_s20, 2  ;;  %s6214_s13 = scalar_lea.sflag [#allocation4], %s6213_s6 }
0x13e8   : > { %p8528_p1 = pnand %p9639_p0, %p9638_p12 }
0x13ea   : > { %p8529_p3 = pneg %p8528_p1 }
0x13ec   : > { %8878 = dma.done.wait (%p8529_p3), %s6214_s13, 256  }
0x13ed   : > { %8880 = vsyncadd (%p8529_p3), %s6214_s13, 4294967040  ;;  %p28_p4 = scmp.ge.s32.totalorder %s9103_s30, 4   ;;  %s9640_s17 = smov %s8887_s18 }
0x13ee   : > { %s9641_s18 = smov %s8891_s19  ;;  %s9642_s19 = smov %s9115_s25 }
0x13ef   : > { %s9643_s20 = smov %s9103_s30  ;;  %30 = sbr.rel (!%p28_p4) target bundleno = 15 (0xf), region = 201 }
0x13f4   :  { %6219 = vsyncpa [#allocation3], 1 }
0x13f5   :  { %6221 = vsyncpa [#allocation3 + $0x1], 1 }
0x13f6   :  { %6222 = vsyncpa [#allocation6], 1 }
0x13f7   :  { %6223 = vsyncpa [#allocation9], 1 }
0x13f8   :  { %6224 = vsyncpa [#allocation12], 1 }
0x13f9   :  { %6225 = vsyncpa [#allocation15], 1 }
0x13fa   :  { %6226 = vsyncpa [#allocation4], 1 }
0x13fb   :  { %6228 = vsyncpa [#allocation4 + $0x1], 1 }

</bundles_post_ra>
